<compile_context>
chip_gen: v5e
topology: v5e:2x2
jax: 0.10.0
libtpu: 0.0.40
codegen_flags: <defaults>
</compile_context>

<pallas_src>
import jax
import jax.numpy as jnp
from jax.experimental import pallas as pl
from jax.experimental.pallas import tpu as pltpu


def _siren_kernel(x_ref, w_ref, b_ref, o_ref):
    # x_ref: [tile_n, in_features], w_ref: [in_features, out_features*F],
    # b_ref: [1, out_features*F],   o_ref: [tile_n, out_features*F]
    z = jnp.dot(x_ref[...], w_ref[...], preferred_element_type=jnp.float32)
    o_ref[...] = jnp.sin(z + b_ref[...]).astype(o_ref.dtype)


def learnable_freq_siren_forward(x, weight, bias, omega, *, tile_n=None):
    """LearnableFreqSIRENLayer forward.

    x:      [N, in_features]              float32
    weight: [out_features, in_features]   (PyTorch nn.Linear layout)
    bias:   [out_features]
    omega:  [num_frequencies]             learnable frequencies
    returns [N, out_features * num_frequencies]
    """
    N, in_features = x.shape
    out_features = weight.shape[0]
    num_freq = omega.shape[0]
    out_dim = out_features * num_freq

    # Fold the learnable frequencies into an expanded weight/bias (tiny one-time op):
    #   sin(omega[f] * (x @ W[j] + b[j])) == sin(x @ (omega[f]*W[j]) + omega[f]*b[j])
    # Column order j*F + f matches torch's .view(B, -1) flattening.
    w_t = weight.T                                                   # [in, out]
    w_eff = (w_t[:, :, None] * omega[None, None, :]).reshape(in_features, out_dim)
    b_eff = (bias[:, None] * omega[None, :]).reshape(1, out_dim)

    if tile_n is None:
        # Big slabs amortize per-grid-step overhead; keep >= 2 steps when the
        # batch allows so both v7x TensorCores get work.
        tile_n = min(1024, pl.next_power_of_2(max(1, pl.cdiv(N, 2))))
    tile_n = max(8, ((tile_n + 7) // 8) * 8)     # sublane (8) alignment

    grid = (pl.cdiv(N, tile_n),)                 # ragged N: last block is padded/masked

    return pl.pallas_call(
        _siren_kernel,
        out_shape=jax.ShapeDtypeStruct((N, out_dim), x.dtype),
        grid_spec=pltpu.PrefetchScalarGridSpec(
            num_scalar_prefetch=0,
            grid=grid,
            in_specs=[
                pl.BlockSpec((tile_n, in_features), lambda i: (i, 0)),    # x slab
                pl.BlockSpec((in_features, out_dim), lambda i: (0, 0)),   # W_eff (resident)
                pl.BlockSpec((1, out_dim), lambda i: (0, 0)),             # b_eff (resident)
            ],
            out_specs=pl.BlockSpec((tile_n, out_dim), lambda i: (i, 0)),  # lane-dense out
        ),
        compiler_params=pltpu.CompilerParams(
            dimension_semantics=("parallel",)),
    )(x, w_eff, b_eff)


def init_siren_params(key, in_features, out_features, num_frequencies=4,
                      is_first=False, omega_init_range=(1.0, 60.0)):
    """Deterministic init matching the PyTorch module's _init_weights + nn.Linear bias."""
    kw, kb = jax.random.split(key)
    if is_first:
        w_bound = 1.0 / in_features
    else:
        w_bound = 6.0 / in_features
    weight = jax.random.uniform(kw, (out_features, in_features), jnp.float32,
                                -w_bound, w_bound)
    b_bound = 1.0 / float(jnp.sqrt(in_features))
    bias = jax.random.uniform(kb, (out_features,), jnp.float32, -b_bound, b_bound)
    low, high = omega_init_range
    omega = jnp.linspace(low, high, num_frequencies, dtype=jnp.float32)
    return weight, bias, omega


def siren_reference(x, weight, bias, omega):
    """Pure-JAX reference that mirrors the PyTorch forward exactly."""
    z = x @ weight.T + bias                                   # [N, out_features]
    out = jnp.sin(omega[None, None, :] * z[:, :, None])       # [N, out_features, F]
    return out.reshape(x.shape[0], -1)


if __name__ == "__main__":
    key = jax.random.PRNGKey(0)
    k_x, k_p = jax.random.split(key)

    # Small shapes consistent with the module: coords -> SIREN layer with
    # out_features=32, num_frequencies=4  ->  output width 128 (lane-dense).
    N, in_features, out_features, num_freq = 256, 2, 32, 4

    x = jax.random.normal(k_x, (N, in_features), jnp.float32)
    weight, bias, omega = init_siren_params(
        k_p, in_features, out_features, num_frequencies=num_freq, is_first=True)

    out = learnable_freq_siren_forward(x, weight, bias, omega)
    out = jax.block_until_ready(out)

    ref = siren_reference(x, weight, bias, omega)
    assert out.shape == (N, out_features * num_freq)
    assert jnp.allclose(out, ref, atol=1e-4, rtol=1e-4), (
        f"Pallas output mismatch vs JAX reference, max abs err "
        f"{float(jnp.max(jnp.abs(out - ref)))}")

    print("KERNEL_OK")
</pallas_src>

<mosaic_0001>
module attributes {stable_mosaic.version = 11 : i64} {
  func.func @_siren_kernel(%arg0: i32, %arg1: memref<128x2xf32, #tpu.memory_space<vmem>>, %arg2: memref<2x128xf32, #tpu.memory_space<vmem>>, %arg3: memref<1x128xf32, #tpu.memory_space<vmem>>, %arg4: memref<128x128xf32, #tpu.memory_space<vmem>>) attributes {dimension_semantics = [#tpu.dimension_semantics<parallel>], iteration_bounds = array<i64: 2>, scalar_prefetch = 0 : i64, scratch_operands = 0 : i64, tpu.core_type = #tpu.core_type<tc>, window_params = [{transform_indices = @transform_0, window_bounds = array<i64: 128, 2>}, {pipeline_mode = #tpu.pipeline_mode<synchronous>, transform_indices = @transform_1, window_bounds = array<i64: 2, 128>}, {pipeline_mode = #tpu.pipeline_mode<synchronous>, transform_indices = @transform_2, window_bounds = array<i64: 1, 128>}, {transform_indices = @transform_3, window_bounds = array<i64: 128, 128>}]} {
    %c0 = arith.constant 0 : index
    %c0_0 = arith.constant 0 : index
    %0 = vector.load %arg1[%c0, %c0_0] : memref<128x2xf32, #tpu.memory_space<vmem>>, vector<128x2xf32>
    %c0_1 = arith.constant 0 : index
    %c0_2 = arith.constant 0 : index
    %1 = vector.load %arg2[%c0_1, %c0_2] : memref<2x128xf32, #tpu.memory_space<vmem>>, vector<2x128xf32>
    %cst = arith.constant dense<0.000000e+00> : vector<128x128xf32>
    %2 = tpu.matmul %0, %1, %cst {dimension_numbers = #tpu.dot_dimension_numbers<[1], [0], [0], [1], [0, 0, 1, 1], [], []>} : vector<128x2xf32>, vector<2x128xf32>, vector<128x128xf32> -> vector<128x128xf32>
    %c0_3 = arith.constant 0 : index
    %c0_4 = arith.constant 0 : index
    %3 = vector.load %arg3[%c0_3, %c0_4] : memref<1x128xf32, #tpu.memory_space<vmem>>, vector<1x128xf32>
    %4 = vector.broadcast %3 : vector<1x128xf32> to vector<128x128xf32>
    %5 = arith.addf %2, %4 : vector<128x128xf32>
    %6 = math.sin %5 : vector<128x128xf32>
    %c0_5 = arith.constant 0 : index
    %c0_6 = arith.constant 0 : index
    %7 = vector.load %arg4[%c0_5, %c0_6] : memref<128x128xf32, #tpu.memory_space<vmem>>, vector<128x128xf32>
    tpu.vector_store %arg4[%c0_5, %c0_6], %6 {strides = array<i32>} : memref<128x128xf32, #tpu.memory_space<vmem>>, vector<128x128xf32>,
    return
  }
  func.func @transform_0(%arg0: i32) -> (i32, i32) {
    %c0_i32 = arith.constant 0 : i32
    %c0_i32_0 = arith.constant 0 : i32
    return %arg0, %c0_i32 : i32, i32
  }
  func.func @transform_1(%arg0: i32) -> (i32, i32) {
    %c0_i32 = arith.constant 0 : i32
    %c0_i32_0 = arith.constant 0 : i32
    %c0_i32_1 = arith.constant 0 : i32
    return %c0_i32, %c0_i32_0 : i32, i32
  }
  func.func @transform_2(%arg0: i32) -> (i32, i32) {
    %c0_i32 = arith.constant 0 : i32
    %c0_i32_0 = arith.constant 0 : i32
    %c0_i32_1 = arith.constant 0 : i32
    return %c0_i32, %c0_i32_0 : i32, i32
  }
  func.func @transform_3(%arg0: i32) -> (i32, i32) {
    %c0_i32 = arith.constant 0 : i32
    %c0_i32_0 = arith.constant 0 : i32
    return %arg0, %c0_i32 : i32, i32
  }
}

</mosaic_0001>

<bundles_post_ra>
// kernel: tpu_custom_call.1
= control target key start
LH: loop header
LB: loop body
LE: loop exit
PB: predicated region body
PF: predicated region fallthrough
CT: control target
= control target key end

     0   :  { %8 = vsyncpa [#allocation3], 0  ;;  %s5042_s0 = inlined_call_operand.vmem [shape: f32[256,2], index: 0, kind: input, shape index: {}]   ;;  %s5043_s1 = inlined_call_operand.vmem [shape: f32[2,128], index: 1, kind: input, shape index: {}]   ;;  %s5044_s2 = inlined_call_operand.vmem [shape: f32[1,128], index: 2, kind: input, shape index: {}]   ;;  %s5045_s3 = inlined_call_operand.hbm [shape: f32[256,128], index: 3, kind: output, shape index: {}]  }
   0x1   :  { %10 = vsyncpa [#allocation3 + $0x1], 0  ;;  %s3111_s12 = smov 0   ;;  %s3113_s13 = smov 0  }
   0x2   :  { %s3115_s14 = smov 0   ;;  %s3117_s15 = smov 0  }
   0x3 LB: > { %s3132_s16 = sadd.s32 4294967295, %s3080_s15   ;;  %s2885_s17 = sadd.s32 4294967294, %s3080_s15   ;;  %s3080_s15 = sphi %s3117_s15, %s5081_s15   ;;  %s3076_s14 = sphi %s3115_s14, %s5080_s14   ;;  %s3072_s13 = sphi %s3113_s13, %s5079_s13   ;;  %s3068_s12 = sphi %s3111_s12, %s5078_s12  }
   0x4   : > { %s3136_s18 = sadd.s32 1, %s3080_s15   ;;  %s91_s19 = sadd.s32 1, %s3076_s14 }
   0x5   : > { %s88_s20 = ssub.s32 %s3080_s15, %s3136_s18  ;;  %p101_p0 = scmp.ne.s32.totalorder %s3076_s14, %s3072_s13 }
   0x6   : > { %p89_p1 = scmp.eq.s32.totalorder %s88_s20, 0  ;;  %p102_p2 = scmp.eq.s32.totalorder %s3132_s16, 1 }
   0x7   : > { %p107_p3 = scmp.ne.s32.totalorder %s3072_s13, %s3068_s12  ;;  %p108_p4 = scmp.eq.s32.totalorder %s2885_s17, 1 }
   0x8   : > { %s3147_s21 = scalar_select %p89_p1, %s3076_s14, %s91_s19  }
   0x9   : > { %p3149_p5 = por %p102_p2, %p101_p0  ;;  %p3153_p6 = por %p108_p4, %p107_p3 }
   0xa   : > { %p2888_p7 = scmp.ge.s32.totalorder %s3080_s15, 1  ;;  %p141_p8 = scmp.lt.s32.totalorder %s3080_s15, 3 }
   0xc   : > { %p142_p9 = pnand %p2888_p7, %p141_p8 }
   0xd   : > { %s2890_s24 = sshll.u32 (!%p142_p9), %s3132_s16, 4  ;;  %s162_s6 = sand.u32 (!%p142_p9), 1, %s3072_s13  }
   0xe   : > { %145 = sbr.rel (%p142_p9) target bundleno = 796 (0x31c), region = 32  ;;  %p166_p10 = scmp.lt.s32.totalorder (!%p142_p9), %s2890_s24, 31 }
   0xf   : > { %s2889_s7 = sshll.u32 (!%p142_p9), %s162_s6, 7  ;;  %s3038_s9 = scalar_lea.hbm (!%p142_p9), %s5045_s3, 256 }
  0x10   : > { %s3440_s8 = scalar_lea.vmem (!%p142_p9), [#allocation2], %s2889_s7 }
  0x11   : > { %s2820_s28 = sshll.u32 (!%p142_p9), %s3440_s8, 4  ;;  %s2821_s28 = int_to_ptr.vmem [resolvable:$true] %s2820_s28 }
  0x13   : > { %v188_v0 = vld [vmem:[%s5043_s1] sm:$0x3]  ;;  %vm242_vm0 = vcmask 1041408   ;;  %s5083_s24 = smov (!%p166_p10, %s2890_s24), 31  ;;  %vm193_vm1 = vcmask 15360  }
  0x14   : > { %2892 = vmatpush.msk.msra.mxu0 %vm242_vm0, %v188_v0  ;;  %2963 = vmatpush.msk.msra.mxu1 %vm242_vm0, %v188_v0  ;;  %s2891_s27 = sshll.u32 %s5083_s24, 3  ;;  %v3185_v17 = vld [vmem:[%s5044_s2] ss:$0 sm:$0xff]  ;;  %v3082_v34 = vmov 683565275   ;;  %s2962_s24 = sshll.u32 %s3132_s16, 7 }
  0x15   : > { %2964 = vmatpush.msk.msra.mxu2 %vm242_vm0, %v188_v0  ;;  %2965 = vmatpush.msk.msra.mxu3 %vm242_vm0, %v188_v0  ;;  %s169_s30 = scalar_lea.vmem %s5042_s0, %s2891_s27  ;;  %v3083_v36 = vmov 2475754826   ;;  %v3084_v38 = vmov 2131351028   ;;  %v3085_v40 = vmov 2102212464   ;;  %s2819_s27 = scalar_lea.hbm %s5045_s3, %s2962_s24 }
  0x16   : > { %v172_v1 = vld [vmem:[%s169_s30] sm:$0xff]  ;;  %v173_v5 = vld [vmem:[%s169_s30 + $0x8] sm:$0xff]  ;;  %v174_v9 = vld [vmem:[%s169_s30 + $0x10] sm:$0xff]  ;;  %v3086_v43 = vmov 920167782   ;;  %s2822_s29 = sshll.u32 %s2819_s27, 4  ;;  %s2823_s29 = int_to_ptr.hbm [resolvable:$true] %s2822_s29 }
  0x17   : > { %v176_v2 = vld [vmem:[%s169_s30 + $0x20] sm:$0xff]  ;;  %2893 = vmatmul.msk.f32.vlgmr.msra.gmra.mxu0 %vm193_vm1, %v172_v1  ;;  %v177_v6 = vld [vmem:[%s169_s30 + $0x28] sm:$0xff]  ;;  %v178_v10 = vld [vmem:[%s169_s30 + $0x30] sm:$0xff]  ;;  %v3087_v52 = vmov 1326507024   ;;  %s2808_s16 = scalar_lea.sflag [#allocation3], %s162_s6 }
  0x18   : > { %v180_v3 = vld [vmem:[%s169_s30 + $0x40] sm:$0xff]  ;;  %2897 = vmatmul.msk.f32.vlgmr.msra.gmra.mxu1 %vm193_vm1, %v176_v2  ;;  %v181_v7 = vld [vmem:[%s169_s30 + $0x48] sm:$0xff]  ;;  %v182_v11 = vld [vmem:[%s169_s30 + $0x50] sm:$0xff] }
  0x19   : > { %2901 = vmatmul.msk.f32.vlgmr.msra.gmra.mxu2 %vm193_vm1, %v180_v3  ;;  %v184_v4 = vld [vmem:[%s169_s30 + $0x60] sm:$0xff]  ;;  %v185_v8 = vld [vmem:[%s169_s30 + $0x68] sm:$0xff]  ;;  %v186_v12 = vld [vmem:[%s169_s30 + $0x70] sm:$0xff] }
  0x1a   : > { %2905 = vmatmul.msk.f32.vlgmr.msra.gmra.mxu3 %vm193_vm1, %v184_v4  ;;  %v175_v13 = vld [vmem:[%s169_s30 + $0x18] sm:$0xff] }
  0x1b   : > { %v179_v14 = vld [vmem:[%s169_s30 + $0x38] sm:$0xff] }
  0x1c   : > { %v183_v15 = vld [vmem:[%s169_s30 + $0x58] sm:$0xff] }
  0x1d   : > { %v187_v16 = vld [vmem:[%s169_s30 + $0x78] sm:$0xff]  ;;  %s3032_s30 = sshra.s32 %s2823_s29, 4  ;;  %s3033_s30 = int_to_ptr.hbm [resolvable:$true] %s3032_s30 }
  0x1e   : > { %s3034_s4 = scalar_lea.hbm %s3033_s30, 128  ;;  %p3039_p0 = scmp.lt.s32.totalorder %s3033_s30, %s5045_s3 }
  0x1f   : > { %2894 = vmatmul.msk.f32.gmra.mxu0 %vm193_vm1, %v173_v5  ;;  %p3035_p11 = scmp.ne.s32.totalorder %s3033_s30, %s3034_s4  ;;  %p3040_p1 = scmp.lt.s32.totalorder %s3038_s9, %s3034_s4 }
  0x20   : > { %2898 = vmatmul.msk.f32.gmra.mxu1 %vm193_vm1, %v177_v6 }
  0x21   : > { %2902 = vmatmul.msk.f32.gmra.mxu2 %vm193_vm1, %v181_v7  ;;  %p3036_p12 = pnand %p3035_p11, %p3149_p5  ;;  %p3041_p2 = por %p3040_p1, %p3039_p0 }
  0x22   : > { %2906 = vmatmul.msk.f32.gmra.mxu3 %vm193_vm1, %v185_v8 }
  0x23   : > { %p3037_p13 = pneg %p3036_p12 }
  0x25   : > { %p3042_p3 = pnand %p3041_p2, %p3037_p13 }
  0x27   : > { %2895 = vmatmul.msk.f32.gmra.mxu0 %vm193_vm1, %v174_v9 }
  0x28   : > { %2899 = vmatmul.msk.f32.gmra.mxu1 %vm193_vm1, %v178_v10 }
  0x29   : > { %2903 = vmatmul.msk.f32.gmra.mxu2 %vm193_vm1, %v182_v11 }
  0x2a   : > { %2907 = vmatmul.msk.f32.gmra.mxu3 %vm193_vm1, %v186_v12 }
  0x2f   : > { %2896 = vmatmul.msk.f32.gmra.mxu0 %vm193_vm1, %v175_v13 }
  0x30   : > { %2900 = vmatmul.msk.f32.gmra.mxu1 %vm193_vm1, %v179_v14 }
  0x31   : > { %2904 = vmatmul.msk.f32.gmra.mxu2 %vm193_vm1, %v183_v15 }
  0x32   : > { %2908 = vmatmul.msk.f32.gmra.mxu3 %vm193_vm1, %v187_v16 }
  0x94   : > { %v263_v18 = vpop.f32.mrf.mxu0 }
  0x95   : > { %v3188_v19 = vadd.f32 %v3185_v17, %v263_v18 }
  0x97   : > { %v314_v20 = vand.u32 2139095040, %v3188_v19  ;;  %v311_v21 = vand.u32 2147483647, %v3188_v19  ;;  %vm313_vm1 = vcmp.lt.s32.totalorder %v3188_v19, 0 }
  0x99   : > { %v315_v22 = vshrl.u32 %v314_v20, 23  ;;  %v318_v25 = vand.u32 8388607, %v311_v21 }
  0x9b   : > { %v2909_v23 = vadd.s32 4294967169, %v315_v22  ;;  %v319_v29 = vor.u32 8388608, %v318_v25 }
  0x9c   : > { %v266_v24 = vpop.f32.mrf.mxu0 }
  0x9d   : > { %v321_v26 = vadd.s32 1, %v2909_v23  ;;  %v3195_v27 = vadd.f32 %v3185_v17, %v266_v24  ;;  %v3204_v45 = vshll.u32 %v319_v29, 8 }
  0x9f   : > { %vm322_vm2 = vcmp.gt.s32.totalorder %v321_v26, 0  ;;  %v469_v31 = vand.u32 2139095040, %v3195_v27  ;;  %v466_v46 = vand.u32 2147483647, %v3195_v27  ;;  %v360_v5 = vand.u32 65535, %v3204_v45 }
  0xa0   : > { %v323_v28 = vsel %vm322_vm2, %v321_v26, 0  ;;  %v361_v6 = vshrl.u32 %v3204_v45, 16 }
  0xa1   : > { %v325_v30 = vand.u32 31, %v323_v28  ;;  %v324_v32 = vshrl.u32 %v323_v28, 5  ;;  %v470_v50 = vshrl.u32 %v469_v31, 23  ;;  %v473_v59 = vand.u32 8388607, %v466_v46 }
  0xa3   : > { %v326_v33 = vsub.s32 32, %v325_v30  ;;  %v328_v35 = vshll.u32 %v3082_v34, %v325_v30  ;;  %v331_v37 = vshll.u32 %v3083_v36, %v325_v30  ;;  %v334_v39 = vshll.u32 %v3084_v38, %v325_v30 }
  0xa4   : > { %v337_v41 = vshll.u32 %v3085_v40, %v325_v30  ;;  %v340_v44 = vshll.u32 %v3086_v43, %v325_v30  ;;  %vm343_vm3 = vcmp.lt.s32.totalorder %v324_v32, 1  ;;  %vm345_vm4 = vcmp.lt.s32.totalorder %v324_v32, 3 }
  0xa5   : > { %v329_v42 = vshrl.u32 %v3083_v36, %v326_v33  ;;  %v332_v47 = vshrl.u32 %v3084_v38, %v326_v33  ;;  %v335_v48 = vshrl.u32 %v3085_v40, %v326_v33  ;;  %v338_v49 = vshrl.u32 %v3086_v43, %v326_v33 }
  0xa6   : > { %v341_v53 = vshrl.u32 %v3087_v52, %v326_v33  ;;  %vm346_vm5 = vcmp.lt.s32.totalorder %v324_v32, 4  ;;  %v327_v57 = vshrl.u32 %v3082_v34, %v326_v33  ;;  %vm344_vm6 = vcmp.lt.s32.totalorder %v324_v32, 2 }
  0xa7   : > { %v330_v51 = vor.u32 %v329_v42, %v328_v35  ;;  %v333_v54 = vor.u32 %v332_v47, %v331_v37  ;;  %v336_v55 = vor.u32 %v335_v48, %v334_v39  ;;  %v339_v56 = vor.u32 %v338_v49, %v337_v41 }
  0xa8   : > { %v342_v58 = vor.u32 %v341_v53, %v340_v44  ;;  %v2912_v2 = vadd.s32 4294967169, %v470_v50  ;;  %v474_v10 = vor.u32 8388608, %v473_v59  ;;  %v3088_v39 = vmov 0  }
  0xa9   : > { %v351_v60 = vsel %vm343_vm3, %v330_v51, %v333_v54  ;;  %v352_v61 = vsel %vm346_vm5, %v339_v56, 920167782  ;;  %v355_v62 = vsel %vm343_vm3, %v333_v54, %v336_v55  ;;  %v348_v63 = vsel %vm346_vm5, %v336_v55, 2102212464 }
  0xaa   : > { %v353_v0 = vsel %vm345_vm4, %v336_v55, %v352_v61  ;;  %v356_v1 = vsel %vm346_vm5, %v342_v58, 1326507024  ;;  %v347_v7 = vsel %vm343_vm3, %v327_v57, %v330_v51  ;;  %v349_v11 = vsel %vm345_vm4, %v333_v54, %v348_v63 }
  0xab   : > { %v354_v3 = vsel %vm344_vm6, %v351_v60, %v353_v0  ;;  %v357_v4 = vsel %vm345_vm4, %v339_v56, %v356_v1  ;;  %v476_v15 = vadd.s32 1, %v2912_v2  ;;  %v3225_v22 = vsel %vm344_vm6, %v347_v7, %v349_v11 }
  0xac   : > { %v358_v8 = vsel %vm344_vm6, %v355_v62, %v357_v4  ;;  %v384_v9 = vand.u32 65535, %v354_v3  ;;  %v385_v14 = vshrl.u32 %v354_v3, 16  ;;  %v3227_v28 = vshll.u32 %v474_v10, 8 }
  0xad   : > { %v362_v12 = vand.u32 65535, %v358_v8  ;;  %v363_v13 = vshrl.u32 %v358_v8, 16  ;;  %vm477_vm7 = vcmp.gt.s32.totalorder %v476_v15, 0  ;;  %vm3292_vm4 = vcmp.le.f32.partialorder %v311_v21, 0.7853982 }
  0xae   : > { %v388_v20 = vmul.u32 %v384_v9, %v361_v6  ;;  %v387_v23 = vmul.u32 %v385_v14, %v360_v5  ;;  %v386_v26 = vmul.u32 %v384_v9, %v360_v5  ;;  %v389_v30 = vmul.u32 %v385_v14, %v361_v6 }
  0xaf   : > { %v365_v16 = vmul.u32 %v363_v13, %v360_v5  ;;  %v366_v18 = vmul.u32 %v362_v12, %v361_v6  ;;  %v364_v24 = vmul.u32 %v362_v12, %v360_v5  ;;  %v367_v29 = vmul.u32 %v363_v13, %v361_v6 }
  0xb0   : > { %v390_v31 = vshll.u32 %v387_v23, 16  ;;  %v392_v37 = vshll.u32 %v388_v20, 16  ;;  %v478_v42 = vsel %vm477_vm7, %v476_v15, 0  ;;  %v393_v47 = vshrl.u32 %v388_v20, 16 }
  0xb1   : > { %v368_v25 = vshll.u32 %v365_v16, 16  ;;  %v370_v33 = vshll.u32 %v366_v18, 16  ;;  %v369_v49 = vshrl.u32 %v365_v16, 16  ;;  %v3233_v55 = vshrl.u32 %v478_v42, 5 }
  0xb2   : > { %vm394_vm9 = vc.u32 %v386_v26, %v390_v31  ;;  %v396_v32 = vadd.s32 %v390_v31, %v386_v26  ;;  %v480_v56 = vand.u32 31, %v478_v42  ;;  %v371_v57 = vshrl.u32 %v366_v18, 16 }
  0xb3   : > { %vm372_vm8 = vc.u32 %v364_v24, %v368_v25  ;;  %v374_v35 = vadd.s32 %v368_v25, %v364_v24  ;;  %v395_v48 = vsel %vm394_vm9, 1, %v3088_v39  ;;  %v391_v58 = vshrl.u32 %v387_v23, 16 }
  0xb4   : > { %v373_v41 = vsel %vm372_vm8, 1, %v3088_v39  ;;  %v397_v51 = vadd.s32 %v395_v48, %v389_v30  ;;  %vm398_vm11 = vc.u32 %v396_v32, %v392_v37  ;;  %v3235_v59 = vadd.s32 %v396_v32, %v392_v37  ;;  %v269_v30 = vpop.f32.mrf.mxu0 }
  0xb5   : > { %v375_v44 = vadd.s32 %v373_v41, %v367_v29  ;;  %vm376_vm10 = vc.u32 %v374_v35, %v370_v33  ;;  %v399_v54 = vsel %vm398_vm11, 1, %v3088_v39  ;;  %v481_v62 = vsub.s32 32, %v480_v56 }
  0xb6   : > { %v377_v50 = vsel %vm376_vm10, 1, %v3088_v39  ;;  %v401_v60 = vadd.s32 %v399_v54, %v397_v51  ;;  %v483_v63 = vshll.u32 %v3082_v34, %v480_v56  ;;  %v486_v0 = vshll.u32 %v3083_v36, %v480_v56 }
  0xb7   : > { %v379_v53 = vadd.s32 %v377_v50, %v375_v44  ;;  %v489_v2 = vshll.u32 %v3084_v38, %v480_v56  ;;  %v492_v3 = vshll.u32 %v3085_v40, %v480_v56  ;;  %v495_v4 = vshll.u32 %v3086_v43, %v480_v56 }
  0xb8   : > { %v402_v1 = vadd.s32 %v401_v60, %v391_v58  ;;  %v484_v6 = vshrl.u32 %v3083_v36, %v481_v62  ;;  %v487_v7 = vshrl.u32 %v3084_v38, %v481_v62  ;;  %vm498_vm12 = vcmp.lt.s32.totalorder %v3233_v55, 1 }
  0xb9   : > { %v380_v61 = vadd.s32 %v379_v53, %v369_v49  ;;  %v490_v9 = vshrl.u32 %v3085_v40, %v481_v62  ;;  %v493_v10 = vshrl.u32 %v3086_v43, %v481_v62  ;;  %v496_v11 = vshrl.u32 %v3087_v52, %v481_v62 }
  0xba   : > { %v403_v8 = vadd.s32 %v402_v1, %v393_v47  ;;  %v3252_v12 = vor.u32 %v484_v6, %v483_v63  ;;  %v3254_v13 = vor.u32 %v487_v7, %v486_v0  ;;  %vm500_vm14 = vcmp.lt.s32.totalorder %v3233_v55, 3 }
  0xbb   : > { %v3242_v5 = vadd.s32 %v380_v61, %v371_v57  ;;  %v491_v15 = vor.u32 %v490_v9, %v489_v2  ;;  %v494_v16 = vor.u32 %v493_v10, %v492_v3  ;;  %v497_v18 = vor.u32 %v496_v11, %v495_v4 }
  0xbc   : > { %v407_v14 = vadd.s32 1, %v403_v8  ;;  %v404_v20 = vmul.u32 %v3204_v45, %v3225_v22  ;;  %vm501_vm15 = vcmp.lt.s32.totalorder %v3233_v55, 4  ;;  %v506_v23 = vsel %vm498_vm12, %v3252_v12, %v3254_v13  ;;  %v272_v11 = vpop.f32.mrf.mxu0 }
  0xbd   : > { %vm406_vm13 = vc.u32 %v3242_v5, %v3235_v59  ;;  %v507_v25 = vsel %vm501_vm15, %v494_v16, 920167782  ;;  %v510_v26 = vsel %vm498_vm12, %v3254_v13, %v491_v15  ;;  %vm499_vm0 = vcmp.lt.s32.totalorder %v3233_v55, 2 }
  0xbe   : > { %v408_v24 = vsel %vm406_vm13, %v407_v14, %v403_v8  ;;  %v508_v45 = vsel %vm500_vm14, %v491_v15, %v507_v25  ;;  %v511_v22 = vsel %vm501_vm15, %v497_v18, 1326507024  ;;  %v515_v35 = vand.u32 65535, %v3227_v28 }
  0xbf   : > { %v409_v29 = vadd.s32 %v408_v24, %v404_v20  ;;  %v509_v31 = vsel %vm499_vm0, %v506_v23, %v508_v45  ;;  %v512_v33 = vsel %vm500_vm14, %v494_v16, %v511_v22  ;;  %v516_v44 = vshrl.u32 %v3227_v28, 16 }
  0xc0   : > { %v513_v41 = vsel %vm499_vm0, %v510_v26, %v512_v33  ;;  %v539_v32 = vand.u32 65535, %v509_v31  ;;  %v540_v42 = vshrl.u32 %v509_v31, 16  ;;  %v3283_v54 = vadd.f32 %v3185_v17, %v269_v30 }
  0xc1   : > { %v410_v37 = vadd.s32 536870912, %v409_v29  ;;  %v517_v47 = vand.u32 65535, %v513_v41  ;;  %v518_v48 = vshrl.u32 %v513_v41, 16  ;;  %v482_v57 = vshrl.u32 %v3082_v34, %v481_v62 }
  0xc2   : > { %v542_v50 = vmul.u32 %v540_v42, %v515_v35  ;;  %v543_v58 = vmul.u32 %v539_v32, %v516_v44  ;;  %v503_v60 = vsel %vm501_vm15, %v491_v15, 2102212464  ;;  %v541_v4 = vmul.u32 %v539_v32, %v515_v35 }
  0xc3   : > { %v411_v49 = vshrl.u32 %v410_v37, 30  ;;  %v520_v51 = vmul.u32 %v518_v48, %v515_v35  ;;  %v521_v53 = vmul.u32 %v517_v47, %v516_v44  ;;  %v519_v61 = vmul.u32 %v517_v47, %v515_v35 }
  0xc4   : > { %v545_v0 = vshll.u32 %v542_v50, 16  ;;  %v522_v3 = vmul.u32 %v518_v48, %v516_v44  ;;  %v544_v8 = vmul.u32 %v540_v42, %v516_v44  ;;  %v547_v10 = vshll.u32 %v543_v58, 16 }
  0xc5   : > { %v412_v56 = vshll.u32 %v411_v49, 30  ;;  %v523_v63 = vshll.u32 %v520_v51, 16  ;;  %v435_v2 = vsub.s32 4, %v411_v49  ;;  %v525_v6 = vshll.u32 %v521_v53, 16 }
  0xc6   : > { %vm549_vm6 = vc.u32 %v541_v4, %v545_v0  ;;  %v551_v16 = vadd.s32 %v545_v0, %v541_v4  ;;  %v524_v20 = vshrl.u32 %v520_v51, 16  ;;  %v3299_v45 = vadd.f32 %v3185_v17, %v272_v11 }
  0xc7   : > { %v413_v1 = vsub.s32 %v409_v29, %v412_v56  ;;  %vm527_vm2 = vc.u32 %v519_v61, %v523_v63  ;;  %v529_v7 = vadd.s32 %v523_v63, %v519_v61  ;;  %v550_v24 = vsel %vm549_vm6, 1, %v3088_v39 }
  0xc8   : > { %v528_v62 = vsel %vm527_vm2, 1, %v3088_v39  ;;  %v552_v29 = vadd.s32 %v550_v24, %v544_v8  ;;  %vm553_vm7 = vc.u32 %v551_v16, %v547_v10  ;;  %v502_v21 = vsel %vm498_vm12, %v482_v57, %v3252_v12 }
  0xc9   : > { %vm414_vm3 = vcmp.lt.s32.totalorder %v413_v1, 0  ;;  %v415_v9 = vsub.s32 0, %v413_v1  ;;  %v530_v15 = vadd.s32 %v528_v62, %v522_v3  ;;  %vm531_vm5 = vc.u32 %v529_v7, %v525_v6 }
  0xca   : > { %v532_v23 = vsel %vm531_vm5, 1, %v3088_v39  ;;  %v526_v22 = vshrl.u32 %v521_v53, 16  ;;  %v554_v30 = vsel %vm553_vm7, 1, %v3088_v39  ;;  %v546_v35 = vshrl.u32 %v542_v50, 16 }
  0xcb   : > { %v416_v18 = vsel %vm414_vm3, %v415_v9, %v413_v1  ;;  %v534_v26 = vadd.s32 %v532_v23, %v530_v15  ;;  %v556_v37 = vadd.s32 %v554_v30, %v552_v29  ;;  %v436_v41 = vsel %vm313_vm1, %v435_v2, %v411_v49 }
  0xcc   : > { %v417_v25 = vclz %v416_v18  ;;  %v504_v32 = vsel %vm500_vm14, %v3254_v13, %v503_v60  ;;  %v621_v42 = vand.u32 2147483647, %v3283_v54  ;;  %v624_v44 = vand.u32 2139095040, %v3283_v54 }
  0xcd   : > { %v535_v33 = vadd.s32 %v534_v26, %v524_v20  ;;  %v548_v47 = vshrl.u32 %v543_v58, 16  ;;  %v557_v48 = vadd.s32 %v556_v37, %v546_v35  ;;  %v405_v51 = vadd.s32 %v3235_v59, %v3242_v5 }
  0xce   : > { %v2910_v31 = vadd.s32 4294967294, %v417_v25  ;;  %v555_v53 = vadd.s32 %v551_v16, %v547_v10  ;;  %v625_v56 = vshrl.u32 %v624_v44, 23  ;;  %v505_v61 = vsel %vm499_vm0, %v502_v21, %v504_v32 }
  0xcf   : > { %v536_v12 = vadd.s32 %v535_v33, %v526_v22  ;;  %v558_v13 = vadd.s32 %v557_v48, %v548_v47  ;;  %v438_v60 = vsel %vm3292_vm4, 0, %v436_v41  ;;  %v628_v58 = vand.u32 8388607, %v621_v42 }
  0xd0   : > { %vm2911_vm8 = vcmp.lt.s32.totalorder %v2910_v31, 0  ;;  %v2915_v63 = vadd.s32 4294967169, %v625_v56  ;;  %v559_v3 = vmul.u32 %v3227_v28, %v505_v61  ;;  %v455_v55 = vadd.s32 3, %v438_v60 }
  0xd1   : > { %v420_v50 = vsel %vm2911_vm8, 0, %v2910_v31  ;;  %vm561_vm9 = vc.u32 %v536_v12, %v555_v53  ;;  %v562_v5 = vadd.s32 1, %v558_v13  ;;  %v629_v62 = vor.u32 8388608, %v628_v58 }
  0xd2   : > { %v421_v57 = vsub.s32 32, %v420_v50  ;;  %v425_v49 = vsub.s32 4294967266, %v420_v50  ;;  %v422_v0 = vshll.u32 %v413_v1, %v420_v50  ;;  %v631_v4 = vadd.s32 1, %v2915_v63 }
  0xd3   : > { %v563_v8 = vsel %vm561_vm9, %v562_v5, %v558_v13  ;;  %v779_v15 = vand.u32 2139095040, %v3299_v45  ;;  %v3322_v23 = vand.u32 3, %v455_v55  ;;  %v776_v28 = vand.u32 2147483647, %v3299_v45 }
  0xd4   : > { %v423_v2 = vshrl.u32 %v405_v51, %v421_v57  ;;  %v426_v59 = vadd.s32 127, %v425_v49  ;;  %v564_v9 = vadd.s32 %v563_v8, %v559_v3  ;;  %vm632_vm10 = vcmp.gt.s32.totalorder %v631_v4, 0 }
  0xd5   : > { %v633_v11 = vsel %vm632_vm10, %v631_v4, 0  ;;  %v3325_v24 = vadd.s32 %v555_v53, %v536_v12  ;;  %v3327_v29 = vshll.u32 %v629_v62, 8  ;;  %vm468_vm11 = vcmp.lt.s32.totalorder %v3195_v27, 0 }
  0xd6   : > { %v424_v6 = vor.u32 %v423_v2, %v422_v0  ;;  %v427_v7 = vshll.u32 %v426_v59, 23  ;;  %v565_v16 = vadd.s32 536870912, %v564_v9  ;;  %v635_v18 = vand.u32 31, %v633_v11 }
  0xd7   : > { %v3330_v22 = vshrl.u32 %v633_v11, 5  ;;  %v780_v31 = vshrl.u32 %v779_v15, 23  ;;  %v3347_v57 = vand.u32 65535, %v3327_v29  ;;  %v3350_v49 = vshrl.u32 %v3327_v29, 16 }
  0xd8   : > { %v428_v10 = vor.u32 4788187, %v427_v7  ;;  %v431_v20 = vcvt.s32.f32 %v424_v6  ;;  %v566_v25 = vshrl.u32 %v565_v16, 30  ;;  %v636_v26 = vsub.s32 32, %v635_v18 }
  0xd9   : > { %v638_v30 = vshll.u32 %v3082_v34, %v635_v18  ;;  %v641_v35 = vshll.u32 %v3083_v36, %v635_v18  ;;  %v644_v37 = vshll.u32 %v3084_v38, %v635_v18  ;;  %v647_v41 = vshll.u32 %v3085_v40, %v635_v18 }
  0xda   : > { %v429_v1 = vand.u32 2147483647, %v428_v10  ;;  %v567_v33 = vshll.u32 %v566_v25, 30  ;;  %v639_v44 = vshrl.u32 %v3083_v36, %v636_v26  ;;  %v642_v12 = vshrl.u32 %v3084_v38, %v636_v26 }
  0xdb   : > { %v645_v47 = vshrl.u32 %v3085_v40, %v636_v26  ;;  %v648_v51 = vshrl.u32 %v3086_v43, %v636_v26  ;;  %v650_v50 = vshll.u32 %v3086_v43, %v635_v18  ;;  %v651_v53 = vshrl.u32 %v3087_v52, %v636_v26 }
  0xdc   : > { %v432_v21 = vmul.f32 %v431_v20, %v429_v1  ;;  %v3339_v48 = vsub.s32 %v564_v9, %v567_v33  ;;  %v2918_v61 = vadd.s32 4294967169, %v780_v31  ;;  %v590_v63 = vsub.s32 4, %v566_v25 }
  0xdd   : > { %v640_v0 = vor.u32 %v639_v44, %v638_v30  ;;  %v643_v2 = vor.u32 %v642_v12, %v641_v35  ;;  %v646_v59 = vor.u32 %v645_v47, %v644_v37  ;;  %v649_v3 = vor.u32 %v648_v51, %v647_v41 }
  0xde   : > { %v433_v32 = vxor.u32 2147483648, %v432_v21  ;;  %vm569_vm12 = vcmp.lt.s32.totalorder %v3339_v48, 0  ;;  %v570_v60 = vsub.s32 0, %v3339_v48  ;;  %v652_v4 = vor.u32 %v651_v53, %v650_v50 }
  0xdf   : > { %vm653_vm13 = vcmp.lt.s32.totalorder %v3330_v22, 1  ;;  %vm656_vm14 = vcmp.lt.s32.totalorder %v3330_v22, 4  ;;  %v3366_v55 = vsel %vm468_vm11, %v590_v63, %v566_v25  ;;  %v637_v8 = vshrl.u32 %v3082_v34, %v636_v26 }
  0xe0   : > { %v434_v56 = vsel %vm313_vm1, %v433_v32, %v432_v21  ;;  %v571_v5 = vsel %vm569_vm12, %v570_v60, %v3339_v48  ;;  %v3371_v9 = vand.u32 8388607, %v776_v28  ;;  %v3373_v62 = vadd.s32 1, %v2918_v61 }
  0xe1   : > { %v3355_v13 = vsel %vm3292_vm4, %v3188_v19, %v434_v56  ;;  %v572_v7 = vclz %v571_v5  ;;  %vm3377_vm15 = vcmp.le.f32.partialorder %v466_v46, 0.7853982  ;;  %vm655_vm0 = vcmp.lt.s32.totalorder %v3330_v22, 3 }
  0xe2   : > { %v439_v58 = vmul.f32 %v3355_v13, %v3355_v13  ;;  %vm654_vm1 = vcmp.lt.s32.totalorder %v3330_v22, 2  ;;  %v661_v18 = vsel %vm653_vm13, %v640_v0, %v643_v2  ;;  %v662_v1 = vsel %vm656_vm14, %v649_v3, 920167782 }
  0xe3   : > { %v2913_v16 = vadd.s32 4294967294, %v572_v7  ;;  %v666_v20 = vsel %vm656_vm14, %v652_v4, 1326507024  ;;  %v665_v46 = vsel %vm653_vm13, %v643_v2, %v646_v59  ;;  %v658_v30 = vsel %vm656_vm14, %v646_v59, 2102212464 }
  0xe4   : > { %v440_v14 = vmul.f32 -0.001358992, %v439_v58  ;;  %v447_v6 = vmul.f32 -0.00019511016, %v439_v58  ;;  %v663_v31 = vsel %vm655_vm0, %v646_v59, %v662_v1  ;;  %v667_v33 = vsel %vm655_vm0, %v649_v3, %v666_v20 }
  0xe5   : > { %vm2914_vm2 = vcmp.lt.s32.totalorder %v2913_v16, 0  ;;  %vm461_vm3 = vcmp.eq.s32.totalorder %v3322_v23, 2  ;;  %v657_v32 = vsel %vm653_vm13, %v637_v8, %v640_v0  ;;  %vm458_vm4 = vcmp.eq.s32.totalorder %v3322_v23, 0 }
  0xe6   : > { %v441_v10 = vadd.f32 0.041655596, %v440_v14  ;;  %v448_v11 = vadd.f32 0.008332121, %v447_v6  ;;  %v575_v21 = vsel %vm2914_vm2, 0, %v2913_v16  ;;  %v664_v47 = vsel %vm654_vm1, %v661_v18, %v663_v31 }
  0xe7   : > { %v576_v41 = vsub.s32 32, %v575_v21  ;;  %v577_v44 = vshll.u32 %v3339_v48, %v575_v21  ;;  %v580_v12 = vsub.s32 4294967266, %v575_v21  ;;  %v668_v51 = vsel %vm654_vm1, %v665_v46, %v667_v33 }
  0xe8   : > { %v442_v25 = vmul.f32 %v441_v10, %v439_v58  ;;  %v449_v26 = vmul.f32 %v448_v11, %v439_v58  ;;  %vm457_vm5 = vcmp.lt.s32.totalorder %v3322_v23, 2  ;;  %v672_v61 = vand.u32 65535, %v668_v51 }
  0xe9   : > { %v578_v56 = vshrl.u32 %v3325_v24, %v576_v41  ;;  %vm454_vm6 = vweird.f32 %v3188_v19  ;;  %v581_v60 = vadd.s32 127, %v580_v12  ;;  %v659_v48 = vsel %vm655_vm0, %v643_v2, %v658_v30 }
  0xea   : > { %v443_v35 = vadd.f32 -0.4999988, %v442_v25  ;;  %v450_v37 = vadd.f32 -0.16666654, %v449_v26  ;;  %v673_v63 = vshrl.u32 %v668_v51, 16  ;;  %v694_v0 = vand.u32 65535, %v664_v47 }
  0xeb   : > { %v579_v3 = vor.u32 %v578_v56, %v577_v44  ;;  %v695_v4 = vshrl.u32 %v664_v47, 16  ;;  %v593_v24 = vsel %vm3377_vm15, 0, %v3366_v55  ;;  %v676_v6 = vmul.u32 %v672_v61, %v3350_v49 }
  0xec   : > { %v444_v50 = vmul.f32 %v443_v35, %v439_v58  ;;  %v451_v53 = vmul.f32 %v450_v37, %v439_v58  ;;  %v582_v58 = vshll.u32 %v581_v60, 23  ;;  %v675_v14 = vmul.u32 %v673_v63, %v3347_v57 }
  0xed   : > { %v3420_v8 = vsel %vm654_vm1, %v657_v32, %v659_v48  ;;  %v674_v10 = vmul.u32 %v672_v61, %v3347_v57  ;;  %v586_v16 = vcvt.s32.f32 %v579_v3  ;;  %v677_v18 = vmul.u32 %v673_v63, %v3350_v49 }
  0xee   : > { %v445_v59 = vadd.f32 1.0, %v444_v50  ;;  %v452_v5 = vadd.f32 1.0, %v451_v53  ;;  %v583_v11 = vor.u32 4788187, %v582_v58  ;;  %v678_v55 = vshll.u32 %v675_v14, 16 }
  0xef   : > { %v680_v20 = vshll.u32 %v676_v6, 16  ;;  %v696_v25 = vmul.u32 %v694_v0, %v3347_v57  ;;  %v698_v31 = vmul.u32 %v694_v0, %v3350_v49  ;;  %v679_v32 = vshrl.u32 %v675_v14, 16 }
  0xf0   : > { %v453_v7 = vmul.f32 %v452_v5, %v3355_v13  ;;  %v462_v2 = vxor.u32 2147483648, %v445_v59  ;;  %v697_v13 = vmul.u32 %v695_v4, %v3347_v57  ;;  %v584_v26 = vand.u32 2147483647, %v583_v11 }
  0xf1   : > { %vm682_vm7 = vc.u32 %v674_v10, %v678_v55  ;;  %v684_v46 = vadd.s32 %v678_v55, %v674_v10  ;;  %v681_v44 = vshrl.u32 %v676_v6, 16  ;;  %v699_v50 = vmul.u32 %v695_v4, %v3350_v49 }
  0xf2   : > { %v459_v1 = vxor.u32 2147483648, %v453_v7  ;;  %v463_v22 = vsel %vm461_vm3, %v462_v2, %v453_v7  ;;  %v683_v30 = vsel %vm682_vm7, 1, %v3088_v39  ;;  %v700_v33 = vshll.u32 %v697_v13, 16 }
  0xf3   : > { %v587_v37 = vmul.f32 %v586_v16, %v584_v26  ;;  %v685_v41 = vadd.s32 %v683_v30, %v677_v18  ;;  %vm686_vm8 = vc.u32 %v684_v46, %v680_v20  ;;  %v702_v23 = vshll.u32 %v698_v31, 16 }
  0xf4   : > { %v460_v21 = vsel %vm458_vm4, %v445_v59, %v459_v1  ;;  %v687_v12 = vsel %vm686_vm8, 1, %v3088_v39  ;;  %vm704_vm9 = vc.u32 %v696_v25, %v700_v33  ;;  %v706_v56 = vadd.s32 %v700_v33, %v696_v25 }
  0xf5   : > { %v464_v35 = vsel %vm457_vm5, %v460_v21, %v463_v22  ;;  %v588_v47 = vxor.u32 2147483648, %v587_v37  ;;  %v689_v51 = vadd.s32 %v687_v12, %v685_v41  ;;  %v705_v53 = vsel %vm704_vm9, 1, %v3088_v39 }
  0xf6   : > { %v465_v57 = vsel %vm454_vm6, nan, %v464_v35  ;;  %vm787_vm10 = vcmp.gt.s32.totalorder %v3373_v62, 0  ;;  %v707_v60 = vadd.s32 %v705_v53, %v699_v50  ;;  %v610_v63 = vadd.s32 3, %v593_v24  ;;  %v275_v35 = vpop.f32.mrf.mxu1 }
  0xf7   : > { %2791 = vst [vmem:[%s3440_s8] sm:$0xff] %v465_v57  ;;  %v589_v19 = vsel %vm468_vm11, %v588_v47, %v587_v37  ;;  %v690_v61 = vadd.s32 %v689_v51, %v679_v32  ;;  %v788_v48 = vsel %vm787_vm10, %v3373_v62, 0  ;;  %vm708_vm12 = vc.u32 %v706_v56, %v702_v23 }
  0xf8   : > { %v592_v49 = vsel %vm3377_vm15, %v3195_v27, %v589_v19  ;;  %v784_v0 = vor.u32 8388608, %v3371_v9  ;;  %v709_v3 = vsel %vm708_vm12, 1, %v3088_v39  ;;  %v790_v4 = vand.u32 31, %v788_v48 }
  0xf9   : > { %v594_v59 = vmul.f32 %v592_v49, %v592_v49  ;;  %v3452_v5 = vadd.s32 %v690_v61, %v681_v44  ;;  %v701_v58 = vshrl.u32 %v697_v13, 16  ;;  %v703_v14 = vshrl.u32 %v698_v31, 16 }
  0xfa   : > { %v711_v6 = vadd.s32 %v709_v3, %v707_v60  ;;  %v714_v62 = vmul.u32 %v3327_v29, %v3420_v8  ;;  %v3457_v15 = vadd.s32 %v706_v56, %v702_v23  ;;  %v3459_v24 = vshrl.u32 %v788_v48, 5 }
  0xfb   : > { %v595_v7 = vmul.f32 -0.001358992, %v594_v59  ;;  %v602_v2 = vmul.f32 -0.00019511016, %v594_v59  ;;  %v791_v9 = vsub.s32 32, %v790_v4  ;;  %v793_v11 = vshll.u32 %v3082_v34, %v790_v4 }
  0xfc   : > { %v712_v10 = vadd.s32 %v711_v6, %v701_v58  ;;  %v796_v16 = vshll.u32 %v3083_v36, %v790_v4  ;;  %vm716_vm11 = vc.u32 %v3452_v5, %v3457_v15  ;;  %v802_v1 = vshll.u32 %v3085_v40, %v790_v4 }
  0xfd   : > { %v596_v18 = vadd.f32 0.041655596, %v595_v7  ;;  %v603_v55 = vadd.f32 0.008332121, %v602_v2  ;;  %v794_v8 = vshrl.u32 %v3083_v36, %v791_v9  ;;  %v797_v20 = vshrl.u32 %v3084_v38, %v791_v9 }
  0xfe   : > { %v713_v29 = vadd.s32 %v712_v10, %v703_v14  ;;  %v799_v25 = vshll.u32 %v3084_v38, %v790_v4  ;;  %v800_v26 = vshrl.u32 %v3085_v40, %v791_v9  ;;  %v803_v46 = vshrl.u32 %v3086_v43, %v791_v9 }
  0xff   : > { %v597_v13 = vmul.f32 %v596_v18, %v594_v59  ;;  %v604_v22 = vmul.f32 %v603_v55, %v594_v59  ;;  %v3471_v30 = vor.u32 %v794_v8, %v793_v11  ;;  %v3473_v31 = vor.u32 %v797_v20, %v796_v16 }
 0x100   : > { %v717_v21 = vadd.s32 1, %v713_v29  ;;  %v805_v33 = vshll.u32 %v3086_v43, %v790_v4  ;;  %v804_v57 = vor.u32 %v803_v46, %v802_v1  ;;  %vm808_vm13 = vcmp.lt.s32.totalorder %v3459_v24, 1  ;;  %v278_v1 = vpop.f32.mrf.mxu1 }
 0x101   : > { %v598_v37 = vadd.f32 -0.4999988, %v597_v13  ;;  %v605_v41 = vadd.f32 -0.16666654, %v604_v22  ;;  %v801_v44 = vor.u32 %v800_v26, %v799_v25  ;;  %v806_v12 = vshrl.u32 %v3087_v52, %v791_v9 }
 0x102   : > { %v718_v32 = vsel %vm716_vm11, %v717_v21, %v713_v29  ;;  %vm811_vm14 = vcmp.lt.s32.totalorder %v3459_v24, 4  ;;  %vm810_vm15 = vcmp.lt.s32.totalorder %v3459_v24, 3  ;;  %v611_v23 = vand.u32 3, %v610_v63 }
 0x103   : > { %v599_v47 = vmul.f32 %v598_v37, %v594_v59  ;;  %v606_v51 = vmul.f32 %v605_v41, %v594_v59  ;;  %v719_v50 = vadd.s32 %v718_v32, %v714_v62  ;;  %v807_v53 = vor.u32 %v806_v12, %v805_v33 }
 0x104   : > { %v816_v56 = vsel %vm808_vm13, %v3471_v30, %v3473_v31  ;;  %v817_v19 = vsel %vm811_vm14, %v804_v57, 920167782  ;;  %v3489_v3 = vshll.u32 %v784_v0, 8  ;;  %vm809_vm0 = vcmp.lt.s32.totalorder %v3459_v24, 2 }
 0x105   : > { %v600_v61 = vadd.f32 1.0, %v599_v47  ;;  %v607_v60 = vadd.f32 1.0, %v606_v51  ;;  %v720_v48 = vadd.s32 536870912, %v719_v50  ;;  %v818_v59 = vsel %vm810_vm15, %v801_v44, %v817_v19 }
 0x106   : > { %v820_v63 = vsel %vm808_vm13, %v3473_v31, %v801_v44  ;;  %v821_v4 = vsel %vm811_vm14, %v807_v53, 1326507024  ;;  %v819_v0 = vsel %vm809_vm0, %v816_v56, %v818_v59  ;;  %vm612_vm1 = vcmp.lt.s32.totalorder %v611_v23, 2 }
 0x107   : > { %v608_v58 = vmul.f32 %v607_v60, %v592_v49  ;;  %v617_v14 = vxor.u32 2147483648, %v600_v61  ;;  %v3499_v6 = vshrl.u32 %v720_v48, 30  ;;  %vm613_vm2 = vcmp.eq.s32.totalorder %v611_v23, 0 }
 0x108   : > { %v822_v62 = vsel %vm810_vm15, %v804_v57, %v821_v4  ;;  %v850_v7 = vshrl.u32 %v819_v0, 16  ;;  %vm616_vm3 = vcmp.eq.s32.totalorder %v611_v23, 2  ;;  %v825_v11 = vand.u32 65535, %v3489_v3 }
 0x109   : > { %v614_v2 = vxor.u32 2147483648, %v608_v58  ;;  %v722_v10 = vshll.u32 %v3499_v6, 30  ;;  %v618_v16 = vsel %vm616_vm3, %v617_v14, %v608_v58  ;;  %v792_v49 = vshrl.u32 %v3082_v34, %v791_v9 }
 0x10a   : > { %v823_v18 = vsel %vm809_vm0, %v820_v63, %v822_v62  ;;  %v849_v55 = vand.u32 65535, %v819_v0  ;;  %v3510_v25 = vmul.u32 %v850_v7, %v825_v11  ;;  %vm609_vm4 = vweird.f32 %v3195_v27 }
 0x10b   : > { %v615_v29 = vsel %vm613_vm2, %v600_v61, %v614_v2  ;;  %v723_v8 = vsub.s32 %v719_v50, %v722_v10  ;;  %v827_v20 = vand.u32 65535, %v823_v18  ;;  %v826_v22 = vshrl.u32 %v3489_v3, 16 }
 0x10c   : > { %v619_v13 = vsel %vm612_vm1, %v615_v29, %v618_v16  ;;  %v828_v26 = vshrl.u32 %v823_v18, 16  ;;  %v3516_v9 = vadd.f32 %v3185_v17, %v275_v35  ;;  %v3519_v33 = vadd.f32 %v3185_v17, %v278_v1 }
 0x10d   : > { %v620_v46 = vsel %vm609_vm4, nan, %v619_v13  ;;  %vm724_vm5 = vcmp.lt.s32.totalorder %v723_v8, 0  ;;  %v725_v21 = vsub.s32 0, %v723_v8  ;;  %v715_v37 = vadd.s32 %v3457_v15, %v3452_v5 }
 0x10e   : > { %v830_v41 = vmul.u32 %v828_v26, %v825_v11  ;;  %v831_v57 = vmul.u32 %v827_v20, %v826_v22  ;;  %2792 = vst [vmem:[%s3440_s8 + $0x8] sm:$0xff] %v620_v46  ;;  %v812_v32 = vsel %vm808_vm13, %v792_v49, %v3471_v30  ;;  %v853_v12 = vmul.u32 %v849_v55, %v826_v22 }
 0x10f   : > { %v726_v27 = vsel %vm724_vm5, %v725_v21, %v723_v8  ;;  %v855_v35 = vshll.u32 %v3510_v25, 16  ;;  %v813_v51 = vsel %vm811_vm14, %v801_v44, 2102212464  ;;  %v829_v17 = vmul.u32 %v827_v20, %v825_v11 }
 0x110   : > { %v727_v47 = vclz %v726_v27  ;;  %v833_v50 = vshll.u32 %v830_v41, 16  ;;  %v745_v23 = vsub.s32 4, %v3499_v6  ;;  %v832_v5 = vmul.u32 %v828_v26, %v826_v22 }
 0x111   : > { %v851_v15 = vmul.u32 %v849_v55, %v825_v11  ;;  %v854_v53 = vmul.u32 %v850_v7, %v826_v22  ;;  %vm623_vm6 = vcmp.lt.s32.totalorder %v3283_v54, 0  ;;  %v835_v19 = vshll.u32 %v831_v57, 16 }
 0x112   : > { %v2916_v56 = vadd.s32 4294967294, %v727_v47  ;;  %vm837_vm7 = vc.u32 %v829_v17, %v833_v50  ;;  %v839_v30 = vadd.s32 %v833_v50, %v829_v17  ;;  %v857_v60 = vshll.u32 %v853_v12, 16 }
 0x113   : > { %v838_v61 = vsel %vm837_vm7, 1, %v3088_v39  ;;  %vm859_vm8 = vc.u32 %v851_v15, %v855_v35  ;;  %v861_v48 = vadd.s32 %v855_v35, %v851_v15  ;;  %v834_v62 = vshrl.u32 %v830_v41, 16 }
 0x114   : > { %vm2917_vm9 = vcmp.lt.s32.totalorder %v2916_v56, 0  ;;  %v840_v44 = vadd.s32 %v838_v61, %v832_v5  ;;  %vm841_vm10 = vc.u32 %v839_v30, %v835_v19  ;;  %v860_v59 = vsel %vm859_vm8, 1, %v3088_v39 }
 0x115   : > { %v730_v63 = vsel %vm2917_vm9, 0, %v2916_v56  ;;  %v842_v4 = vsel %vm841_vm10, 1, %v3088_v39  ;;  %v862_v58 = vadd.s32 %v860_v59, %v854_v53  ;;  %vm863_vm12 = vc.u32 %v861_v48, %v857_v60 }
 0x116   : > { %v731_v14 = vsub.s32 32, %v730_v63  ;;  %v735_v0 = vsub.s32 4294967266, %v730_v63  ;;  %v844_v7 = vadd.s32 %v842_v4, %v840_v44  ;;  %v732_v2 = vshll.u32 %v723_v8, %v730_v63 }
 0x117   : > { %v836_v10 = vshrl.u32 %v831_v57, 16  ;;  %v856_v11 = vshrl.u32 %v3510_v25, 16  ;;  %v864_v16 = vsel %vm863_vm12, 1, %v3088_v39  ;;  %v814_v29 = vsel %vm810_vm15, %v3473_v31, %v813_v51 }
 0x118   : > { %v733_v49 = vshrl.u32 %v715_v37, %v731_v14  ;;  %v736_v18 = vadd.s32 127, %v735_v0  ;;  %v845_v55 = vadd.s32 %v844_v7, %v834_v62  ;;  %v866_v1 = vadd.s32 %v864_v16, %v862_v58 }
 0x119   : > { %v858_v20 = vshrl.u32 %v853_v12, 16  ;;  %v931_v13 = vand.u32 2147483647, %v3516_v9  ;;  %v934_v22 = vand.u32 2139095040, %v3516_v9  ;;  %v746_v25 = vsel %vm623_vm6, %v745_v23, %v3499_v6 }
 0x11a   : > { %v734_v26 = vor.u32 %v733_v49, %v732_v2  ;;  %v737_v8 = vshll.u32 %v736_v18, 23  ;;  %v846_v46 = vadd.s32 %v845_v55, %v836_v10  ;;  %v867_v21 = vadd.s32 %v866_v1, %v856_v11 }
 0x11b   : > { %v865_v37 = vadd.s32 %v861_v48, %v857_v60  ;;  %v935_v41 = vshrl.u32 %v934_v22, 23  ;;  %v938_v57 = vand.u32 8388607, %v931_v13  ;;  %v815_v31 = vsel %vm809_vm0, %v812_v32, %v814_v29 }
 0x11c   : > { %v738_v27 = vor.u32 4788187, %v737_v8  ;;  %v868_v12 = vadd.s32 %v867_v21, %v858_v20  ;;  %vm3551_vm11 = vcmp.le.f32.partialorder %v621_v42, 0.7853982  ;;  %v741_v6 = vcvt.s32.f32 %v734_v26 }
 0x11d   : > { %vm871_vm13 = vc.u32 %v846_v46, %v865_v37  ;;  %v2921_v47 = vadd.s32 4294967169, %v935_v41  ;;  %v748_v17 = vsel %vm3551_vm11, 0, %v746_v25  ;;  %v869_v23 = vmul.u32 %v3489_v3, %v815_v31 }
 0x11e   : > { %v739_v51 = vand.u32 2147483647, %v738_v27  ;;  %v872_v50 = vadd.s32 1, %v868_v12  ;;  %v939_v5 = vor.u32 8388608, %v938_v57  ;;  %v1089_v32 = vand.u32 2139095040, %v3519_v33 }
 0x11f   : > { %v941_v24 = vadd.s32 1, %v2921_v47  ;;  %v1086_v42 = vand.u32 2147483647, %v3519_v33  ;;  %v765_v30 = vadd.s32 3, %v748_v17  ;;  %v3577_v62 = vadd.s32 %v865_v37, %v846_v46 }
 0x120   : > { %v742_v15 = vmul.f32 %v741_v6, %v739_v51  ;;  %v873_v53 = vsel %vm871_vm13, %v872_v50, %v868_v12  ;;  %v3560_v44 = vshll.u32 %v939_v5, 8  ;;  %v1090_v59 = vshrl.u32 %v1089_v32, 23 }
 0x121   : > { %v874_v56 = vadd.s32 %v873_v53, %v869_v23  ;;  %vm942_vm14 = vcmp.gt.s32.totalorder %v941_v24, 0  ;;  %v3566_v63 = vand.u32 8388607, %v1086_v42  ;;  %v3575_v0 = vand.u32 3, %v765_v30 }
 0x122   : > { %v743_v19 = vxor.u32 2147483648, %v742_v15  ;;  %v943_v61 = vsel %vm942_vm14, %v941_v24, 0  ;;  %v3580_v10 = vand.u32 65535, %v3560_v44  ;;  %v3583_v11 = vshrl.u32 %v3560_v44, 16 }
 0x123   : > { %v875_v60 = vadd.s32 536870912, %v874_v56  ;;  %v945_v48 = vand.u32 31, %v943_v61  ;;  %v2924_v16 = vadd.s32 4294967169, %v1090_v59  ;;  %vm778_vm15 = vcmp.lt.s32.totalorder %v3299_v45, 0 }
 0x124   : > { %v744_v3 = vsel %vm623_vm6, %v743_v19, %v742_v15  ;;  %v1094_v1 = vor.u32 8388608, %v3566_v63  ;;  %v3599_v12 = vshrl.u32 %v943_v61, 5  ;;  %vm768_vm1 = vcmp.eq.s32.totalorder %v3575_v0, 0 }
 0x125   : > { %v3571_v4 = vsel %vm3551_vm11, %v3283_v54, %v744_v3  ;;  %v876_v58 = vshrl.u32 %v875_v60, 30  ;;  %v946_v7 = vsub.s32 32, %v945_v48  ;;  %v948_v55 = vshll.u32 %v3082_v34, %v945_v48 }
 0x126   : > { %v749_v14 = vmul.f32 %v3571_v4, %v3571_v4  ;;  %v951_v20 = vshll.u32 %v3083_v36, %v945_v48  ;;  %v954_v22 = vshll.u32 %v3084_v38, %v945_v48  ;;  %v957_v26 = vshll.u32 %v3085_v40, %v945_v48 }
 0x127   : > { %v877_v2 = vshll.u32 %v876_v58, 30  ;;  %v949_v21 = vshrl.u32 %v3083_v36, %v946_v7  ;;  %v952_v25 = vshrl.u32 %v3084_v38, %v946_v7  ;;  %v955_v41 = vshrl.u32 %v3085_v40, %v946_v7 }
 0x128   : > { %v750_v49 = vmul.f32 -0.001358992, %v749_v14  ;;  %v757_v18 = vmul.f32 -0.00019511016, %v749_v14  ;;  %v958_v57 = vshrl.u32 %v3086_v43, %v946_v7  ;;  %v960_v35 = vshll.u32 %v3086_v43, %v945_v48 }
 0x129   : > { %v3588_v29 = vsub.s32 %v874_v56, %v877_v2  ;;  %v900_v51 = vsub.s32 4, %v876_v58  ;;  %v961_v6 = vshrl.u32 %v3087_v52, %v946_v7  ;;  %v3604_v17 = vadd.s32 1, %v2924_v16 }
 0x12a   : > { %v751_v8 = vadd.f32 0.041655596, %v750_v49  ;;  %v758_v46 = vadd.f32 0.008332121, %v757_v18  ;;  %v950_v24 = vor.u32 %v949_v21, %v948_v55  ;;  %vm771_vm2 = vcmp.eq.s32.totalorder %v3575_v0, 2 }
 0x12b   : > { %vm879_vm0 = vcmp.lt.s32.totalorder %v3588_v29, 0  ;;  %v880_v37 = vsub.s32 0, %v3588_v29  ;;  %v953_v32 = vor.u32 %v952_v25, %v951_v20  ;;  %v956_v15 = vor.u32 %v955_v41, %v954_v22 }
 0x12c   : > { %v752_v27 = vmul.f32 %v751_v8, %v749_v14  ;;  %v759_v31 = vmul.f32 %v758_v46, %v749_v14  ;;  %v959_v53 = vor.u32 %v958_v57, %v957_v26  ;;  %v962_v56 = vor.u32 %v961_v6, %v960_v35 }
 0x12d   : > { %v881_v47 = vsel %vm879_vm0, %v880_v37, %v3588_v29  ;;  %vm767_vm3 = vcmp.lt.s32.totalorder %v3575_v0, 2  ;;  %vm963_vm4 = vcmp.lt.s32.totalorder %v3599_v12, 1  ;;  %vm764_vm5 = vweird.f32 %v3283_v54 }
 0x12e   : > { %v753_v50 = vadd.f32 -0.4999988, %v752_v27  ;;  %v760_v23 = vadd.f32 -0.16666654, %v759_v31  ;;  %v882_v5 = vclz %v881_v47  ;;  %vm3613_vm6 = vcmp.le.f32.partialorder %v776_v28, 0.7853982 }
 0x12f   : > { %v3619_v48 = vsel %vm778_vm15, %v900_v51, %v876_v58  ;;  %v947_v59 = vshrl.u32 %v3082_v34, %v946_v7  ;;  %vm964_vm7 = vcmp.lt.s32.totalorder %v3599_v12, 2  ;;  %vm966_vm8 = vcmp.lt.s32.totalorder %v3599_v12, 4 }
 0x130   : > { %v754_v19 = vmul.f32 %v753_v50, %v749_v14  ;;  %v761_v30 = vmul.f32 %v760_v23, %v749_v14  ;;  %v2919_v61 = vadd.s32 4294967294, %v882_v5  ;;  %vm965_vm10 = vcmp.lt.s32.totalorder %v3599_v12, 3 }
 0x131   : > { %v971_v28 = vsel %vm963_vm4, %v950_v24, %v953_v32  ;;  %v972_v16 = vsel %vm966_vm8, %v959_v53, 920167782  ;;  %v976_v49 = vsel %vm966_vm8, %v962_v56, 1326507024  ;;  %v975_v7 = vsel %vm963_vm4, %v953_v32, %v956_v15 }
 0x132   : > { %v755_v3 = vadd.f32 1.0, %v754_v19  ;;  %v762_v14 = vadd.f32 1.0, %v761_v30  ;;  %vm2920_vm9 = vcmp.lt.s32.totalorder %v2919_v61, 0  ;;  %v968_v22 = vsel %vm966_vm8, %v956_v15, 2102212464 }
 0x133   : > { %v885_v2 = vsel %vm2920_vm9, 0, %v2919_v61  ;;  %v973_v26 = vsel %vm965_vm10, %v956_v15, %v972_v16  ;;  %v977_v8 = vsel %vm965_vm10, %v959_v53, %v976_v49  ;;  %v903_v5 = vsel %vm3613_vm6, 0, %v3619_v48 }
 0x134   : > { %v763_v58 = vmul.f32 %v762_v14, %v3571_v4  ;;  %v772_v18 = vxor.u32 2147483648, %v755_v3  ;;  %v886_v55 = vsub.s32 32, %v885_v2  ;;  %v890_v20 = vsub.s32 4294967266, %v885_v2 }
 0x135   : > { %v887_v21 = vshll.u32 %v3588_v29, %v885_v2  ;;  %v974_v4 = vsel %vm964_vm7, %v971_v28, %v973_v26  ;;  %v978_v41 = vsel %vm964_vm7, %v975_v7, %v977_v8  ;;  %v967_v15 = vsel %vm963_vm4, %v947_v59, %v950_v24 }
 0x136   : > { %v769_v46 = vxor.u32 2147483648, %v763_v58  ;;  %v888_v25 = vshrl.u32 %v3577_v62, %v886_v55  ;;  %v891_v37 = vadd.s32 127, %v890_v20  ;;  %v1004_v57 = vand.u32 65535, %v974_v4 }
 0x137   : > { %v1005_v27 = vshrl.u32 %v974_v4, 16  ;;  %v773_v35 = vsel %vm771_vm2, %v772_v18, %v763_v58  ;;  %v982_v47 = vand.u32 65535, %v978_v41  ;;  %v983_v29 = vshrl.u32 %v978_v41, 16 }
 0x138   : > { %v770_v31 = vsel %vm768_vm1, %v755_v3, %v769_v46  ;;  %v889_v51 = vor.u32 %v888_v25, %v887_v21  ;;  %v892_v6 = vshll.u32 %v891_v37, 23  ;;  %v969_v0 = vsel %vm965_vm10, %v953_v32, %v968_v22 }
 0x139   : > { %v774_v62 = vsel %vm767_vm3, %v770_v31, %v773_v35  ;;  %v1007_v50 = vmul.u32 %v1005_v27, %v3580_v10  ;;  %v985_v53 = vmul.u32 %v983_v29, %v3580_v10  ;;  %v986_v19 = vmul.u32 %v982_v47, %v3583_v11 }
 0x13a   : > { %v775_v23 = vsel %vm764_vm5, nan, %v774_v62  ;;  %v893_v56 = vor.u32 4788187, %v892_v6  ;;  %v1008_v30 = vmul.u32 %v1004_v57, %v3583_v11  ;;  %v984_v54 = vmul.u32 %v982_v47, %v3580_v10 }
 0x13b   : > { %2793 = vst [vmem:[%s3440_s8 + $0x10] sm:$0xff] %v775_v23  ;;  %v988_v61 = vshll.u32 %v985_v53, 16  ;;  %v1006_v3 = vmul.u32 %v1004_v57, %v3580_v10  ;;  %v1010_v48 = vshll.u32 %v1007_v50, 16  ;;  %v896_v2 = vcvt.s32.f32 %v889_v51 }
 0x13c   : > { %v894_v14 = vand.u32 2147483647, %v893_v56  ;;  %v987_v24 = vmul.u32 %v983_v29, %v3583_v11  ;;  %v1009_v59 = vmul.u32 %v1005_v27, %v3583_v11  ;;  %v990_v28 = vshll.u32 %v986_v19, 16 }
 0x13d   : > { %vm992_vm12 = vc.u32 %v984_v54, %v988_v61  ;;  %v994_v32 = vadd.s32 %v988_v61, %v984_v54  ;;  %v1012_v16 = vshll.u32 %v1008_v30, 16  ;;  %vm1014_vm11 = vc.u32 %v1006_v3, %v1010_v48 }
 0x13e   : > { %v897_v49 = vmul.f32 %v896_v2, %v894_v14  ;;  %v993_v58 = vsel %vm992_vm12, 1, %v3088_v39  ;;  %v1016_v18 = vadd.s32 %v1010_v48, %v1006_v3  ;;  %v970_v55 = vsel %vm964_vm7, %v967_v15, %v969_v0 }
 0x13f   : > { %v995_v10 = vadd.s32 %v993_v58, %v987_v24  ;;  %vm996_vm13 = vc.u32 %v994_v32, %v990_v28  ;;  %v1015_v7 = vsel %vm1014_vm11, 1, %v3088_v39  ;;  %v989_v26 = vshrl.u32 %v985_v53, 16 }
 0x140   : > { %v898_v20 = vxor.u32 2147483648, %v897_v49  ;;  %v997_v22 = vsel %vm996_vm13, 1, %v3088_v39  ;;  %v1017_v11 = vadd.s32 %v1015_v7, %v1009_v59  ;;  %vm1018_vm14 = vc.u32 %v1016_v18, %v1012_v16 }
 0x141   : > { %v999_v8 = vadd.s32 %v997_v22, %v995_v10  ;;  %v1019_v46 = vsel %vm1018_vm14, 1, %v3088_v39  ;;  %vm1097_vm0 = vcmp.gt.s32.totalorder %v3604_v17, 0  ;;  %v1011_v12 = vshrl.u32 %v1007_v50, 16 }
 0x142   : > { %v899_v21 = vsel %vm778_vm15, %v898_v20, %v897_v49  ;;  %v1021_v25 = vadd.s32 %v1019_v46, %v1017_v11  ;;  %v1098_v4 = vsel %vm1097_vm0, %v3604_v17, 0  ;;  %v991_v41 = vshrl.u32 %v986_v19, 16 }
 0x143   : > { %v902_v37 = vsel %vm3613_vm6, %v3299_v45, %v899_v21  ;;  %v1000_v57 = vadd.s32 %v999_v8, %v989_v26  ;;  %v1100_v27 = vand.u32 31, %v1098_v4  ;;  %v920_v35 = vadd.s32 3, %v903_v5 }
 0x144   : > { %v904_v31 = vmul.f32 %v902_v37, %v902_v37  ;;  %v1013_v47 = vshrl.u32 %v1008_v30, 16  ;;  %v1022_v29 = vadd.s32 %v1021_v25, %v1011_v12  ;;  %v3679_v51 = vadd.s32 %v1016_v18, %v1012_v16 }
 0x145   : > { %v3677_v62 = vadd.s32 %v1000_v57, %v991_v41  ;;  %v1024_v6 = vmul.u32 %v3560_v44, %v970_v55  ;;  %v3682_v50 = vsub.s32 32, %v1100_v27  ;;  %v3684_v60 = vshrl.u32 %v1098_v4, 5 }
 0x146   : > { %v905_v17 = vmul.f32 -0.001358992, %v904_v31  ;;  %v912_v23 = vmul.f32 -0.00019511016, %v904_v31  ;;  %v1023_v15 = vadd.s32 %v1022_v29, %v1013_v47  ;;  %v1103_v5 = vshll.u32 %v3082_v34, %v1100_v27 }
 0x147   : > { %vm1026_vm15 = vc.u32 %v3677_v62, %v3679_v51  ;;  %v1104_v53 = vshrl.u32 %v3083_v36, %v3682_v50  ;;  %v1106_v56 = vshll.u32 %v3083_v36, %v1100_v27  ;;  %v1107_v30 = vshrl.u32 %v3084_v38, %v3682_v50 }
 0x148   : > { %v906_v0 = vadd.f32 0.041655596, %v905_v17  ;;  %v913_v19 = vadd.f32 0.008332121, %v912_v23  ;;  %v1027_v44 = vadd.s32 1, %v1023_v15  ;;  %v1109_v54 = vshll.u32 %v3084_v38, %v1100_v27 }
 0x149   : > { %v1110_v61 = vshrl.u32 %v3085_v40, %v3682_v50  ;;  %v1112_v3 = vshll.u32 %v3085_v40, %v1100_v27  ;;  %v1113_v48 = vshrl.u32 %v3086_v43, %v3682_v50  ;;  %v921_v24 = vand.u32 3, %v920_v35 }
 0x14a   : > { %v907_v14 = vmul.f32 %v906_v0, %v904_v31  ;;  %v914_v2 = vmul.f32 %v913_v19, %v904_v31  ;;  %v1028_v59 = vsel %vm1026_vm15, %v1027_v44, %v1023_v15  ;;  %v3700_v32 = vor.u32 %v1104_v53, %v1103_v5  ;;  %v281_v5 = vpop.f32.mrf.mxu1 }
 0x14b   : > { %v1029_v28 = vadd.s32 %v1028_v59, %v1024_v6  ;;  %v1114_v16 = vor.u32 %v1113_v48, %v1112_v3  ;;  %v1115_v49 = vshll.u32 %v3086_v43, %v1100_v27  ;;  %v3703_v55 = vor.u32 %v1107_v30, %v1106_v56  ;;  %v3755_v59 = vld [vmem:[%s5044_s2] ss:$0 sm:$0xff] }
 0x14c   : > { %v908_v58 = vadd.f32 -0.4999988, %v907_v14  ;;  %v915_v18 = vadd.f32 -0.16666654, %v914_v2  ;;  %v1116_v10 = vshrl.u32 %v3087_v52, %v3682_v50  ;;  %v3707_v20 = vor.u32 %v1110_v61, %v1109_v54 }
 0x14d   : > { %v1030_v7 = vadd.s32 536870912, %v1029_v28  ;;  %vm1118_vm1 = vcmp.lt.s32.totalorder %v3684_v60, 1  ;;  %vm1121_vm2 = vcmp.lt.s32.totalorder %v3684_v60, 4  ;;  %vm1120_vm3 = vcmp.lt.s32.totalorder %v3684_v60, 3 }
 0x14e   : > { %v909_v22 = vmul.f32 %v908_v58, %v904_v31  ;;  %v916_v11 = vmul.f32 %v915_v18, %v904_v31  ;;  %v1117_v26 = vor.u32 %v1116_v10, %v1115_v49  ;;  %v1127_v46 = vsel %vm1121_vm2, %v1114_v16, 920167782 }
 0x14f   : > { %v3712_v8 = vshrl.u32 %v1030_v7, 30  ;;  %vm919_vm4 = vweird.f32 %v3299_v45  ;;  %vm922_vm5 = vcmp.lt.s32.totalorder %v921_v24, 2  ;;  %v1126_v4 = vsel %vm1118_vm1, %v3700_v32, %v3703_v55 }
 0x150   : > { %v910_v21 = vadd.f32 1.0, %v909_v22  ;;  %v917_v12 = vadd.f32 1.0, %v916_v11  ;;  %v1128_v41 = vsel %vm1120_vm3, %v3707_v20, %v1127_v46  ;;  %v3727_v57 = vshll.u32 %v1094_v1, 8 }
 0x151   : > { %v1032_v25 = vshll.u32 %v3712_v8, 30  ;;  %v1130_v35 = vsel %vm1118_vm1, %v3703_v55, %v3707_v20  ;;  %v1131_v47 = vsel %vm1121_vm2, %v1117_v26, 1326507024  ;;  %vm923_vm6 = vcmp.eq.s32.totalorder %v921_v24, 0 }
 0x152   : > { %v918_v27 = vmul.f32 %v917_v12, %v902_v37  ;;  %v927_v31 = vxor.u32 2147483648, %v910_v21  ;;  %vm1119_vm7 = vcmp.lt.s32.totalorder %v3684_v60, 2  ;;  %v1132_v63 = vsel %vm1120_vm3, %v1114_v16, %v1131_v47 }
 0x153   : > { %v3735_v29 = vsub.s32 %v1029_v28, %v1032_v25  ;;  %vm926_vm8 = vcmp.eq.s32.totalorder %v921_v24, 2  ;;  %v1129_v37 = vsel %vm1119_vm7, %v1126_v4, %v1128_v41  ;;  %v1133_v6 = vsel %vm1119_vm7, %v1130_v35, %v1132_v63 }
 0x154   : > { %v924_v1 = vxor.u32 2147483648, %v918_v27  ;;  %v1135_v23 = vand.u32 65535, %v3727_v57  ;;  %v1137_v15 = vand.u32 65535, %v1133_v6  ;;  %v928_v56 = vsel %vm926_vm8, %v927_v31, %v918_v27 }
 0x155   : > { %vm1034_vm9 = vcmp.lt.s32.totalorder %v3735_v29, 0  ;;  %v1035_v17 = vsub.s32 0, %v3735_v29  ;;  %v1136_v0 = vshrl.u32 %v3727_v57, 16  ;;  %v1138_v19 = vshrl.u32 %v1133_v6, 16 }
 0x156   : > { %v925_v53 = vsel %vm923_vm6, %v910_v21, %v924_v1  ;;  %v1159_v54 = vand.u32 65535, %v1129_v37  ;;  %v1160_v61 = vshrl.u32 %v1129_v37, 16  ;;  %v3758_v28 = vadd.f32 %v3755_v59, %v281_v5 }
 0x157   : > { %v929_v44 = vsel %vm922_vm5, %v925_v53, %v928_v56  ;;  %v1036_v30 = vsel %vm1034_vm9, %v1035_v17, %v3735_v29  ;;  %v1140_v14 = vmul.u32 %v1138_v19, %v1135_v23  ;;  %v1141_v2 = vmul.u32 %v1137_v15, %v1136_v0 }
 0x158   : > { %v930_v3 = vsel %vm919_vm4, nan, %v929_v44  ;;  %v1037_v48 = vclz %v1036_v30  ;;  %v1025_v24 = vadd.s32 %v3679_v51, %v3677_v62  ;;  %vm933_vm10 = vcmp.lt.s32.totalorder %v3516_v9, 0 }
 0x159   : > { %2794 = vst [vmem:[%s3440_s8 + $0x18] sm:$0xff] %v930_v3  ;;  %v1102_v45 = vshrl.u32 %v3082_v34, %v3682_v50  ;;  %v1139_v49 = vmul.u32 %v1137_v15, %v1135_v23  ;;  %v1143_v58 = vshll.u32 %v1140_v14, 16  ;;  %v1055_v18 = vsub.s32 4, %v3712_v8 }
 0x15a   : > { %v2922_v16 = vadd.s32 4294967294, %v1037_v48  ;;  %v1142_v10 = vmul.u32 %v1138_v19, %v1136_v0  ;;  %v1161_v7 = vmul.u32 %v1159_v54, %v1135_v23  ;;  %v1162_v22 = vmul.u32 %v1160_v61, %v1135_v23 }
 0x15b   : > { %v1145_v11 = vshll.u32 %v1141_v2, 16  ;;  %vm1147_vm11 = vc.u32 %v1139_v49, %v1143_v58  ;;  %v1149_v26 = vadd.s32 %v1143_v58, %v1139_v49  ;;  %v1163_v51 = vmul.u32 %v1159_v54, %v1136_v0 }
 0x15c   : > { %vm2923_vm12 = vcmp.lt.s32.totalorder %v2922_v16, 0  ;;  %v1148_v62 = vsel %vm1147_vm11, 1, %v3088_v39  ;;  %v1165_v21 = vshll.u32 %v1162_v22, 16  ;;  %v1144_v4 = vshrl.u32 %v1140_v14, 16 }
 0x15d   : > { %v1040_v46 = vsel %vm2923_vm12, 0, %v2922_v16  ;;  %v1150_v50 = vadd.s32 %v1148_v62, %v1142_v10  ;;  %vm1151_vm13 = vc.u32 %v1149_v26, %v1145_v11  ;;  %v1164_v27 = vmul.u32 %v1160_v61, %v1136_v0  ;;  %v287_v26 = vpop.f32.mrf.mxu2 }
 0x15e   : > { %v1041_v12 = vsub.s32 32, %v1040_v46  ;;  %v1045_v25 = vsub.s32 4294967266, %v1040_v46  ;;  %v1042_v41 = vshll.u32 %v3735_v29, %v1040_v46  ;;  %vm1169_vm14 = vc.u32 %v1161_v7, %v1165_v21 }
 0x15f   : > { %v1152_v47 = vsel %vm1151_vm13, 1, %v3088_v39  ;;  %v1170_v63 = vsel %vm1169_vm14, 1, %v3088_v39  ;;  %v1167_v37 = vshll.u32 %v1163_v51, 16  ;;  %v1171_v6 = vadd.s32 %v1165_v21, %v1161_v7 }
 0x160   : > { %v1043_v31 = vshrl.u32 %v1025_v24, %v1041_v12  ;;  %v1046_v35 = vadd.s32 127, %v1045_v25  ;;  %v1154_v1 = vadd.s32 %v1152_v47, %v1150_v50  ;;  %v1172_v17 = vadd.s32 %v1170_v63, %v1164_v27 }
 0x161   : > { %vm3773_vm0 = vcmp.le.f32.partialorder %v931_v13, 0.7853982  ;;  %v1123_v5 = vsel %vm1121_vm2, %v3707_v20, 2102212464  ;;  %v1056_v53 = vsel %vm933_vm10, %v1055_v18, %v3712_v8  ;;  %vm1173_vm15 = vc.u32 %v1171_v6, %v1167_v37  ;;  %v284_v18 = vpop.f32.mrf.mxu1 }
 0x162   : > { %v1044_v29 = vor.u32 %v1043_v31, %v1042_v41  ;;  %v1047_v15 = vshll.u32 %v1046_v35, 23  ;;  %v1155_v56 = vadd.s32 %v1154_v1, %v1144_v4  ;;  %v1244_v0 = vand.u32 2139095040, %v3758_v28 }
 0x163   : > { %v1122_v13 = vsel %vm1118_vm1, %v1102_v45, %v3700_v32  ;;  %v1146_v44 = vshrl.u32 %v1141_v2, 16  ;;  %v1174_v30 = vsel %vm1173_vm15, 1, %v3088_v39  ;;  %v1124_v20 = vsel %vm1120_vm3, %v3703_v55, %v1123_v5 }
 0x164   : > { %v1048_v19 = vor.u32 4788187, %v1047_v15  ;;  %v1166_v54 = vshrl.u32 %v1162_v22, 16  ;;  %v1176_v61 = vadd.s32 %v1174_v30, %v1172_v17  ;;  %v1245_v3 = vshrl.u32 %v1244_v0, 23 }
 0x165   : > { %v1051_v48 = vcvt.s32.f32 %v1044_v29  ;;  %v1058_v14 = vsel %vm3773_vm0, 0, %v1056_v53  ;;  %v1156_v24 = vadd.s32 %v1155_v56, %v1146_v44  ;;  %v1168_v16 = vshrl.u32 %v1163_v51, 16 }
 0x166   : > { %v1049_v8 = vand.u32 2147483647, %v1048_v19  ;;  %v1177_v49 = vadd.s32 %v1176_v61, %v1166_v54  ;;  %v1241_v32 = vand.u32 2147483647, %v3758_v28  ;;  %v2927_v2 = vadd.s32 4294967169, %v1245_v3 }
 0x167   : > { %v1175_v58 = vadd.s32 %v1171_v6, %v1167_v37  ;;  %v1125_v55 = vsel %vm1119_vm7, %v1122_v13, %v1124_v20  ;;  %v1075_v11 = vadd.s32 3, %v1058_v14  ;;  %v3799_v51 = vadd.f32 %v3755_v59, %v284_v18 }
 0x168   : > { %v1052_v45 = vmul.f32 %v1051_v48, %v1049_v8  ;;  %v1178_v10 = vadd.s32 %v1177_v49, %v1168_v16  ;;  %v1251_v7 = vadd.s32 1, %v2927_v2  ;;  %v1248_v62 = vand.u32 8388607, %v1241_v32 }
 0x169   : > { %vm1181_vm1 = vc.u32 %v1156_v24, %v1175_v58  ;;  %v1179_v60 = vmul.u32 %v3727_v57, %v1125_v55  ;;  %v3810_v41 = vadd.f32 %v3755_v59, %v287_v26  ;;  %v3814_v31 = vand.u32 3, %v1075_v11 }
 0x16a   : > { %v1053_v22 = vxor.u32 2147483648, %v1052_v45  ;;  %v1182_v46 = vadd.s32 1, %v1178_v10  ;;  %vm1252_vm2 = vcmp.gt.s32.totalorder %v1251_v7, 0  ;;  %v3816_v47 = vadd.s32 %v1175_v58, %v1156_v24 }
 0x16b   : > { %v1253_v12 = vsel %vm1252_vm2, %v1251_v7, 0  ;;  %v1249_v57 = vor.u32 8388608, %v1248_v62  ;;  %v1396_v1 = vand.u32 2147483647, %v3799_v51  ;;  %v1399_v23 = vand.u32 2139095040, %v3799_v51 }
 0x16c   : > { %v1054_v21 = vsel %vm933_vm10, %v1053_v22, %v1052_v45  ;;  %v1183_v4 = vsel %vm1181_vm1, %v1182_v46, %v1178_v10  ;;  %v1255_v50 = vand.u32 31, %v1253_v12  ;;  %v3824_v13 = vshrl.u32 %v1253_v12, 5 }
 0x16d   : > { %v3807_v25 = vsel %vm3773_vm0, %v3516_v9, %v1054_v21  ;;  %v1184_v35 = vadd.s32 %v1183_v4, %v1179_v60  ;;  %v3832_v48 = vand.u32 8388607, %v1396_v1  ;;  %vm1088_vm3 = vcmp.lt.s32.totalorder %v3519_v33, 0 }
 0x16e   : > { %v1059_v27 = vmul.f32 %v3807_v25, %v3807_v25  ;;  %v1256_v63 = vsub.s32 32, %v1255_v50  ;;  %v1258_v29 = vshll.u32 %v3082_v34, %v1255_v50  ;;  %v1261_v5 = vshll.u32 %v3083_v36, %v1255_v50 }
 0x16f   : > { %v1185_v17 = vadd.s32 536870912, %v1184_v35  ;;  %v1264_v44 = vshll.u32 %v3084_v38, %v1255_v50  ;;  %v1267_v20 = vshll.u32 %v3085_v40, %v1255_v50  ;;  %v1270_v16 = vshll.u32 %v3086_v43, %v1255_v50 }
 0x170   : > { %v1060_v37 = vmul.f32 -0.001358992, %v1059_v27  ;;  %v1067_v6 = vmul.f32 -0.00019511016, %v1059_v27  ;;  %v1259_v15 = vshrl.u32 %v3083_v36, %v1256_v63  ;;  %v1262_v53 = vshrl.u32 %v3084_v38, %v1256_v63 }
 0x171   : > { %v1186_v19 = vshrl.u32 %v1185_v17, 30  ;;  %v1265_v30 = vshrl.u32 %v3085_v40, %v1256_v63  ;;  %v1268_v54 = vshrl.u32 %v3086_v43, %v1256_v63  ;;  %v3840_v49 = vshll.u32 %v1249_v57, 8 }
 0x172   : > { %v1061_v56 = vadd.f32 0.041655596, %v1060_v37  ;;  %v1068_v0 = vadd.f32 0.008332121, %v1067_v6  ;;  %v3835_v14 = vor.u32 %v1259_v15, %v1258_v29  ;;  %v3837_v24 = vor.u32 %v1262_v53, %v1261_v5 }
 0x173   : > { %v1187_v8 = vshll.u32 %v1186_v19, 30  ;;  %vm1081_vm4 = vcmp.eq.s32.totalorder %v3814_v31, 2  ;;  %v1271_v18 = vshrl.u32 %v3087_v52, %v1256_v63  ;;  %vm1078_vm5 = vcmp.eq.s32.totalorder %v3814_v31, 0 }
 0x174   : > { %v1062_v61 = vmul.f32 %v1061_v56, %v1059_v27  ;;  %v1069_v3 = vmul.f32 %v1068_v0, %v1059_v27  ;;  %v1266_v55 = vor.u32 %v1265_v30, %v1264_v44  ;;  %v1269_v10 = vor.u32 %v1268_v54, %v1267_v20 }
 0x175   : > { %v3843_v58 = vsub.s32 %v1184_v35, %v1187_v8  ;;  %vm1273_vm6 = vcmp.lt.s32.totalorder %v3824_v13, 1  ;;  %vm1276_vm7 = vcmp.lt.s32.totalorder %v3824_v13, 4  ;;  %vm1077_vm8 = vcmp.lt.s32.totalorder %v3814_v31, 2 }
 0x176   : > { %v1063_v2 = vadd.f32 -0.4999988, %v1062_v61  ;;  %v1070_v45 = vadd.f32 -0.16666654, %v1069_v3  ;;  %vm1074_vm10 = vweird.f32 %v3516_v9  ;;  %vm3855_vm12 = vcmp.le.f32.partialorder %v1086_v42, 0.7853982 }
 0x177   : > { %vm1189_vm9 = vcmp.lt.s32.totalorder %v3843_v58, 0  ;;  %v1190_v11 = vsub.s32 0, %v3843_v58  ;;  %v1210_v46 = vsub.s32 4, %v1186_v19  ;;  %vm1275_vm11 = vcmp.lt.s32.totalorder %v3824_v13, 3 }
 0x178   : > { %v1064_v7 = vmul.f32 %v1063_v2, %v1059_v27  ;;  %v1071_v22 = vmul.f32 %v1070_v45, %v1059_v27  ;;  %v1400_v62 = vshrl.u32 %v1399_v23, 23  ;;  %v1404_v21 = vor.u32 8388608, %v3832_v48 }
 0x179   : > { %v1191_v4 = vsel %vm1189_vm9, %v1190_v11, %v3843_v58  ;;  %v1272_v50 = vor.u32 %v1271_v18, %v1270_v16  ;;  %v1281_v42 = vsel %vm1273_vm6, %v3835_v14, %v3837_v24  ;;  %v1282_v35 = vsel %vm1276_vm7, %v1269_v10, 920167782 }
 0x17a   : > { %v1065_v60 = vadd.f32 1.0, %v1064_v7  ;;  %v1072_v12 = vadd.f32 1.0, %v1071_v22  ;;  %v1192_v27 = vclz %v1191_v4  ;;  %v1290_v57 = vand.u32 65535, %v3840_v49 }
 0x17b   : > { %v1283_v17 = vsel %vm1275_vm11, %v1266_v55, %v1282_v35  ;;  %v1291_v23 = vshrl.u32 %v3840_v49, 16  ;;  %v1257_v15 = vshrl.u32 %v3082_v34, %v1256_v63  ;;  %vm1274_vm13 = vcmp.lt.s32.totalorder %v3824_v13, 2 }
 0x17c   : > { %v1073_v37 = vmul.f32 %v1072_v12, %v3807_v25  ;;  %v1082_v6 = vxor.u32 2147483648, %v1065_v60  ;;  %v2925_v29 = vadd.s32 4294967294, %v1192_v27  ;;  %v1285_v5 = vsel %vm1273_vm6, %v3837_v24, %v1266_v55 }
 0x17d   : > { %v3880_v56 = vsel %vm1088_vm3, %v1210_v46, %v1186_v19  ;;  %v1284_v25 = vsel %vm1274_vm13, %v1281_v42, %v1283_v17  ;;  %v1286_v0 = vsel %vm1276_vm7, %v1272_v50, 1326507024  ;;  %v2930_v2 = vadd.s32 4294967169, %v1400_v62 }
 0x17e   : > { %v1079_v53 = vxor.u32 2147483648, %v1073_v37  ;;  %v1083_v63 = vsel %vm1081_vm4, %v1082_v6, %v1073_v37  ;;  %vm2926_vm14 = vcmp.lt.s32.totalorder %v2925_v29, 0  ;;  %v1287_v44 = vsel %vm1275_vm11, %v1269_v10, %v1286_v0 }
 0x17f   : > { %v1315_v30 = vshrl.u32 %v1284_v25, 16  ;;  %v1195_v19 = vsel %vm2926_vm14, 0, %v2925_v29  ;;  %v1288_v54 = vsel %vm1274_vm13, %v1285_v5, %v1287_v44  ;;  %v1314_v61 = vand.u32 65535, %v1284_v25 }
 0x180   : > { %v1080_v20 = vsel %vm1078_vm5, %v1065_v60, %v1079_v53  ;;  %v1196_v8 = vsub.s32 32, %v1195_v19  ;;  %v1200_v16 = vsub.s32 4294967266, %v1195_v19  ;;  %v1213_v18 = vsel %vm3855_vm12, 0, %v3880_v56 }
 0x181   : > { %v1084_v3 = vsel %vm1077_vm8, %v1080_v20, %v1083_v63  ;;  %v1292_v10 = vand.u32 65535, %v1288_v54  ;;  %v1293_v7 = vshrl.u32 %v1288_v54, 16  ;;  %v1197_v22 = vshll.u32 %v3843_v58, %v1195_v19 }
 0x182   : > { %v1085_v45 = vsel %vm1074_vm10, nan, %v1084_v3  ;;  %v1198_v11 = vshrl.u32 %v3816_v47, %v1196_v8  ;;  %v1201_v46 = vadd.s32 127, %v1200_v16  ;;  %v1317_v60 = vmul.u32 %v1315_v30, %v1290_v57 }
 0x183   : > { %2795 = vst [vmem:[%s3440_s8 + $0x20] sm:$0xff] %v1085_v45  ;;  %v1277_v31 = vsel %vm1273_vm6, %v1257_v15, %v3835_v14  ;;  %v1295_v62 = vmul.u32 %v1293_v7, %v1290_v57  ;;  %v1296_v9 = vmul.u32 %v1292_v10, %v1291_v23  ;;  %v1318_v12 = vmul.u32 %v1314_v61, %v1291_v23 }
 0x184   : > { %v1199_v4 = vor.u32 %v1198_v11, %v1197_v22  ;;  %v1202_v50 = vshll.u32 %v1201_v46, 23  ;;  %v1278_v27 = vsel %vm1276_vm7, %v1266_v55, 2102212464  ;;  %v1320_v42 = vshll.u32 %v1317_v60, 16 }
 0x185   : > { %v1294_v35 = vmul.u32 %v1292_v10, %v1290_v57  ;;  %v1297_v58 = vmul.u32 %v1293_v7, %v1291_v23  ;;  %v1298_v37 = vshll.u32 %v1295_v62, 16  ;;  %v1316_v47 = vmul.u32 %v1314_v61, %v1290_v57 }
 0x186   : > { %v1203_v6 = vor.u32 4788187, %v1202_v50  ;;  %v1206_v17 = vcvt.s32.f32 %v1199_v4  ;;  %v1300_v29 = vshll.u32 %v1296_v9, 16  ;;  %v1319_v5 = vmul.u32 %v1315_v30, %v1291_v23 }
 0x187   : > { %vm1302_vm0 = vc.u32 %v1294_v35, %v1298_v37  ;;  %v1304_v53 = vadd.s32 %v1298_v37, %v1294_v35  ;;  %v1322_v14 = vshll.u32 %v1318_v12, 16  ;;  %vm1324_vm15 = vc.u32 %v1316_v47, %v1320_v42 }
 0x188   : > { %v1204_v15 = vand.u32 2147483647, %v1203_v6  ;;  %v1303_v56 = vsel %vm1302_vm0, 1, %v3088_v39  ;;  %v1325_v25 = vsel %vm1324_vm15, 1, %v3088_v39  ;;  %v1326_v0 = vadd.s32 %v1320_v42, %v1316_v47 }
 0x189   : > { %v1305_v55 = vadd.s32 %v1303_v56, %v1297_v58  ;;  %vm1306_vm1 = vc.u32 %v1304_v53, %v1300_v29  ;;  %v1327_v63 = vadd.s32 %v1325_v25, %v1319_v5  ;;  %v1406_v44 = vadd.s32 1, %v2930_v2 }
 0x18a   : > { %v1207_v20 = vmul.f32 %v1206_v17, %v1204_v15  ;;  %v1279_v57 = vsel %vm1275_vm11, %v3837_v24, %v1278_v27  ;;  %v1307_v23 = vsel %vm1306_vm1, 1, %v3088_v39  ;;  %vm1328_vm2 = vc.u32 %v1326_v0, %v1322_v14 }
 0x18b   : > { %v1299_v30 = vshrl.u32 %v1295_v62, 16  ;;  %v1309_v19 = vadd.s32 %v1307_v23, %v1305_v55  ;;  %v1329_v54 = vsel %vm1328_vm2, 1, %v3088_v39  ;;  %vm1407_vm4 = vcmp.gt.s32.totalorder %v1406_v44, 0 }
 0x18c   : > { %v1208_v61 = vxor.u32 2147483648, %v1207_v20  ;;  %v1321_v3 = vshrl.u32 %v1317_v60, 16  ;;  %v1331_v8 = vadd.s32 %v1329_v54, %v1327_v63  ;;  %v1408_v16 = vsel %vm1407_vm4, %v1406_v44, 0 }
 0x18d   : > { %v1280_v2 = vsel %vm1274_vm13, %v1277_v31, %v1279_v57  ;;  %v1301_v45 = vshrl.u32 %v1296_v9, 16  ;;  %v1310_v10 = vadd.s32 %v1309_v19, %v1299_v30  ;;  %v1410_v7 = vand.u32 31, %v1408_v16 }
 0x18e   : > { %v1209_v24 = vsel %vm1088_vm3, %v1208_v61, %v1207_v20  ;;  %v1230_v22 = vadd.s32 3, %v1213_v18  ;;  %v1323_v11 = vshrl.u32 %v1318_v12, 16  ;;  %v1332_v46 = vadd.s32 %v1331_v8, %v1321_v3 }
 0x18f   : > { %v1212_v62 = vsel %vm3855_vm12, %v3519_v33, %v1209_v24  ;;  %v3923_v4 = vadd.s32 %v1310_v10, %v1301_v45  ;;  %v3925_v60 = vadd.s32 %v1326_v0, %v1322_v14  ;;  %v3927_v50 = vsub.s32 32, %v1410_v7 }
 0x190   : > { %v1214_v13 = vmul.f32 %v1212_v62, %v1212_v62  ;;  %v1333_v31 = vadd.s32 %v1332_v46, %v1323_v11  ;;  %v1334_v9 = vmul.u32 %v3840_v49, %v1280_v2  ;;  %v3930_v27 = vshrl.u32 %v1408_v16, 5 }
 0x191   : > { %vm1336_vm3 = vc.u32 %v3923_v4, %v3925_v60  ;;  %v1413_v18 = vshll.u32 %v3082_v34, %v1410_v7  ;;  %v1414_v26 = vshrl.u32 %v3083_v36, %v3927_v50  ;;  %v1416_v12 = vshll.u32 %v3083_v36, %v1410_v7 }
 0x192   : > { %v1215_v42 = vmul.f32 -0.001358992, %v1214_v13  ;;  %v1222_v35 = vmul.f32 -0.00019511016, %v1214_v13  ;;  %v1337_v58 = vadd.s32 1, %v1333_v31  ;;  %v1417_v37 = vshrl.u32 %v3084_v38, %v3927_v50 }
 0x193   : > { %v1419_v49 = vshll.u32 %v3084_v38, %v1410_v7  ;;  %v1420_v47 = vshrl.u32 %v3085_v40, %v3927_v50  ;;  %v1422_v6 = vshll.u32 %v3085_v40, %v1410_v7  ;;  %v1423_v17 = vshrl.u32 %v3086_v43, %v3927_v50 }
 0x194   : > { %v1216_v29 = vadd.f32 0.041655596, %v1215_v42  ;;  %v1223_v5 = vadd.f32 0.008332121, %v1222_v35  ;;  %v1231_v53 = vand.u32 3, %v1230_v22  ;;  %v1338_v14 = vsel %vm1336_vm3, %v1337_v58, %v1333_v31 }
 0x195   : > { %v1339_v15 = vadd.s32 %v1338_v14, %v1334_v9  ;;  %v3946_v56 = vor.u32 %v1414_v26, %v1413_v18  ;;  %v1424_v25 = vor.u32 %v1423_v17, %v1422_v6  ;;  %v1425_v0 = vshll.u32 %v3086_v43, %v1410_v7 }
 0x196   : > { %v1217_v55 = vmul.f32 %v1216_v29, %v1214_v13  ;;  %v1224_v63 = vmul.f32 %v1223_v5, %v1214_v13  ;;  %v3949_v44 = vor.u32 %v1417_v37, %v1416_v12  ;;  %v1426_v20 = vshrl.u32 %v3087_v52, %v3927_v50 }
 0x197   : > { %v1340_v57 = vadd.s32 536870912, %v1339_v15  ;;  %v1421_v23 = vor.u32 %v1420_v47, %v1419_v49  ;;  %vm1428_vm5 = vcmp.lt.s32.totalorder %v3930_v27, 1  ;;  %vm1431_vm6 = vcmp.lt.s32.totalorder %v3930_v27, 4 }
 0x198   : > { %v1218_v30 = vadd.f32 -0.4999988, %v1217_v55  ;;  %v1225_v19 = vadd.f32 -0.16666654, %v1224_v63  ;;  %v1427_v54 = vor.u32 %v1426_v20, %v1425_v0  ;;  %vm1430_vm7 = vcmp.lt.s32.totalorder %v3930_v27, 3 }
 0x199   : > { %v1341_v61 = vshrl.u32 %v1340_v57, 30  ;;  %v1437_v3 = vsel %vm1431_vm6, %v1424_v25, 920167782  ;;  %v1554_v8 = vand.u32 2139095040, %v3810_v41  ;;  %vm1232_vm8 = vcmp.lt.s32.totalorder %v1231_v53, 2 }
 0x19a   : > { %v1219_v16 = vmul.f32 %v1218_v30, %v1214_v13  ;;  %v1226_v2 = vmul.f32 %v1225_v19, %v1214_v13  ;;  %vm1233_vm9 = vcmp.eq.s32.totalorder %v1231_v53, 0  ;;  %vm1229_vm10 = vweird.f32 %v3519_v33 }
 0x19b   : > { %v1342_v45 = vshll.u32 %v1341_v61, 30  ;;  %v1436_v10 = vsel %vm1428_vm5, %v3946_v56, %v3949_v44  ;;  %v1438_v7 = vsel %vm1430_vm7, %v1421_v23, %v1437_v3  ;;  %v3968_v24 = vshll.u32 %v1404_v21, 8 }
 0x19c   : > { %v1220_v22 = vadd.f32 1.0, %v1219_v16  ;;  %v1227_v11 = vadd.f32 1.0, %v1226_v2  ;;  %vm1243_vm12 = vcmp.lt.s32.totalorder %v3758_v28, 0  ;;  %v1440_v46 = vsel %vm1428_vm5, %v3949_v44, %v1421_v23 }
 0x19d   : > { %v1441_v13 = vsel %vm1431_vm6, %v1427_v54, 1326507024  ;;  %vm1236_vm11 = vcmp.eq.s32.totalorder %v1231_v53, 2  ;;  %v1343_v31 = vsub.s32 %v1339_v15, %v1342_v45  ;;  %vm1429_vm13 = vcmp.lt.s32.totalorder %v3930_v27, 2 }
 0x19e   : > { %v1442_v48 = vsel %vm1430_vm7, %v1424_v25, %v1441_v13  ;;  %v1228_v21 = vmul.f32 %v1227_v11, %v1212_v62  ;;  %v1237_v9 = vxor.u32 2147483648, %v1220_v22  ;;  %v1439_v18 = vsel %vm1429_vm13, %v1436_v10, %v1438_v7 }
 0x19f   : > { %v1443_v26 = vsel %vm1429_vm13, %v1440_v46, %v1442_v48  ;;  %vm1344_vm14 = vcmp.lt.s32.totalorder %v1343_v31, 0  ;;  %v1345_v12 = vsub.s32 0, %v1343_v31  ;;  %v1445_v42 = vand.u32 65535, %v3968_v24 }
 0x1a0   : > { %v1447_v35 = vand.u32 65535, %v1443_v26  ;;  %v1234_v58 = vxor.u32 2147483648, %v1228_v21  ;;  %v1446_v37 = vshrl.u32 %v3968_v24, 16  ;;  %v1448_v49 = vshrl.u32 %v1443_v26, 16 }
 0x1a1   : > { %v1555_v47 = vshrl.u32 %v1554_v8, 23  ;;  %v1238_v6 = vsel %vm1236_vm11, %v1237_v9, %v1228_v21  ;;  %v1346_v62 = vsel %vm1344_vm14, %v1345_v12, %v1343_v31  ;;  %v1365_v17 = vsub.s32 4, %v1341_v61 }
 0x1a2   : > { %v1470_v29 = vshrl.u32 %v1439_v18, 16  ;;  %v1235_v5 = vsel %vm1233_vm9, %v1220_v22, %v1234_v58  ;;  %v1347_v14 = vclz %v1346_v62  ;;  %v1450_v15 = vmul.u32 %v1448_v49, %v1445_v42 }
 0x1a3   : > { %v1451_v25 = vmul.u32 %v1447_v35, %v1446_v37  ;;  %v1239_v0 = vsel %vm1232_vm8, %v1235_v5, %v1238_v6  ;;  %v1335_v55 = vadd.s32 %v3925_v60, %v3923_v4  ;;  %v1412_v63 = vshrl.u32 %v3082_v34, %v3927_v50 }
 0x1a4   : > { %v1469_v20 = vand.u32 65535, %v1439_v18  ;;  %v1240_v57 = vsel %vm1229_vm10, nan, %v1239_v0  ;;  %v2928_v30 = vadd.s32 4294967294, %v1347_v14  ;;  %v1449_v19 = vmul.u32 %v1447_v35, %v1445_v42 }
 0x1a5   : > { %v1453_v54 = vshll.u32 %v1450_v15, 16  ;;  %v1366_v3 = vsel %vm1243_vm12, %v1365_v17, %v1341_v61  ;;  %v1433_v53 = vsel %vm1431_vm6, %v1421_v23, 2102212464  ;;  %v1452_v8 = vmul.u32 %v1448_v49, %v1446_v37  ;;  %2796 = vst [vmem:[%s3440_s8 + $0x28] sm:$0xff] %v1240_v57 }
 0x1a6   : > { %v1472_v16 = vmul.u32 %v1470_v29, %v1445_v42  ;;  %vm4001_vm0 = vcmp.le.f32.partialorder %v1241_v32, 0.7853982  ;;  %vm2929_vm15 = vcmp.lt.s32.totalorder %v2928_v30, 0  ;;  %v1455_v33 = vshll.u32 %v1451_v25, 16 }
 0x1a7   : > { %vm1457_vm1 = vc.u32 %v1449_v19, %v1453_v54  ;;  %v1459_v60 = vadd.s32 %v1453_v54, %v1449_v19  ;;  %v1350_v50 = vsel %vm2929_vm15, 0, %v2928_v30  ;;  %v1473_v61 = vmul.u32 %v1469_v20, %v1446_v37 }
 0x1a8   : > { %v1458_v2 = vsel %vm1457_vm1, 1, %v3088_v39  ;;  %v1475_v45 = vshll.u32 %v1472_v16, 16  ;;  %v1351_v10 = vsub.s32 32, %v1350_v50  ;;  %v1355_v23 = vsub.s32 4294967266, %v1350_v50 }
 0x1a9   : > { %v1460_v7 = vadd.s32 %v1458_v2, %v1452_v8  ;;  %v1471_v22 = vmul.u32 %v1469_v20, %v1445_v42  ;;  %v1352_v11 = vshll.u32 %v1343_v31, %v1350_v50  ;;  %v1454_v46 = vshrl.u32 %v1450_v15, 16 }
 0x1aa   : > { %vm1461_vm2 = vc.u32 %v1459_v60, %v1455_v33  ;;  %v1474_v32 = vmul.u32 %v1470_v29, %v1446_v37  ;;  %v1353_v13 = vshrl.u32 %v1335_v55, %v1351_v10  ;;  %v1356_v48 = vadd.s32 127, %v1355_v23 }
 0x1ab   : > { %v1462_v21 = vsel %vm1461_vm2, 1, %v3088_v39  ;;  %vm1479_vm4 = vc.u32 %v1471_v22, %v1475_v45  ;;  %v1477_v18 = vshll.u32 %v1473_v61, 16  ;;  %v1481_v12 = vadd.s32 %v1475_v45, %v1471_v22 }
 0x1ac   : > { %v1464_v9 = vadd.s32 %v1462_v21, %v1460_v7  ;;  %v1480_v26 = vsel %vm1479_vm4, 1, %v3088_v39  ;;  %v1354_v35 = vor.u32 %v1353_v13, %v1352_v11  ;;  %v1357_v58 = vshll.u32 %v1356_v48, 23 }
 0x1ad   : > { %v1482_v49 = vadd.s32 %v1480_v26, %v1474_v32  ;;  %v2933_v6 = vadd.s32 4294967169, %v1555_v47  ;;  %v1432_v31 = vsel %vm1428_vm5, %v1412_v63, %v3946_v56  ;;  %v1434_v42 = vsel %vm1430_vm7, %v3949_v44, %v1433_v53 }
 0x1ae   : > { %v1465_v37 = vadd.s32 %v1464_v9, %v1454_v46  ;;  %vm1483_vm3 = vc.u32 %v1481_v12, %v1477_v18  ;;  %v1358_v62 = vor.u32 4788187, %v1357_v58  ;;  %v1456_v17 = vshrl.u32 %v1451_v25, 16 }
 0x1af   : > { %v1484_v29 = vsel %vm1483_vm3, 1, %v3088_v39  ;;  %v1561_v5 = vadd.s32 1, %v2933_v6  ;;  %v1368_v14 = vsel %vm4001_vm0, 0, %v1366_v3  ;;  %v1476_v15 = vshrl.u32 %v1472_v16, 16 }
 0x1b0   : > { %v1486_v47 = vadd.s32 %v1484_v29, %v1482_v49  ;;  %v1551_v0 = vand.u32 2147483647, %v3810_v41  ;;  %v1359_v55 = vand.u32 2147483647, %v1358_v62  ;;  %v1361_v56 = vcvt.s32.f32 %v1354_v35 }
 0x1b1   : > { %v4018_v63 = vadd.s32 %v1465_v37, %v1456_v17  ;;  %vm1562_vm5 = vcmp.gt.s32.totalorder %v1561_v5, 0  ;;  %v1435_v44 = vsel %vm1429_vm13, %v1432_v31, %v1434_v42  ;;  %v1478_v20 = vshrl.u32 %v1473_v61, 16  ;;  %v290_v37 = vpop.f32.mrf.mxu2 }
 0x1b2   : > { %v1487_v25 = vadd.s32 %v1486_v47, %v1476_v15  ;;  %v1563_v57 = vsel %vm1562_vm5, %v1561_v5, 0  ;;  %v1362_v30 = vmul.f32 %v1361_v56, %v1359_v55  ;;  %v4022_v19 = vadd.s32 %v1481_v12, %v1477_v18 }
 0x1b3   : > { %v1565_v54 = vand.u32 31, %v1563_v57  ;;  %v1385_v3 = vadd.s32 3, %v1368_v14  ;;  %v1489_v16 = vmul.u32 %v3968_v24, %v1435_v44  ;;  %v1558_v27 = vand.u32 8388607, %v1551_v0 }
 0x1b4   : > { %v1488_v53 = vadd.s32 %v1487_v25, %v1478_v20  ;;  %v1363_v8 = vxor.u32 2147483648, %v1362_v30  ;;  %vm1491_vm6 = vc.u32 %v4018_v63, %v4022_v19  ;;  %v4031_v50 = vshrl.u32 %v1563_v57, 5 }
 0x1b5   : > { %v4027_v33 = vsub.s32 32, %v1565_v54  ;;  %v1571_v2 = vshll.u32 %v3083_v36, %v1565_v54  ;;  %v1577_v10 = vshll.u32 %v3085_v40, %v1565_v54  ;;  %v1568_v13 = vshll.u32 %v3082_v34, %v1565_v54 }
 0x1b6   : > { %v1492_v60 = vadd.s32 1, %v1488_v53  ;;  %v1364_v61 = vsel %vm1243_vm12, %v1363_v8, %v1362_v30  ;;  %v1574_v48 = vshll.u32 %v3084_v38, %v1565_v54  ;;  %v1580_v18 = vshll.u32 %v3086_v43, %v1565_v54 }
 0x1b7   : > { %v1569_v45 = vshrl.u32 %v3083_v36, %v4027_v33  ;;  %v1572_v24 = vshrl.u32 %v3084_v38, %v4027_v33  ;;  %v1367_v23 = vsel %vm4001_vm0, %v3758_v28, %v1364_v61  ;;  %v1575_v22 = vshrl.u32 %v3085_v40, %v4027_v33 }
 0x1b8   : > { %v1493_v7 = vsel %vm1491_vm6, %v1492_v60, %v1488_v53  ;;  %v1578_v11 = vshrl.u32 %v3086_v43, %v4027_v33  ;;  %v1369_v46 = vmul.f32 %v1367_v23, %v1367_v23  ;;  %v1581_v4 = vshrl.u32 %v3087_v52, %v4027_v33 }
 0x1b9   : > { %v1494_v32 = vadd.s32 %v1493_v7, %v1489_v16  ;;  %v4050_v21 = vor.u32 %v1572_v24, %v1571_v2  ;;  %v1576_v58 = vor.u32 %v1575_v22, %v1574_v48  ;;  %v4055_v49 = vand.u32 3, %v1385_v3 }
 0x1ba   : > { %v1579_v9 = vor.u32 %v1578_v11, %v1577_v10  ;;  %v1370_v26 = vmul.f32 -0.001358992, %v1369_v46  ;;  %v1377_v12 = vmul.f32 -0.00019511016, %v1369_v46  ;;  %v1559_v6 = vor.u32 8388608, %v1558_v27 }
 0x1bb   : > { %v1495_v35 = vadd.s32 536870912, %v1494_v32  ;;  %v4057_v31 = vor.u32 %v1569_v45, %v1568_v13  ;;  %v1582_v42 = vor.u32 %v1581_v4, %v1580_v18  ;;  %vm1586_vm7 = vcmp.lt.s32.totalorder %v4031_v50, 4 }
 0x1bc   : > { %v1371_v62 = vadd.f32 0.041655596, %v1370_v26  ;;  %v1378_v17 = vadd.f32 0.008332121, %v1377_v12  ;;  %vm1583_vm8 = vcmp.lt.s32.totalorder %v4031_v50, 1  ;;  %vm1585_vm9 = vcmp.lt.s32.totalorder %v4031_v50, 3 }
 0x1bd   : > { %v4059_v29 = vshrl.u32 %v1495_v35, 30  ;;  %v1592_v5 = vsel %vm1586_vm7, %v1579_v9, 920167782  ;;  %v1596_v14 = vsel %vm1586_vm7, %v1582_v42, 1326507024  ;;  %v1595_v56 = vsel %vm1583_vm8, %v4050_v21, %v1576_v58 }
 0x1be   : > { %v1372_v15 = vmul.f32 %v1371_v62, %v1369_v46  ;;  %v1379_v47 = vmul.f32 %v1378_v17, %v1369_v46  ;;  %v4073_v44 = vadd.f32 %v3755_v59, %v290_v37  ;;  %v1597_v20 = vsel %vm1585_vm9, %v1579_v9, %v1596_v14 }
 0x1bf   : > { %v1497_v55 = vshll.u32 %v4059_v29, 30  ;;  %v4077_v25 = vshll.u32 %v1559_v6, 8  ;;  %vm1584_vm10 = vcmp.lt.s32.totalorder %v4031_v50, 2  ;;  %vm1388_vm12 = vcmp.eq.s32.totalorder %v4055_v49, 0 }
 0x1c0   : > { %v1373_v57 = vadd.f32 -0.4999988, %v1372_v15  ;;  %v1380_v30 = vadd.f32 -0.16666654, %v1379_v47  ;;  %v1591_v3 = vsel %vm1583_vm8, %v4057_v31, %v4050_v21  ;;  %v1593_v59 = vsel %vm1585_vm9, %v1576_v58, %v1592_v5 }
 0x1c1   : > { %v4079_v54 = vsub.s32 %v1494_v32, %v1497_v55  ;;  %v1598_v53 = vsel %vm1584_vm10, %v1595_v56, %v1597_v20  ;;  %vm1387_vm11 = vcmp.lt.s32.totalorder %v4055_v49, 2  ;;  %vm1384_vm14 = vweird.f32 %v3758_v28 }
 0x1c2   : > { %v1374_v8 = vmul.f32 %v1373_v57, %v1369_v46  ;;  %v1381_v16 = vmul.f32 %v1380_v30, %v1369_v46  ;;  %vm1391_vm0 = vcmp.eq.s32.totalorder %v4055_v49, 2  ;;  %v1600_v27 = vand.u32 65535, %v4077_v25 }
 0x1c3   : > { %vm1499_vm13 = vcmp.lt.s32.totalorder %v4079_v54, 0  ;;  %v1500_v60 = vsub.s32 0, %v4079_v54  ;;  %v1602_v2 = vand.u32 65535, %v1598_v53  ;;  %v1603_v61 = vshrl.u32 %v1598_v53, 16 }
 0x1c4   : > { %v1375_v45 = vadd.f32 1.0, %v1374_v8  ;;  %v1382_v24 = vadd.f32 1.0, %v1381_v16  ;;  %v1601_v7 = vshrl.u32 %v4077_v25, 16  ;;  %v1490_v22 = vadd.s32 %v4022_v19, %v4018_v63 }
 0x1c5   : > { %v1501_v10 = vsel %vm1499_vm13, %v1500_v60, %v4079_v54  ;;  %v1594_v46 = vsel %vm1584_vm10, %v1591_v3, %v1593_v59  ;;  %v1605_v32 = vmul.u32 %v1603_v61, %v1600_v27  ;;  %v1709_v18 = vand.u32 2139095040, %v4073_v44 }
 0x1c6   : > { %v1502_v11 = vclz %v1501_v10  ;;  %v1383_v13 = vmul.f32 %v1382_v24, %v1367_v23  ;;  %v1392_v48 = vxor.u32 2147483648, %v1375_v45  ;;  %v4103_v9 = vmul.u32 %v1602_v2, %v1601_v7 }
 0x1c7   : > { %vm1398_vm15 = vcmp.lt.s32.totalorder %v3799_v51, 0  ;;  %v1520_v26 = vsub.s32 4, %v4059_v29  ;;  %v1567_v12 = vshrl.u32 %v3082_v34, %v4027_v33  ;;  %v1588_v63 = vsel %vm1586_vm7, %v1576_v58, 2102212464 }
 0x1c8   : > { %v2931_v4 = vadd.s32 4294967294, %v1502_v11  ;;  %v1389_v19 = vxor.u32 2147483648, %v1383_v13  ;;  %v1604_v35 = vmul.u32 %v1602_v2, %v1600_v27  ;;  %v1608_v6 = vshll.u32 %v1605_v32, 16 }
 0x1c9   : > { %v1624_v23 = vand.u32 65535, %v1594_v46  ;;  %v1393_v42 = vsel %vm1391_vm0, %v1392_v48, %v1383_v13  ;;  %v1610_v37 = vshll.u32 %v4103_v9, 16  ;;  %v1625_v62 = vshrl.u32 %v1594_v46, 16 }
 0x1ca   : > { %vm2932_vm1 = vcmp.lt.s32.totalorder %v2931_v4, 0  ;;  %v1390_v17 = vsel %vm1388_vm12, %v1375_v45, %v1389_v19  ;;  %vm1612_vm2 = vc.u32 %v1604_v35, %v1608_v6  ;;  %v1614_v33 = vadd.s32 %v1608_v6, %v1604_v35 }
 0x1cb   : > { %v1505_v5 = vsel %vm2932_vm1, 0, %v2931_v4  ;;  %v1394_v58 = vsel %vm1387_vm11, %v1390_v17, %v1393_v42  ;;  %vm4121_vm4 = vcmp.le.f32.partialorder %v1396_v1, 0.7853982  ;;  %v1607_v55 = vmul.u32 %v1603_v61, %v1601_v7 }
 0x1cc   : > { %v1506_v15 = vsub.s32 32, %v1505_v5  ;;  %v1510_v47 = vsub.s32 4294967266, %v1505_v5  ;;  %v1395_v56 = vsel %vm1384_vm14, nan, %v1394_v58  ;;  %v1507_v20 = vshll.u32 %v4079_v54, %v1505_v5 }
 0x1cd   : > { %v1613_v57 = vsel %vm1612_vm2, 1, %v3088_v39  ;;  %vm1616_vm3 = vc.u32 %v1614_v33, %v1610_v37  ;;  %2797 = vst [vmem:[%s3440_s8 + $0x30] sm:$0xff] %v1395_v56  ;;  %v1587_v1 = vsel %vm1583_vm8, %v1567_v12, %v4057_v31  ;;  %v1609_v53 = vshrl.u32 %v1605_v32, 16 }
 0x1ce   : > { %v1508_v30 = vshrl.u32 %v1490_v22, %v1506_v15  ;;  %v1511_v49 = vadd.s32 127, %v1510_v47  ;;  %v1615_v3 = vadd.s32 %v1613_v57, %v1607_v55  ;;  %v1617_v59 = vsel %vm1616_vm3, 1, %v3088_v39 }
 0x1cf   : > { %v1627_v8 = vmul.u32 %v1625_v62, %v1600_v27  ;;  %v1628_v16 = vmul.u32 %v1624_v23, %v1601_v7  ;;  %v1710_v54 = vshrl.u32 %v1709_v18, 23  ;;  %v1521_v61 = vsel %vm1398_vm15, %v1520_v26, %v4059_v29 }
 0x1d0   : > { %v1509_v28 = vor.u32 %v1508_v30, %v1507_v20  ;;  %v1512_v60 = vshll.u32 %v1511_v49, 23  ;;  %v1619_v2 = vadd.s32 %v1617_v59, %v1615_v3  ;;  %v1589_v45 = vsel %vm1585_vm9, %v4050_v21, %v1588_v63 }
 0x1d1   : > { %v1626_v24 = vmul.u32 %v1624_v23, %v1600_v27  ;;  %v1630_v10 = vshll.u32 %v1627_v8, 16  ;;  %v1611_v31 = vshrl.u32 %v4103_v9, 16  ;;  %v2936_v46 = vadd.s32 4294967169, %v1710_v54 }
 0x1d2   : > { %v1513_v22 = vor.u32 4788187, %v1512_v60  ;;  %v1620_v11 = vadd.s32 %v1619_v2, %v1609_v53  ;;  %v1629_v32 = vmul.u32 %v1625_v62, %v1601_v7  ;;  %v1632_v13 = vshll.u32 %v1628_v16, 16 }
 0x1d3   : > { %vm1634_vm5 = vc.u32 %v1626_v24, %v1630_v10  ;;  %v1636_v48 = vadd.s32 %v1630_v10, %v1626_v24  ;;  %v1516_v4 = vcvt.s32.f32 %v1509_v28  ;;  %v1716_v29 = vadd.s32 1, %v2936_v46 }
 0x1d4   : > { %v1514_v18 = vand.u32 2147483647, %v1513_v22  ;;  %v1635_v12 = vsel %vm1634_vm5, 1, %v3088_v39  ;;  %v1523_v26 = vsel %vm4121_vm4, 0, %v1521_v61  ;;  %v1706_v27 = vand.u32 2147483647, %v4073_v44 }
 0x1d5   : > { %v1637_v21 = vadd.s32 %v1635_v12, %v1629_v32  ;;  %vm1638_vm6 = vc.u32 %v1636_v48, %v1632_v13  ;;  %v4145_v9 = vadd.s32 %v1620_v11, %v1611_v31  ;;  %vm1717_vm7 = vcmp.gt.s32.totalorder %v1716_v29, 0 }
 0x1d6   : > { %v1517_v63 = vmul.f32 %v1516_v4, %v1514_v18  ;;  %v1639_v7 = vsel %vm1638_vm6, 1, %v3088_v39  ;;  %v1590_v19 = vsel %vm1584_vm10, %v1587_v1, %v1589_v45  ;;  %v1631_v35 = vshrl.u32 %v1627_v8, 16 }
 0x1d7   : > { %v1641_v6 = vadd.s32 %v1639_v7, %v1637_v21  ;;  %v1718_v23 = vsel %vm1717_vm7, %v1716_v29, 0  ;;  %v4150_v37 = vadd.s32 %v1636_v48, %v1632_v13  ;;  %v1540_v17 = vadd.s32 3, %v1523_v26  ;;  %v293_v13 = vpop.f32.mrf.mxu2 }
 0x1d8   : > { %v1518_v42 = vxor.u32 2147483648, %v1517_v63  ;;  %v1720_v62 = vand.u32 31, %v1718_v23  ;;  %v1633_v5 = vshrl.u32 %v1628_v16, 16  ;;  %v1713_v58 = vand.u32 8388607, %v1706_v27 }
 0x1d9   : > { %v1642_v33 = vadd.s32 %v1641_v6, %v1631_v35  ;;  %v1644_v47 = vmul.u32 %v4077_v25, %v1590_v19  ;;  %vm1646_vm8 = vc.u32 %v4145_v9, %v4150_v37  ;;  %v4164_v20 = vshrl.u32 %v1718_v23, 5  ;;  %v4202_v19 = vld [vmem:[%s5044_s2] ss:$0 sm:$0xff] }
 0x1da   : > { %v1519_v15 = vsel %vm1398_vm15, %v1518_v42, %v1517_v63  ;;  %v4159_v50 = vsub.s32 32, %v1720_v62  ;;  %v1723_v57 = vshll.u32 %v3082_v34, %v1720_v62  ;;  %v1726_v25 = vshll.u32 %v3083_v36, %v1720_v62 }
 0x1db   : > { %v1522_v55 = vsel %vm4121_vm4, %v3799_v51, %v1519_v15  ;;  %v1643_v56 = vadd.s32 %v1642_v33, %v1633_v5  ;;  %v1732_v14 = vshll.u32 %v3085_v40, %v1720_v62  ;;  %v1729_v28 = vshll.u32 %v3084_v38, %v1720_v62 }
 0x1dc   : > { %v1524_v30 = vmul.f32 %v1522_v55, %v1522_v55  ;;  %v1724_v49 = vshrl.u32 %v3083_v36, %v4159_v50  ;;  %v1727_v3 = vshrl.u32 %v3084_v38, %v4159_v50  ;;  %v1730_v1 = vshrl.u32 %v3085_v40, %v4159_v50 }
 0x1dd   : > { %v1647_v59 = vadd.s32 1, %v1643_v56  ;;  %v1733_v53 = vshrl.u32 %v3086_v43, %v4159_v50  ;;  %v1735_v60 = vshll.u32 %v3086_v43, %v1720_v62  ;;  %v1736_v45 = vshrl.u32 %v3087_v52, %v4159_v50 }
 0x1de   : > { %v1525_v8 = vmul.f32 -0.001358992, %v1524_v30  ;;  %v1532_v16 = vmul.f32 -0.00019511016, %v1524_v30  ;;  %v4182_v54 = vor.u32 %v1724_v49, %v1723_v57  ;;  %v4186_v31 = vor.u32 %v1727_v3, %v1726_v25 }
 0x1df   : > { %v1648_v2 = vsel %vm1646_vm8, %v1647_v59, %v1643_v56  ;;  %v1734_v61 = vor.u32 %v1733_v53, %v1732_v14  ;;  %v1541_v11 = vand.u32 3, %v1540_v17  ;;  %v1731_v46 = vor.u32 %v1730_v1, %v1729_v28 }
 0x1e0   : > { %v1526_v24 = vadd.f32 0.041655596, %v1525_v8  ;;  %v1533_v10 = vadd.f32 0.008332121, %v1532_v16  ;;  %v1649_v22 = vadd.s32 %v1648_v2, %v1644_v47  ;;  %v1737_v32 = vor.u32 %v1736_v45, %v1735_v60 }
 0x1e1   : > { %vm1741_vm9 = vcmp.lt.s32.totalorder %v4164_v20, 4  ;;  %v1714_v12 = vor.u32 8388608, %v1713_v58  ;;  %vm1738_vm10 = vcmp.lt.s32.totalorder %v4164_v20, 1  ;;  %vm1740_vm12 = vcmp.lt.s32.totalorder %v4164_v20, 3 }
 0x1e2   : > { %v1527_v48 = vmul.f32 %v1526_v24, %v1524_v30  ;;  %v1534_v18 = vmul.f32 %v1533_v10, %v1524_v30  ;;  %v1650_v4 = vadd.s32 536870912, %v1649_v22  ;;  %v1747_v29 = vsel %vm1741_vm9, %v1734_v61, 920167782 }
 0x1e3   : > { %v1746_v7 = vsel %vm1738_vm10, %v4182_v54, %v4186_v31  ;;  %v4205_v35 = vadd.f32 %v4202_v19, %v293_v13  ;;  %vm1739_vm11 = vcmp.lt.s32.totalorder %v4164_v20, 2  ;;  %v1748_v6 = vsel %vm1740_vm12, %v1731_v46, %v1747_v29 }
 0x1e4   : > { %v1528_v26 = vadd.f32 -0.4999988, %v1527_v48  ;;  %v1535_v21 = vadd.f32 -0.16666654, %v1534_v18  ;;  %v4193_v63 = vshrl.u32 %v1650_v4, 30  ;;  %v1750_v5 = vsel %vm1738_vm10, %v4186_v31, %v1731_v46 }
 0x1e5   : > { %v1751_v23 = vsel %vm1741_vm9, %v1737_v32, 1326507024  ;;  %vm1539_vm13 = vweird.f32 %v3799_v51  ;;  %vm1542_vm14 = vcmp.lt.s32.totalorder %v1541_v11, 2  ;;  %v1749_v33 = vsel %vm1739_vm11, %v1746_v7, %v1748_v6 }
 0x1e6   : > { %v1529_v42 = vmul.f32 %v1528_v26, %v1524_v30  ;;  %v1536_v62 = vmul.f32 %v1535_v21, %v1524_v30  ;;  %v1652_v17 = vshll.u32 %v4193_v63, 30  ;;  %v1752_v58 = vsel %vm1740_vm12, %v1734_v61, %v1751_v23 }
 0x1e7   : > { %v4221_v15 = vshll.u32 %v1714_v12, 8  ;;  %vm1543_vm0 = vcmp.eq.s32.totalorder %v1541_v11, 0  ;;  %vm1546_vm15 = vcmp.eq.s32.totalorder %v1541_v11, 2  ;;  %v1753_v30 = vsel %vm1739_vm11, %v1750_v5, %v1752_v58 }
 0x1e8   : > { %v1530_v47 = vadd.f32 1.0, %v1529_v42  ;;  %v1537_v56 = vadd.f32 1.0, %v1536_v62  ;;  %v1653_v57 = vsub.s32 %v1649_v22, %v1652_v17  ;;  %v1780_v49 = vshrl.u32 %v1749_v33, 16 }
 0x1e9   : > { %v1861_v25 = vand.u32 2147483647, %v4205_v35  ;;  %v1755_v14 = vand.u32 65535, %v4221_v15  ;;  %v1757_v53 = vand.u32 65535, %v1753_v30  ;;  %v1758_v8 = vshrl.u32 %v1753_v30, 16 }
 0x1ea   : > { %v1538_v3 = vmul.f32 %v1537_v56, %v1522_v55  ;;  %v1547_v59 = vxor.u32 2147483648, %v1530_v47  ;;  %vm1654_vm1 = vcmp.lt.s32.totalorder %v1653_v57, 0  ;;  %v1655_v1 = vsub.s32 0, %v1653_v57 }
 0x1eb   : > { %v1864_v16 = vand.u32 2139095040, %v4205_v35  ;;  %v1756_v2 = vshrl.u32 %v4221_v15, 16  ;;  %v1779_v61 = vand.u32 65535, %v1749_v33  ;;  %v1645_v45 = vadd.s32 %v4150_v37, %v4145_v9 }
 0x1ec   : > { %v1544_v28 = vxor.u32 2147483648, %v1538_v3  ;;  %v1656_v60 = vsel %vm1654_vm1, %v1655_v1, %v1653_v57  ;;  %v1722_v55 = vshrl.u32 %v3082_v34, %v4159_v50  ;;  %v1760_v10 = vmul.u32 %v1758_v8, %v1755_v14 }
 0x1ed   : > { %v1657_v24 = vclz %v1656_v60  ;;  %v1548_v32 = vsel %vm1546_vm15, %v1547_v59, %v1538_v3  ;;  %v1761_v13 = vmul.u32 %v1757_v53, %v1756_v2  ;;  %v1782_v48 = vmul.u32 %v1780_v49, %v1755_v14 }
 0x1ee   : > { %v1545_v22 = vsel %vm1543_vm0, %v1530_v47, %v1544_v28  ;;  %v1743_v12 = vsel %vm1741_vm9, %v1731_v46, 2102212464  ;;  %v1865_v29 = vshrl.u32 %v1864_v16, 23  ;;  %v1759_v37 = vmul.u32 %v1757_v53, %v1755_v14 }
 0x1ef   : > { %v1549_v18 = vsel %vm1542_vm14, %v1545_v22, %v1548_v32  ;;  %v2934_v4 = vadd.s32 4294967294, %v1657_v24  ;;  %v1763_v50 = vshll.u32 %v1760_v10, 16  ;;  %v1781_v26 = vmul.u32 %v1779_v61, %v1755_v14 }
 0x1f0   : > { %v1550_v9 = vsel %vm1539_vm13, nan, %v1549_v18  ;;  %v1762_v21 = vmul.u32 %v1758_v8, %v1756_v2  ;;  %v1765_v7 = vshll.u32 %v1761_v13, 16  ;;  %v1783_v6 = vmul.u32 %v1779_v61, %v1756_v2 }
 0x1f1   : > { %vm2935_vm2 = vcmp.lt.s32.totalorder %v2934_v4, 0  ;;  %2798 = vst [vmem:[%s3440_s8 + $0x38] sm:$0xff] %v1550_v9  ;;  %vm1553_vm4 = vcmp.lt.s32.totalorder %v3810_v41, 0  ;;  %vm1767_vm3 = vc.u32 %v1759_v37, %v1763_v50  ;;  %v1769_v23 = vadd.s32 %v1763_v50, %v1759_v37 }
 0x1f2   : > { %v1660_v11 = vsel %vm2935_vm2, 0, %v2934_v4  ;;  %v1785_v42 = vshll.u32 %v1782_v48, 16  ;;  %v1764_v17 = vshrl.u32 %v1760_v10, 16  ;;  %v1768_v51 = vsel %vm1767_vm3, 1, %v3088_v39 }
 0x1f3   : > { %v1661_v62 = vsub.s32 32, %v1660_v11  ;;  %v1665_v46 = vsub.s32 4294967266, %v1660_v11  ;;  %v1662_v5 = vshll.u32 %v1653_v57, %v1660_v11  ;;  %v1770_v33 = vadd.s32 %v1768_v51, %v1762_v21 }
 0x1f4   : > { %vm1771_vm5 = vc.u32 %v1769_v23, %v1765_v7  ;;  %v1784_v58 = vmul.u32 %v1780_v49, %v1756_v2  ;;  %v1787_v3 = vshll.u32 %v1783_v6, 16  ;;  %vm1789_vm6 = vc.u32 %v1781_v26, %v1785_v42 }
 0x1f5   : > { %v1663_v47 = vshrl.u32 %v1645_v45, %v1661_v62  ;;  %v1666_v56 = vadd.s32 127, %v1665_v46  ;;  %v1772_v30 = vsel %vm1771_vm5, 1, %v3088_v39  ;;  %v1791_v1 = vadd.s32 %v1785_v42, %v1781_v26 }
 0x1f6   : > { %v1774_v59 = vadd.s32 %v1772_v30, %v1770_v33  ;;  %v2939_v14 = vadd.s32 4294967169, %v1865_v29  ;;  %v1675_v16 = vsub.s32 4, %v4193_v63  ;;  %v1790_v28 = vsel %vm1789_vm6, 1, %v3088_v39 }
 0x1f7   : > { %v1664_v53 = vor.u32 %v1663_v47, %v1662_v5  ;;  %v1667_v8 = vshll.u32 %v1666_v56, 23  ;;  %v1742_v57 = vsel %vm1738_vm10, %v1722_v55, %v4182_v54  ;;  %v1792_v60 = vadd.s32 %v1790_v28, %v1784_v58 }
 0x1f8   : > { %v1775_v49 = vadd.s32 %v1774_v59, %v1764_v17  ;;  %vm1793_vm7 = vc.u32 %v1791_v1, %v1787_v3  ;;  %v1744_v61 = vsel %vm1740_vm12, %v4186_v31, %v1743_v12  ;;  %v1766_v45 = vshrl.u32 %v1761_v13, 16 }
 0x1f9   : > { %v1668_v2 = vor.u32 4788187, %v1667_v8  ;;  %v1794_v24 = vsel %vm1793_vm7, 1, %v3088_v39  ;;  %vm4255_vm8 = vcmp.le.f32.partialorder %v1551_v0, 0.7853982  ;;  %v1786_v22 = vshrl.u32 %v1782_v48, 16 }
 0x1fa   : > { %v1796_v32 = vadd.s32 %v1794_v24, %v1792_v60  ;;  %v1871_v54 = vadd.s32 1, %v2939_v14  ;;  %v1671_v18 = vcvt.s32.f32 %v1664_v53  ;;  %v1676_v4 = vsel %vm1553_vm4, %v1675_v16, %v4193_v63 }
 0x1fb   : > { %v1669_v55 = vand.u32 2147483647, %v1668_v2  ;;  %v4262_v29 = vadd.s32 %v1775_v49, %v1766_v45  ;;  %v1745_v31 = vsel %vm1739_vm11, %v1742_v57, %v1744_v61  ;;  %v1788_v13 = vshrl.u32 %v1783_v6, 16 }
 0x1fc   : > { %v1797_v12 = vadd.s32 %v1796_v32, %v1786_v22  ;;  %vm1872_vm9 = vcmp.gt.s32.totalorder %v1871_v54, 0  ;;  %v4266_v9 = vadd.s32 %v1791_v1, %v1787_v3  ;;  %v1868_v48 = vand.u32 8388607, %v1861_v25  ;;  %v296_v1 = vpop.f32.mrf.mxu2 }
 0x1fd   : > { %v1672_v0 = vmul.f32 %v1671_v18, %v1669_v55  ;;  %v1873_v37 = vsel %vm1872_vm9, %v1871_v54, 0  ;;  %v1678_v50 = vsel %vm4255_vm8, 0, %v1676_v4  ;;  %v1799_v20 = vmul.u32 %v4221_v15, %v1745_v31 }
 0x1fe   : > { %v1798_v26 = vadd.s32 %v1797_v12, %v1788_v13  ;;  %v1875_v63 = vand.u32 31, %v1873_v37  ;;  %vm1801_vm10 = vc.u32 %v4262_v29, %v4266_v9  ;;  %v1695_v23 = vadd.s32 3, %v1678_v50 }
 0x1ff   : > { %v1673_v21 = vxor.u32 2147483648, %v1672_v0  ;;  %v1869_v42 = vor.u32 8388608, %v1868_v48  ;;  %v4279_v62 = vshrl.u32 %v1873_v37, 5  ;;  %v4306_v10 = vadd.f32 %v4202_v19, %v296_v1 }
 0x200   : > { %v1802_v7 = vadd.s32 1, %v1798_v26  ;;  %v4275_v6 = vsub.s32 32, %v1875_v63  ;;  %v1881_v51 = vshll.u32 %v3083_v36, %v1875_v63  ;;  %v1887_v5 = vshll.u32 %v3085_v40, %v1875_v63 }
 0x201   : > { %v1674_v11 = vsel %vm1553_vm4, %v1673_v21, %v1672_v0  ;;  %v1890_v3 = vshll.u32 %v3086_v43, %v1875_v63  ;;  %v1884_v16 = vshll.u32 %v3084_v38, %v1875_v63  ;;  %v1878_v28 = vshll.u32 %v3082_v34, %v1875_v63 }
 0x202   : > { %v1677_v46 = vsel %vm4255_vm8, %v3810_v41, %v1674_v11  ;;  %v1803_v17 = vsel %vm1801_vm10, %v1802_v7, %v1798_v26  ;;  %v1882_v58 = vshrl.u32 %v3084_v38, %v4275_v6  ;;  %v1885_v47 = vshrl.u32 %v3085_v40, %v4275_v6 }
 0x203   : > { %v1679_v15 = vmul.f32 %v1677_v46, %v1677_v46  ;;  %v1804_v33 = vadd.s32 %v1803_v17, %v1799_v20  ;;  %v1879_v56 = vshrl.u32 %v3083_v36, %v4275_v6  ;;  %v1888_v30 = vshrl.u32 %v3086_v43, %v4275_v6 }
 0x204   : > { %v1891_v59 = vshrl.u32 %v3087_v52, %v4275_v6  ;;  %v4299_v57 = vor.u32 %v1882_v58, %v1881_v51  ;;  %v4303_v24 = vor.u32 %v1885_v47, %v1884_v16  ;;  %v1696_v22 = vand.u32 3, %v1695_v23 }
 0x205   : > { %v1680_v14 = vmul.f32 -0.001358992, %v1679_v15  ;;  %v1687_v53 = vmul.f32 -0.00019511016, %v1679_v15  ;;  %v1805_v8 = vadd.s32 536870912, %v1804_v33  ;;  %v1889_v49 = vor.u32 %v1888_v30, %v1887_v5 }
 0x206   : > { %v1892_v60 = vor.u32 %v1891_v59, %v1890_v3  ;;  %v4308_v32 = vor.u32 %v1879_v56, %v1878_v28  ;;  %v4310_v54 = vshll.u32 %v1869_v42, 8  ;;  %vm1896_vm12 = vcmp.lt.s32.totalorder %v4279_v62, 4 }
 0x207   : > { %v1681_v2 = vadd.f32 0.041655596, %v1680_v14  ;;  %v1688_v61 = vadd.f32 0.008332121, %v1687_v53  ;;  %v4301_v45 = vshrl.u32 %v1805_v8, 30  ;;  %vm1893_vm11 = vcmp.lt.s32.totalorder %v4279_v62, 1 }
 0x208   : > { %vm1895_vm13 = vcmp.lt.s32.totalorder %v4279_v62, 3  ;;  %v1902_v31 = vsel %vm1896_vm12, %v1889_v49, 920167782  ;;  %v1906_v13 = vsel %vm1896_vm12, %v1892_v60, 1326507024  ;;  %v1905_v37 = vsel %vm1893_vm11, %v4299_v57, %v4303_v24 }
 0x209   : > { %v1682_v55 = vmul.f32 %v1681_v2, %v1679_v15  ;;  %v1689_v18 = vmul.f32 %v1688_v61, %v1679_v15  ;;  %v1807_v4 = vshll.u32 %v4301_v45, 30  ;;  %vm1894_vm14 = vcmp.lt.s32.totalorder %v4279_v62, 2 }
 0x20a   : > { %v1901_v50 = vsel %vm1893_vm11, %v4308_v32, %v4299_v57  ;;  %v1903_v26 = vsel %vm1895_vm13, %v4303_v24, %v1902_v31  ;;  %v1907_v63 = vsel %vm1895_vm13, %v1889_v49, %v1906_v13  ;;  %vm1694_vm15 = vweird.f32 %v3810_v41 }
 0x20b   : > { %v1683_v12 = vadd.f32 -0.4999988, %v1682_v55  ;;  %v1690_v0 = vadd.f32 -0.16666654, %v1689_v18  ;;  %v4320_v48 = vsub.s32 %v1804_v33, %v1807_v4  ;;  %vm1697_vm1 = vcmp.lt.s32.totalorder %v1696_v22, 2 }
 0x20c   : > { %vm1698_vm2 = vcmp.eq.s32.totalorder %v1696_v22, 0  ;;  %vm1701_vm4 = vcmp.eq.s32.totalorder %v1696_v22, 2  ;;  %v1908_v11 = vsel %vm1894_vm14, %v1905_v37, %v1907_v63  ;;  %v1911_v33 = vshrl.u32 %v4310_v54, 16 }
 0x20d   : > { %v1684_v21 = vmul.f32 %v1683_v12, %v1679_v15  ;;  %v1691_v20 = vmul.f32 %v1690_v0, %v1679_v15  ;;  %vm1809_vm0 = vcmp.lt.s32.totalorder %v4320_v48, 0  ;;  %v1810_v7 = vsub.s32 0, %v4320_v48 }
 0x20e   : > { %v1912_v51 = vand.u32 65535, %v1908_v11  ;;  %v1904_v15 = vsel %vm1894_vm14, %v1901_v50, %v1903_v26  ;;  %v1913_v58 = vshrl.u32 %v1908_v11, 16  ;;  %v1910_v30 = vand.u32 65535, %v4310_v54 }
 0x20f   : > { %v1685_v23 = vadd.f32 1.0, %v1684_v21  ;;  %v1692_v42 = vadd.f32 1.0, %v1691_v20  ;;  %v1811_v17 = vsel %vm1809_vm0, %v1810_v7, %v4320_v48  ;;  %v2016_v3 = vand.u32 2147483647, %v4306_v10 }
 0x210   : > { %v1812_v5 = vclz %v1811_v17  ;;  %v1800_v59 = vadd.s32 %v4266_v9, %v4262_v29  ;;  %v4349_v14 = vmul.u32 %v1912_v51, %v1911_v33  ;;  %v2019_v53 = vand.u32 2139095040, %v4306_v10 }
 0x211   : > { %v1693_v47 = vmul.f32 %v1692_v42, %v1677_v46  ;;  %v1702_v56 = vxor.u32 2147483648, %v1685_v23  ;;  %v1830_v16 = vsub.s32 4, %v4301_v45  ;;  %v1915_v28 = vmul.u32 %v1913_v58, %v1910_v30 }
 0x212   : > { %v2937_v1 = vadd.s32 4294967294, %v1812_v5  ;;  %v1934_v49 = vand.u32 65535, %v1904_v15  ;;  %vm1708_vm3 = vcmp.lt.s32.totalorder %v4073_v44, 0  ;;  %v1914_v60 = vmul.u32 %v1912_v51, %v1910_v30 }
 0x213   : > { %v1699_v8 = vxor.u32 2147483648, %v1693_v47  ;;  %v1703_v46 = vsel %vm1701_vm4, %v1702_v56, %v1693_v47  ;;  %v1935_v2 = vshrl.u32 %v1904_v15, 16  ;;  %v1917_v9 = vmul.u32 %v1913_v58, %v1911_v33 }
 0x214   : > { %vm2938_vm5 = vcmp.lt.s32.totalorder %v2937_v1, 0  ;;  %v1918_v55 = vshll.u32 %v1915_v28, 16  ;;  %v1920_v13 = vshll.u32 %v4349_v14, 16  ;;  %vm4362_vm6 = vcmp.le.f32.partialorder %v1706_v27, 0.7853982 }
 0x215   : > { %v1700_v61 = vsel %vm1698_vm2, %v1685_v23, %v1699_v8  ;;  %v1815_v29 = vsel %vm2938_vm5, 0, %v2937_v1  ;;  %v1937_v21 = vmul.u32 %v1935_v2, %v1910_v30  ;;  %v1936_v41 = vmul.u32 %v1934_v49, %v1910_v30 }
 0x216   : > { %v1704_v18 = vsel %vm1697_vm1, %v1700_v61, %v1703_v46  ;;  %v1816_v4 = vsub.s32 32, %v1815_v29  ;;  %v1820_v31 = vsub.s32 4294967266, %v1815_v29  ;;  %v1817_v37 = vshll.u32 %v4320_v48, %v1815_v29 }
 0x217   : > { %v1705_v12 = vsel %vm1694_vm15, nan, %v1704_v18  ;;  %vm1922_vm7 = vc.u32 %v1914_v60, %v1918_v55  ;;  %v1924_v50 = vadd.s32 %v1918_v55, %v1914_v60  ;;  %v1938_v7 = vmul.u32 %v1934_v49, %v1911_v33 }
 0x218   : > { %v1818_v26 = vshrl.u32 %v1800_v59, %v1816_v4  ;;  %v1821_v22 = vadd.s32 127, %v1820_v31  ;;  %v1923_v63 = vsel %vm1922_vm7, 1, %v3088_v39  ;;  %2799 = vst [vmem:[%s3440_s8 + $0x40] sm:$0xff] %v1705_v12  ;;  %v1940_v42 = vshll.u32 %v1937_v21, 16 }
 0x219   : > { %v1925_v20 = vadd.s32 %v1923_v63, %v1917_v9  ;;  %vm1926_vm8 = vc.u32 %v1924_v50, %v1920_v13  ;;  %v1898_v48 = vsel %vm1896_vm12, %v4303_v24, 2102212464  ;;  %v1919_v17 = vshrl.u32 %v1915_v28, 16  ;;  %v299_v24 = vpop.f32.mrf.mxu3 }
 0x21a   : > { %v1819_v11 = vor.u32 %v1818_v26, %v1817_v37  ;;  %v1822_v23 = vshll.u32 %v1821_v22, 23  ;;  %v1927_v27 = vsel %vm1926_vm8, 1, %v3088_v39  ;;  %v1939_v5 = vmul.u32 %v1935_v2, %v1911_v33 }
 0x21b   : > { %v1929_v51 = vadd.s32 %v1927_v27, %v1925_v20  ;;  %v1942_v58 = vshll.u32 %v1938_v7, 16  ;;  %vm1944_vm9 = vc.u32 %v1936_v41, %v1940_v42  ;;  %v1946_v47 = vadd.s32 %v1940_v42, %v1936_v41 }
 0x21c   : > { %v1823_v15 = vor.u32 4788187, %v1822_v23  ;;  %v1831_v56 = vsel %vm1708_vm3, %v1830_v16, %v4301_v45  ;;  %v1945_v59 = vsel %vm1944_vm9, 1, %v3088_v39  ;;  %v2020_v1 = vshrl.u32 %v2019_v53, 23 }
 0x21d   : > { %v1930_v30 = vadd.s32 %v1929_v51, %v1919_v17  ;;  %v1826_v49 = vcvt.s32.f32 %v1819_v11  ;;  %v1947_v46 = vadd.s32 %v1945_v59, %v1939_v5  ;;  %vm1948_vm10 = vc.u32 %v1946_v47, %v1942_v58 }
 0x21e   : > { %v1824_v8 = vand.u32 2147483647, %v1823_v15  ;;  %v1877_v33 = vshrl.u32 %v3082_v34, %v4275_v6  ;;  %v1921_v28 = vshrl.u32 %v4349_v14, 16  ;;  %v1949_v60 = vsel %vm1948_vm10, 1, %v3088_v39 }
 0x21f   : > { %v2942_v2 = vadd.s32 4294967169, %v2020_v1  ;;  %v1833_v45 = vsel %vm4362_vm6, 0, %v1831_v56  ;;  %v1941_v16 = vshrl.u32 %v1937_v21, 16  ;;  %v1951_v29 = vadd.s32 %v1949_v60, %v1947_v46 }
 0x220   : > { %v1827_v61 = vmul.f32 %v1826_v49, %v1824_v8  ;;  %v1897_v53 = vsel %vm1893_vm11, %v1877_v33, %v4308_v32  ;;  %v1899_v9 = vsel %vm1895_vm13, %v4299_v57, %v1898_v48  ;;  %v1931_v6 = vadd.s32 %v1930_v30, %v1921_v28 }
 0x221   : > { %v2026_v55 = vadd.s32 1, %v2942_v2  ;;  %v4390_v14 = vadd.f32 %v4202_v19, %v299_v24  ;;  %v1943_v4 = vshrl.u32 %v1938_v7, 16  ;;  %v1952_v31 = vadd.s32 %v1951_v29, %v1941_v16 }
 0x222   : > { %v1828_v18 = vxor.u32 2147483648, %v1827_v61  ;;  %v1850_v13 = vadd.s32 3, %v1833_v45  ;;  %v1950_v12 = vadd.s32 %v1946_v47, %v1942_v58  ;;  %v2023_v37 = vand.u32 8388607, %v2016_v3 }
 0x223   : > { %vm2027_vm12 = vcmp.gt.s32.totalorder %v2026_v55, 0  ;;  %v1900_v57 = vsel %vm1894_vm14, %v1897_v53, %v1899_v9  ;;  %v1953_v50 = vadd.s32 %v1952_v31, %v1943_v4  ;;  %v2171_v62 = vand.u32 2147483647, %v4390_v14 }
 0x224   : > { %v1829_v32 = vsel %vm1708_vm3, %v1828_v18, %v1827_v61  ;;  %v2028_v26 = vsel %vm2027_vm12, %v2026_v55, 0  ;;  %vm1956_vm11 = vc.u32 %v1931_v6, %v1950_v12  ;;  %v4405_v41 = vand.u32 3, %v1850_v13 }
 0x225   : > { %v4401_v22 = vsel %vm4362_vm6, %v4073_v44, %v1829_v32  ;;  %v2030_v63 = vand.u32 31, %v2028_v26  ;;  %v1957_v20 = vadd.s32 1, %v1953_v50  ;;  %v1954_v7 = vmul.u32 %v4310_v54, %v1900_v57 }
 0x226   : > { %v1834_v21 = vmul.f32 %v4401_v22, %v4401_v22  ;;  %v2024_v0 = vor.u32 8388608, %v2023_v37  ;;  %v4411_v48 = vadd.s32 %v1950_v12, %v1931_v6  ;;  %v4413_v51 = vshrl.u32 %v2028_v26, 5 }
 0x227   : > { %v4408_v11 = vsub.s32 32, %v2030_v63  ;;  %v1958_v42 = vsel %vm1956_vm11, %v1957_v20, %v1953_v50  ;;  %v2174_v5 = vand.u32 2139095040, %v4390_v14  ;;  %v2042_v1 = vshll.u32 %v3085_v40, %v2030_v63 }
 0x228   : > { %v1835_v23 = vmul.f32 -0.001358992, %v1834_v21  ;;  %v1842_v27 = vmul.f32 -0.00019511016, %v1834_v21  ;;  %v1959_v17 = vadd.s32 %v1958_v42, %v1954_v7  ;;  %v2033_v46 = vshll.u32 %v3082_v34, %v2030_v63 }
 0x229   : > { %v2034_v54 = vshrl.u32 %v3083_v36, %v4408_v11  ;;  %v2043_v47 = vshrl.u32 %v3086_v43, %v4408_v11  ;;  %v2037_v30 = vshrl.u32 %v3084_v38, %v4408_v11  ;;  %v2040_v59 = vshrl.u32 %v3085_v40, %v4408_v11 }
 0x22a   : > { %v1836_v15 = vadd.f32 0.041655596, %v1835_v23  ;;  %v1843_v58 = vadd.f32 0.008332121, %v1842_v27  ;;  %v1960_v56 = vadd.s32 536870912, %v1959_v17  ;;  %v2036_v24 = vshll.u32 %v3083_v36, %v2030_v63 }
 0x22b   : > { %v2039_v28 = vshll.u32 %v3084_v38, %v2030_v63  ;;  %v2044_v60 = vor.u32 %v2043_v47, %v2042_v1  ;;  %v2046_v2 = vshrl.u32 %v3087_v52, %v4408_v11  ;;  %vm1856_vm13 = vcmp.eq.s32.totalorder %v4405_v41, 2 }
 0x22c   : > { %v1837_v8 = vmul.f32 %v1836_v15, %v1834_v21  ;;  %v1844_v49 = vmul.f32 %v1843_v58, %v1834_v21  ;;  %v1961_v33 = vshrl.u32 %v1960_v56, 30  ;;  %vm1863_vm14 = vcmp.lt.s32.totalorder %v4205_v35, 0 }
 0x22d   : > { %v4432_v16 = vor.u32 %v2034_v54, %v2033_v46  ;;  %v4434_v29 = vshll.u32 %v2024_v0, 8  ;;  %vm1853_vm0 = vcmp.eq.s32.totalorder %v4405_v41, 0  ;;  %v4437_v9 = vor.u32 %v2037_v30, %v2036_v24 }
 0x22e   : > { %v1838_v61 = vadd.f32 -0.4999988, %v1837_v8  ;;  %v1845_v45 = vadd.f32 -0.16666654, %v1844_v49  ;;  %v1962_v53 = vshll.u32 %v1961_v33, 30  ;;  %v2041_v6 = vor.u32 %v2040_v59, %v2039_v28 }
 0x22f   : > { %v2045_v55 = vshll.u32 %v3086_v43, %v2030_v63  ;;  %vm1852_vm15 = vcmp.lt.s32.totalorder %v4405_v41, 2  ;;  %vm2051_vm1 = vcmp.lt.s32.totalorder %v4413_v51, 4  ;;  %v2175_v31 = vshrl.u32 %v2174_v5, 23 }
 0x230   : > { %v1839_v18 = vmul.f32 %v1838_v61, %v1834_v21  ;;  %v1846_v4 = vmul.f32 %v1845_v45, %v1834_v21  ;;  %vm1849_vm2 = vweird.f32 %v4073_v44  ;;  %v4443_v13 = vsub.s32 %v1959_v17, %v1962_v53 }
 0x231   : > { %v2047_v12 = vor.u32 %v2046_v2, %v2045_v55  ;;  %vm2048_vm4 = vcmp.lt.s32.totalorder %v4413_v51, 1  ;;  %v2057_v37 = vsel %vm2051_vm1, %v2044_v60, 920167782  ;;  %vm4450_vm3 = vcmp.le.f32.partialorder %v1861_v25, 0.7853982 }
 0x232   : > { %v1840_v32 = vadd.f32 1.0, %v1839_v18  ;;  %v1847_v57 = vadd.f32 1.0, %v1846_v4  ;;  %v1985_v26 = vsub.s32 4, %v1961_v33  ;;  %vm2050_vm5 = vcmp.lt.s32.totalorder %v4413_v51, 3 }
 0x233   : > { %vm1964_vm6 = vcmp.lt.s32.totalorder %v4443_v13, 0  ;;  %v1965_v63 = vsub.s32 0, %v4443_v13  ;;  %v2056_v21 = vsel %vm2048_vm4, %v4432_v16, %v4437_v9  ;;  %v2058_v20 = vsel %vm2050_vm5, %v2041_v6, %v2057_v37 }
 0x234   : > { %v1848_v25 = vmul.f32 %v1847_v57, %v4401_v22  ;;  %v1857_v7 = vxor.u32 2147483648, %v1840_v32  ;;  %v2060_v23 = vsel %vm2048_vm4, %v4437_v9, %v2041_v6  ;;  %v2065_v27 = vand.u32 65535, %v4434_v29 }
 0x235   : > { %v1966_v42 = vsel %vm1964_vm6, %v1965_v63, %v4443_v13  ;;  %vm2049_vm7 = vcmp.lt.s32.totalorder %v4413_v51, 2  ;;  %v2061_v0 = vsel %vm2051_vm1, %v2047_v12, 1326507024  ;;  %v2066_v17 = vshrl.u32 %v4434_v29, 16 }
 0x236   : > { %v1854_v5 = vxor.u32 2147483648, %v1848_v25  ;;  %v1967_v15 = vclz %v1966_v42  ;;  %v2059_v22 = vsel %vm2049_vm7, %v2056_v21, %v2058_v20  ;;  %v2062_v58 = vsel %vm2050_vm5, %v2044_v60, %v2061_v0 }
 0x237   : > { %v1858_v54 = vsel %vm1856_vm13, %v1857_v7, %v1848_v25  ;;  %v4481_v47 = vsel %vm1863_vm14, %v1985_v26, %v1961_v33  ;;  %v2063_v56 = vsel %vm2049_vm7, %v2060_v23, %v2062_v58  ;;  %v2945_v30 = vadd.s32 4294967169, %v2175_v31 }
 0x238   : > { %v1855_v59 = vsel %vm1853_vm0, %v1840_v32, %v1854_v5  ;;  %v2940_v1 = vadd.s32 4294967294, %v1967_v15  ;;  %v2067_v8 = vand.u32 65535, %v2063_v56  ;;  %v2068_v49 = vshrl.u32 %v2063_v56, 16 }
 0x239   : > { %v1859_v46 = vsel %vm1852_vm15, %v1855_v59, %v1858_v54  ;;  %v2032_v24 = vshrl.u32 %v3082_v34, %v4408_v11  ;;  %v2089_v28 = vand.u32 65535, %v2059_v22  ;;  %v2090_v33 = vshrl.u32 %v2059_v22, 16 }
 0x23a   : > { %v1860_v60 = vsel %vm1849_vm2, nan, %v1859_v46  ;;  %vm2941_vm8 = vcmp.lt.s32.totalorder %v2940_v1, 0  ;;  %v2053_v2 = vsel %vm2051_vm1, %v2041_v6, 2102212464  ;;  %v2070_v61 = vmul.u32 %v2068_v49, %v2065_v27 }
 0x23b   : > { %v1970_v45 = vsel %vm2941_vm8, 0, %v2940_v1  ;;  %v1988_v53 = vsel %vm4450_vm3, 0, %v4481_v47  ;;  %v2071_v41 = vmul.u32 %v2067_v8, %v2066_v17  ;;  %v2092_v55 = vmul.u32 %v2090_v33, %v2065_v27  ;;  %2800 = vst [vmem:[%s3440_s8 + $0x48] sm:$0xff] %v1860_v60 }
 0x23c   : > { %v1971_v18 = vsub.s32 32, %v1970_v45  ;;  %v1975_v11 = vsub.s32 4294967266, %v1970_v45  ;;  %v2069_v4 = vmul.u32 %v2067_v8, %v2065_v27  ;;  %v2073_v31 = vshll.u32 %v2070_v61, 16 }
 0x23d   : > { %v1972_v44 = vshll.u32 %v4443_v13, %v1970_v45  ;;  %v2072_v12 = vmul.u32 %v2068_v49, %v2066_v17  ;;  %v2075_v37 = vshll.u32 %v2071_v41, 16  ;;  %v2093_v32 = vmul.u32 %v2089_v28, %v2066_v17  ;;  %v302_v45 = vpop.f32.mrf.mxu3 }
 0x23e   : > { %v1973_v6 = vshrl.u32 %v4411_v48, %v1971_v18  ;;  %v1976_v57 = vadd.s32 127, %v1975_v11  ;;  %vm2077_vm9 = vc.u32 %v2069_v4, %v2073_v31  ;;  %v2079_v26 = vadd.s32 %v2073_v31, %v2069_v4 }
 0x23f   : > { %v2078_v63 = vsel %vm2077_vm9, 1, %v3088_v39  ;;  %v2091_v21 = vmul.u32 %v2089_v28, %v2065_v27  ;;  %v2094_v20 = vmul.u32 %v2090_v33, %v2066_v17  ;;  %v2095_v25 = vshll.u32 %v2092_v55, 16 }
 0x240   : > { %v1974_v7 = vor.u32 %v1973_v6, %v1972_v44  ;;  %v1977_v23 = vshll.u32 %v1976_v57, 23  ;;  %v2080_v42 = vadd.s32 %v2078_v63, %v2072_v12  ;;  %vm2081_vm10 = vc.u32 %v2079_v26, %v2075_v37 }
 0x241   : > { %v2082_v0 = vsel %vm2081_vm10, 1, %v3088_v39  ;;  %v2097_v13 = vshll.u32 %v2093_v32, 16  ;;  %vm2099_vm12 = vc.u32 %v2091_v21, %v2095_v25  ;;  %v2101_v5 = vadd.s32 %v2095_v25, %v2091_v21 }
 0x242   : > { %v1978_v15 = vor.u32 4788187, %v1977_v23  ;;  %v2074_v22 = vshrl.u32 %v2070_v61, 16  ;;  %v2084_v48 = vadd.s32 %v2082_v0, %v2080_v42  ;;  %v2100_v58 = vsel %vm2099_vm12, 1, %v3088_v39 }
 0x243   : > { %v1981_v54 = vcvt.s32.f32 %v1974_v7  ;;  %v2076_v47 = vshrl.u32 %v2071_v41, 16  ;;  %v2102_v56 = vadd.s32 %v2100_v58, %v2094_v20  ;;  %vm2103_vm11 = vc.u32 %v2101_v5, %v2097_v13 }
 0x244   : > { %v1979_v27 = vand.u32 2147483647, %v1978_v15  ;;  %v2085_v17 = vadd.s32 %v2084_v48, %v2074_v22  ;;  %v2104_v59 = vsel %vm2103_vm11, 1, %v3088_v39  ;;  %v2181_v1 = vadd.s32 1, %v2945_v30 }
 0x245   : > { %v2052_v8 = vsel %vm2048_vm4, %v2032_v24, %v4432_v16  ;;  %v2096_v49 = vshrl.u32 %v2092_v55, 16  ;;  %v2106_v46 = vadd.s32 %v2104_v59, %v2102_v56  ;;  %v4510_v28 = vand.u32 8388607, %v2171_v62 }
 0x246   : > { %v1982_v33 = vmul.f32 %v1981_v54, %v1979_v27  ;;  %v2054_v60 = vsel %vm2050_vm5, %v4437_v9, %v2053_v2  ;;  %v4515_v61 = vadd.s32 %v2085_v17, %v2076_v47  ;;  %vm2182_vm13 = vcmp.gt.s32.totalorder %v2181_v1, 0 }
 0x247   : > { %v2005_v30 = vadd.s32 3, %v1988_v53  ;;  %v2098_v41 = vshrl.u32 %v2093_v32, 16  ;;  %v2107_v18 = vadd.s32 %v2106_v46, %v2096_v49  ;;  %v2183_v11 = vsel %vm2182_vm13, %v2181_v1, 0 }
 0x248   : > { %v1983_v16 = vxor.u32 2147483648, %v1982_v33  ;;  %v4517_v24 = vadd.s32 %v2101_v5, %v2097_v13  ;;  %v2055_v55 = vsel %vm2049_vm7, %v2052_v8, %v2054_v60  ;;  %v2185_v31 = vand.u32 31, %v2183_v11 }
 0x249   : > { %v2108_v4 = vadd.s32 %v2107_v18, %v2098_v41  ;;  %v4522_v44 = vadd.f32 %v4202_v19, %v302_v45  ;;  %v2179_v2 = vor.u32 8388608, %v4510_v28  ;;  %v4532_v12 = vand.u32 3, %v2005_v30 }
 0x24a   : > { %v1984_v9 = vsel %vm1863_vm14, %v1983_v16, %v1982_v33  ;;  %vm2111_vm0 = vc.u32 %v4515_v61, %v4517_v24  ;;  %v4534_v37 = vsub.s32 32, %v2185_v31  ;;  %v2109_v19 = vmul.u32 %v4434_v29, %v2055_v55 }
 0x24b   : > { %v1987_v53 = vsel %vm4450_vm3, %v4205_v35, %v1984_v9  ;;  %v2112_v51 = vadd.s32 1, %v2108_v4  ;;  %v4537_v6 = vshrl.u32 %v2183_v11, 5  ;;  %v2188_v57 = vshll.u32 %v3082_v34, %v2185_v31 }
 0x24c   : > { %v1989_v32 = vmul.f32 %v1987_v53, %v1987_v53  ;;  %v2189_v63 = vshrl.u32 %v3083_v36, %v4534_v37  ;;  %v2191_v21 = vshll.u32 %v3083_v36, %v2185_v31  ;;  %v2192_v50 = vshrl.u32 %v3084_v38, %v4534_v37 }
 0x24d   : > { %v2113_v26 = vsel %vm2111_vm0, %v2112_v51, %v2108_v4  ;;  %v2195_v23 = vshrl.u32 %v3085_v40, %v4534_v37  ;;  %v2194_v42 = vshll.u32 %v3084_v38, %v2185_v31  ;;  %v2197_v0 = vshll.u32 %v3085_v40, %v2185_v31 }
 0x24e   : > { %v1990_v20 = vmul.f32 -0.001358992, %v1989_v32  ;;  %v1997_v25 = vmul.f32 -0.00019511016, %v1989_v32  ;;  %v2114_v7 = vadd.s32 %v2113_v26, %v2109_v19  ;;  %v4547_v29 = vor.u32 %v2189_v63, %v2188_v57 }
 0x24f   : > { %v2198_v13 = vshrl.u32 %v3086_v43, %v4534_v37  ;;  %v4553_v48 = vor.u32 %v2192_v50, %v2191_v21  ;;  %v4555_v58 = vor.u32 %v2195_v23, %v2194_v42  ;;  %v2200_v47 = vshll.u32 %v3086_v43, %v2185_v31 }
 0x250   : > { %v1991_v5 = vadd.f32 0.041655596, %v1990_v20  ;;  %v1998_v15 = vadd.f32 0.008332121, %v1997_v25  ;;  %v2115_v22 = vadd.s32 536870912, %v2114_v7  ;;  %v2201_v56 = vshrl.u32 %v3087_v52, %v4534_v37 }
 0x251   : > { %v2199_v54 = vor.u32 %v2198_v13, %v2197_v0  ;;  %vm2206_vm14 = vcmp.lt.s32.totalorder %v4537_v6, 4  ;;  %vm2203_vm15 = vcmp.lt.s32.totalorder %v4537_v6, 1  ;;  %vm2205_vm1 = vcmp.lt.s32.totalorder %v4537_v6, 3 }
 0x252   : > { %v1992_v27 = vmul.f32 %v1991_v5, %v1989_v32  ;;  %v1999_v17 = vmul.f32 %v1998_v15, %v1989_v32  ;;  %v2116_v59 = vshrl.u32 %v2115_v22, 30  ;;  %v2202_v1 = vor.u32 %v2201_v56, %v2200_v47 }
 0x253   : > { %v2212_v8 = vsel %vm2206_vm14, %v2199_v54, 920167782  ;;  %v2211_v33 = vsel %vm2203_vm15, %v4547_v29, %v4553_v48  ;;  %vm2018_vm2 = vcmp.lt.s32.totalorder %v4306_v10, 0  ;;  %vm2204_vm4 = vcmp.lt.s32.totalorder %v4537_v6, 2 }
 0x254   : > { %v1993_v49 = vadd.f32 -0.4999988, %v1992_v27  ;;  %v2000_v46 = vadd.f32 -0.16666654, %v1999_v17  ;;  %v2117_v28 = vshll.u32 %v2116_v59, 30  ;;  %v2213_v60 = vsel %vm2205_vm1, %v4555_v58, %v2212_v8 }
 0x255   : > { %v2216_v45 = vsel %vm2206_vm14, %v2202_v1, 1326507024  ;;  %vm2007_vm3 = vcmp.lt.s32.totalorder %v4532_v12, 2  ;;  %v2215_v11 = vsel %vm2203_vm15, %v4553_v48, %v4555_v58  ;;  %vm2004_vm5 = vweird.f32 %v4205_v35 }
 0x256   : > { %v1994_v30 = vmul.f32 %v1993_v49, %v1989_v32  ;;  %v2001_v41 = vmul.f32 %v2000_v46, %v1989_v32  ;;  %v2118_v18 = vsub.s32 %v2114_v7, %v2117_v28  ;;  %vm2008_vm6 = vcmp.eq.s32.totalorder %v4532_v12, 0 }
 0x257   : > { %v2214_v16 = vsel %vm2204_vm4, %v2211_v33, %v2213_v60  ;;  %v2217_v55 = vsel %vm2205_vm1, %v2199_v54, %v2216_v45  ;;  %v4587_v4 = vshll.u32 %v2179_v2, 8  ;;  %vm2011_vm8 = vcmp.eq.s32.totalorder %v4532_v12, 2 }
 0x258   : > { %v1995_v31 = vadd.f32 1.0, %v1994_v30  ;;  %v2002_v9 = vadd.f32 1.0, %v2001_v41  ;;  %vm2119_vm7 = vcmp.lt.s32.totalorder %v2118_v18, 0  ;;  %v2120_v51 = vsub.s32 0, %v2118_v18 }
 0x259   : > { %v2140_v32 = vsub.s32 4, %v2116_v59  ;;  %v2218_v19 = vsel %vm2204_vm4, %v2215_v11, %v2217_v55  ;;  %v2244_v57 = vand.u32 65535, %v2214_v16  ;;  %v2221_v25 = vshrl.u32 %v4587_v4, 16 }
 0x25a   : > { %v2003_v26 = vmul.f32 %v2002_v9, %v1987_v53  ;;  %v2012_v63 = vxor.u32 2147483648, %v1995_v31  ;;  %v2121_v21 = vsel %vm2119_vm7, %v2120_v51, %v2118_v18  ;;  %v2222_v50 = vand.u32 65535, %v2218_v19 }
 0x25b   : > { %v2122_v20 = vclz %v2121_v21  ;;  %v2223_v2 = vshrl.u32 %v2218_v19, 16  ;;  %v2245_v7 = vshrl.u32 %v2214_v16, 16  ;;  %v2110_v42 = vadd.s32 %v4517_v24, %v4515_v61 }
 0x25c   : > { %v2009_v23 = vxor.u32 2147483648, %v2003_v26  ;;  %v2220_v0 = vand.u32 65535, %v4587_v4  ;;  %v2326_v13 = vand.u32 2147483647, %v4522_v44  ;;  %v2141_v53 = vsel %vm2018_vm2, %v2140_v32, %v2116_v59 }
 0x25d   : > { %v2943_v5 = vadd.s32 4294967294, %v2122_v20  ;;  %v2226_v15 = vmul.u32 %v2222_v50, %v2221_v25  ;;  %v2329_v22 = vand.u32 2139095040, %v4522_v44  ;;  %v2013_v47 = vsel %vm2011_vm8, %v2012_v63, %v2003_v26 }
 0x25e   : > { %v2010_v54 = vsel %vm2008_vm6, %v1995_v31, %v2009_v23  ;;  %v2225_v56 = vmul.u32 %v2223_v2, %v2220_v0  ;;  %v2246_v61 = vmul.u32 %v2244_v57, %v2220_v0  ;;  %vm4608_vm9 = vcmp.le.f32.partialorder %v2016_v3, 0.7853982 }
 0x25f   : > { %v2014_v24 = vsel %vm2007_vm3, %v2010_v54, %v2013_v47  ;;  %vm2944_vm10 = vcmp.lt.s32.totalorder %v2943_v5, 0  ;;  %v2224_v17 = vmul.u32 %v2222_v50, %v2220_v0  ;;  %v2247_v59 = vmul.u32 %v2245_v7, %v2220_v0 }
 0x260   : > { %v2015_v1 = vsel %vm2004_vm5, nan, %v2014_v24  ;;  %v2125_v8 = vsel %vm2944_vm10, 0, %v2943_v5  ;;  %v2227_v49 = vmul.u32 %v2223_v2, %v2221_v25  ;;  %v2228_v46 = vshll.u32 %v2225_v56, 16 }
 0x261   : > { %v2126_v28 = vsub.s32 32, %v2125_v8  ;;  %v2130_v33 = vsub.s32 4294967266, %v2125_v8  ;;  %v2230_v60 = vshll.u32 %v2226_v15, 16  ;;  %v2248_v12 = vmul.u32 %v2244_v57, %v2221_v25  ;;  %2801 = vst [vmem:[%s3440_s8 + $0x50] sm:$0xff] %v2015_v1 }
 0x262   : > { %v2229_v45 = vshrl.u32 %v2225_v56, 16  ;;  %vm2232_vm12 = vc.u32 %v2224_v17, %v2228_v46  ;;  %v2234_v3 = vadd.s32 %v2228_v46, %v2224_v17  ;;  %v2250_v30 = vshll.u32 %v2247_v59, 16 }
 0x263   : > { %v2127_v41 = vshll.u32 %v2118_v18, %v2125_v8  ;;  %v2128_v11 = vshrl.u32 %v2110_v42, %v2126_v28  ;;  %v2131_v16 = vadd.s32 127, %v2130_v33  ;;  %v2233_v55 = vsel %vm2232_vm12, 1, %v3088_v39 }
 0x264   : > { %v2235_v31 = vadd.s32 %v2233_v55, %v2227_v49  ;;  %vm2236_vm11 = vc.u32 %v2234_v3, %v2230_v60  ;;  %v2249_v35 = vmul.u32 %v2245_v7, %v2221_v25  ;;  %v2252_v9 = vshll.u32 %v2248_v12, 16  ;;  %v4647_v60 = vld [vmem:[%s5044_s2] ss:$0 sm:$0xff] }
 0x265   : > { %v2129_v51 = vor.u32 %v2128_v11, %v2127_v41  ;;  %v2132_v32 = vshll.u32 %v2131_v16, 23  ;;  %v2237_v19 = vsel %vm2236_vm11, 1, %v3088_v39  ;;  %vm2254_vm13 = vc.u32 %v2246_v61, %v2250_v30 }
 0x266   : > { %v2239_v57 = vadd.s32 %v2237_v19, %v2235_v31  ;;  %v2255_v26 = vsel %vm2254_vm13, 1, %v3088_v39  ;;  %v2256_v63 = vadd.s32 %v2250_v30, %v2246_v61  ;;  %v2330_v21 = vshrl.u32 %v2329_v22, 23 }
 0x267   : > { %v2133_v50 = vor.u32 4788187, %v2132_v32  ;;  %v2187_v18 = vshrl.u32 %v3082_v34, %v4534_v37  ;;  %v2208_v20 = vsel %vm2206_vm14, %v4555_v58, 2102212464  ;;  %v2257_v25 = vadd.s32 %v2255_v26, %v2249_v35 }
 0x268   : > { %v2143_v2 = vsel %vm4608_vm9, 0, %v2141_v53  ;;  %v2240_v7 = vadd.s32 %v2239_v57, %v2229_v45  ;;  %vm2258_vm0 = vc.u32 %v2256_v63, %v2252_v9  ;;  %v2948_v23 = vadd.s32 4294967169, %v2330_v21 }
 0x269   : > { %v2134_v42 = vand.u32 2147483647, %v2133_v50  ;;  %v2136_v0 = vcvt.s32.f32 %v2129_v51  ;;  %v2231_v5 = vshrl.u32 %v2226_v15, 16  ;;  %v2259_v22 = vsel %vm2258_vm0, 1, %v3088_v39  ;;  %v305_v15 = vpop.f32.mrf.mxu3 }
 0x26a   : > { %v2251_v54 = vshrl.u32 %v2247_v59, 16  ;;  %v2261_v47 = vadd.s32 %v2259_v22, %v2257_v25  ;;  %v2336_v56 = vadd.s32 1, %v2948_v23  ;;  %v2207_v58 = vsel %vm2203_vm15, %v2187_v18, %v4547_v29 }
 0x26b   : > { %v2137_v37 = vmul.f32 %v2136_v0, %v2134_v42  ;;  %v2209_v53 = vsel %vm2205_vm1, %v4553_v48, %v2208_v20  ;;  %v4632_v61 = vadd.s32 %v2240_v7, %v2231_v5  ;;  %v2160_v24 = vadd.s32 3, %v2143_v2 }
 0x26c   : > { %v2253_v17 = vshrl.u32 %v2248_v12, 16  ;;  %v2262_v1 = vadd.s32 %v2261_v47, %v2251_v54  ;;  %vm2337_vm14 = vcmp.gt.s32.totalorder %v2336_v56, 0  ;;  %v4634_v59 = vadd.s32 %v2256_v63, %v2252_v9 }
 0x26d   : > { %v2138_v8 = vxor.u32 2147483648, %v2137_v37  ;;  %v2333_v49 = vand.u32 8388607, %v2326_v13  ;;  %v2338_v46 = vsel %vm2337_vm14, %v2336_v56, 0  ;;  %v2210_v29 = vsel %vm2204_vm4, %v2207_v58, %v2209_v53 }
 0x26e   : > { %v2263_v28 = vadd.s32 %v2262_v1, %v2253_v17  ;;  %v2340_v33 = vand.u32 31, %v2338_v46  ;;  %vm2266_vm15 = vc.u32 %v4632_v61, %v4634_v59  ;;  %v4650_v12 = vadd.f32 %v4647_v60, %v305_v15 }
 0x26f   : > { %v2139_v48 = vsel %vm2018_vm2, %v2138_v8, %v2137_v37  ;;  %v4657_v41 = vand.u32 3, %v2160_v24  ;;  %v2264_v11 = vmul.u32 %v4587_v4, %v2210_v29  ;;  %v2334_v16 = vor.u32 8388608, %v2333_v49 }
 0x270   : > { %v2142_v6 = vsel %vm4608_vm9, %v4306_v10, %v2139_v48  ;;  %v2267_v45 = vadd.s32 1, %v2263_v28  ;;  %v4655_v3 = vsub.s32 32, %v2340_v33  ;;  %v4660_v31 = vshrl.u32 %v2338_v46, 5 }
 0x271   : > { %v2144_v30 = vmul.f32 %v2142_v6, %v2142_v6  ;;  %v2343_v35 = vshll.u32 %v3082_v34, %v2340_v33  ;;  %v2346_v4 = vshll.u32 %v3083_v36, %v2340_v33  ;;  %v2352_v26 = vshll.u32 %v3085_v40, %v2340_v33 }
 0x272   : > { %v2268_v55 = vsel %vm2266_vm15, %v2267_v45, %v2263_v28  ;;  %v2347_v9 = vshrl.u32 %v3084_v38, %v4655_v3  ;;  %v2350_v19 = vshrl.u32 %v3085_v40, %v4655_v3  ;;  %v2344_v57 = vshrl.u32 %v3083_v36, %v4655_v3 }
 0x273   : > { %v2145_v51 = vmul.f32 -0.001358992, %v2144_v30  ;;  %v2152_v27 = vmul.f32 -0.00019511016, %v2144_v30  ;;  %v2269_v32 = vadd.s32 %v2268_v55, %v2264_v11  ;;  %v2353_v63 = vshrl.u32 %v3086_v43, %v4655_v3 }
 0x274   : > { %v2349_v20 = vshll.u32 %v3084_v38, %v2340_v33  ;;  %v4674_v25 = vor.u32 %v2347_v9, %v2346_v4  ;;  %v2355_v7 = vshll.u32 %v3086_v43, %v2340_v33  ;;  %v2356_v23 = vshrl.u32 %v3087_v52, %v4655_v3 }
 0x275   : > { %v2146_v21 = vadd.f32 0.041655596, %v2145_v51  ;;  %v2153_v50 = vadd.f32 0.008332121, %v2152_v27  ;;  %v2270_v18 = vadd.s32 536870912, %v2269_v32  ;;  %v2354_v2 = vor.u32 %v2353_v63, %v2352_v26 }
 0x276   : > { %v4681_v22 = vor.u32 %v2350_v19, %v2349_v20  ;;  %v4683_v54 = vor.u32 %v2344_v57, %v2343_v35  ;;  %v2357_v47 = vor.u32 %v2356_v23, %v2355_v7  ;;  %v4685_v56 = vshll.u32 %v2334_v16, 8 }
 0x277   : > { %v2147_v42 = vmul.f32 %v2146_v21, %v2144_v30  ;;  %v2154_v0 = vmul.f32 %v2153_v50, %v2144_v30  ;;  %v4679_v5 = vshrl.u32 %v2270_v18, 30  ;;  %v2484_v37 = vand.u32 2139095040, %v4650_v12 }
 0x278   : > { %vm2361_vm1 = vcmp.lt.s32.totalorder %v4660_v31, 4  ;;  %vm2358_vm2 = vcmp.lt.s32.totalorder %v4660_v31, 1  ;;  %vm2360_vm4 = vcmp.lt.s32.totalorder %v4660_v31, 3  ;;  %vm2162_vm3 = vcmp.lt.s32.totalorder %v4657_v41, 2 }
 0x279   : > { %v2148_v58 = vadd.f32 -0.4999988, %v2147_v42  ;;  %v2155_v53 = vadd.f32 -0.16666654, %v2154_v0  ;;  %v2272_v24 = vshll.u32 %v4679_v5, 30  ;;  %v2370_v46 = vsel %vm2358_vm2, %v4674_v25, %v4681_v22 }
 0x27a   : > { %v2367_v17 = vsel %vm2361_vm1, %v2354_v2, 920167782  ;;  %v2371_v1 = vsel %vm2361_vm1, %v2357_v47, 1326507024  ;;  %vm2159_vm5 = vweird.f32 %v4306_v10  ;;  %vm2359_vm6 = vcmp.lt.s32.totalorder %v4660_v31, 2 }
 0x27b   : > { %v2149_v15 = vmul.f32 %v2148_v58, %v2144_v30  ;;  %v2156_v8 = vmul.f32 %v2155_v53, %v2144_v30  ;;  %v4697_v49 = vsub.s32 %v2269_v32, %v2272_v24  ;;  %v2366_v29 = vsel %vm2358_vm2, %v4683_v54, %v4674_v25 }
 0x27c   : > { %v2368_v28 = vsel %vm2360_vm4, %v4681_v22, %v2367_v17  ;;  %v2372_v33 = vsel %vm2360_vm4, %v2354_v2, %v2371_v1  ;;  %vm2163_vm8 = vcmp.eq.s32.totalorder %v4657_v41, 0  ;;  %vm2166_vm9 = vcmp.eq.s32.totalorder %v4657_v41, 2 }
 0x27d   : > { %v2150_v48 = vadd.f32 1.0, %v2149_v15  ;;  %v2157_v45 = vadd.f32 1.0, %v2156_v8  ;;  %vm2274_vm7 = vcmp.lt.s32.totalorder %v4697_v49, 0  ;;  %v2275_v30 = vsub.s32 0, %v4697_v49 }
 0x27e   : > { %v2373_v11 = vsel %vm2359_vm6, %v2370_v46, %v2372_v33  ;;  %v2481_v16 = vand.u32 2147483647, %v4650_v12  ;;  %v2369_v32 = vsel %vm2359_vm6, %v2366_v29, %v2368_v28  ;;  %v2376_v19 = vshrl.u32 %v4685_v56, 16 }
 0x27f   : > { %v2158_v55 = vmul.f32 %v2157_v45, %v2142_v6  ;;  %v2167_v35 = vxor.u32 2147483648, %v2150_v48  ;;  %v2276_v9 = vsel %vm2274_vm7, %v2275_v30, %v4697_v49  ;;  %v2377_v51 = vand.u32 65535, %v2373_v11 }
 0x280   : > { %v2277_v27 = vclz %v2276_v9  ;;  %v2378_v57 = vshrl.u32 %v2373_v11, 16  ;;  %v2265_v26 = vadd.s32 %v4634_v59, %v4632_v61  ;;  %v2375_v63 = vand.u32 65535, %v4685_v56 }
 0x281   : > { %v2164_v4 = vxor.u32 2147483648, %v2158_v55  ;;  %v2485_v21 = vshrl.u32 %v2484_v37, 23  ;;  %v2295_v6 = vsub.s32 4, %v4679_v5  ;;  %v2342_v18 = vshrl.u32 %v3082_v34, %v4655_v3 }
 0x282   : > { %v2946_v50 = vadd.s32 4294967294, %v2277_v27  ;;  %v2381_v20 = vmul.u32 %v2377_v51, %v2376_v19  ;;  %v2168_v7 = vsel %vm2166_vm9, %v2167_v35, %v2158_v55  ;;  %vm2173_vm10 = vcmp.lt.s32.totalorder %v4390_v14, 0 }
 0x283   : > { %v2165_v2 = vsel %vm2163_vm8, %v2150_v48, %v2164_v4  ;;  %v2380_v61 = vmul.u32 %v2378_v57, %v2375_v63  ;;  %v2399_v59 = vand.u32 65535, %v2369_v32  ;;  %v2379_v42 = vmul.u32 %v2377_v51, %v2375_v63 }
 0x284   : > { %v2169_v23 = vsel %vm2162_vm3, %v2165_v2, %v2168_v7  ;;  %vm2947_vm12 = vcmp.lt.s32.totalorder %v2946_v50, 0  ;;  %v2400_v0 = vshrl.u32 %v2369_v32, 16  ;;  %v2382_v37 = vmul.u32 %v2378_v57, %v2376_v19 }
 0x285   : > { %v2170_v3 = vsel %vm2159_vm5, nan, %v2169_v23  ;;  %v2280_v47 = vsel %vm2947_vm12, 0, %v2946_v50  ;;  %v2383_v58 = vshll.u32 %v2380_v61, 16  ;;  %vm4742_vm11 = vcmp.le.f32.partialorder %v2171_v62, 0.7853982 }
 0x286   : > { %v2281_v24 = vsub.s32 32, %v2280_v47  ;;  %v2285_v17 = vsub.s32 4294967266, %v2280_v47  ;;  %v2384_v1 = vshrl.u32 %v2380_v61, 16  ;;  %v2385_v41 = vshll.u32 %v2381_v20, 16  ;;  %2802 = vst [vmem:[%s3440_s8 + $0x58] sm:$0xff] %v2170_v3 }
 0x287   : > { %vm2387_vm13 = vc.u32 %v2379_v42, %v2383_v58  ;;  %v2389_v15 = vadd.s32 %v2383_v58, %v2379_v42  ;;  %v2402_v8 = vmul.u32 %v2400_v0, %v2375_v63  ;;  %v2403_v46 = vmul.u32 %v2399_v59, %v2376_v19 }
 0x288   : > { %v2282_v10 = vshll.u32 %v4697_v49, %v2280_v47  ;;  %v2283_v29 = vshrl.u32 %v2265_v26, %v2281_v24  ;;  %v2286_v28 = vadd.s32 127, %v2285_v17  ;;  %v2388_v33 = vsel %vm2387_vm13, 1, %v3088_v39  ;;  %v308_v17 = vpop.f32.mrf.mxu3 }
 0x289   : > { %v2390_v48 = vadd.s32 %v2388_v33, %v2382_v37  ;;  %vm2391_vm0 = vc.u32 %v2389_v15, %v2385_v41  ;;  %v2401_v62 = vmul.u32 %v2399_v59, %v2375_v63  ;;  %v2405_v45 = vshll.u32 %v2402_v8, 16 }
 0x28a   : > { %v2284_v30 = vor.u32 %v2283_v29, %v2282_v10  ;;  %v2287_v11 = vshll.u32 %v2286_v28, 23  ;;  %v2392_v55 = vsel %vm2391_vm0, 1, %v3088_v39  ;;  %v2404_v35 = vmul.u32 %v2400_v0, %v2376_v19 }
 0x28b   : > { %v2394_v9 = vadd.s32 %v2392_v55, %v2390_v48  ;;  %v2407_v51 = vshll.u32 %v2403_v46, 16  ;;  %vm2409_vm14 = vc.u32 %v2401_v62, %v2405_v45  ;;  %v2411_v27 = vadd.s32 %v2405_v45, %v2401_v62 }
 0x28c   : > { %v2288_v32 = vor.u32 4788187, %v2287_v11  ;;  %v2296_v49 = vsel %vm2173_vm10, %v2295_v6, %v4679_v5  ;;  %v2363_v57 = vsel %vm2361_vm1, %v4681_v22, 2102212464  ;;  %v2410_v4 = vsel %vm2409_vm14, 1, %v3088_v39 }
 0x28d   : > { %v2386_v26 = vshrl.u32 %v2381_v20, 16  ;;  %v2395_v63 = vadd.s32 %v2394_v9, %v2384_v1  ;;  %v2412_v50 = vadd.s32 %v2410_v4, %v2404_v35  ;;  %vm2413_vm15 = vc.u32 %v2411_v27, %v2407_v51 }
 0x28e   : > { %v2289_v19 = vand.u32 2147483647, %v2288_v32  ;;  %v2291_v2 = vcvt.s32.f32 %v2284_v30  ;;  %v2414_v7 = vsel %vm2413_vm15, 1, %v3088_v39  ;;  %v2951_v61 = vadd.s32 4294967169, %v2485_v21 }
 0x28f   : > { %v2298_v59 = vsel %vm4742_vm11, 0, %v2296_v49  ;;  %v2362_v5 = vsel %vm2358_vm2, %v2342_v18, %v4683_v54  ;;  %v2406_v6 = vshrl.u32 %v2402_v8, 16  ;;  %v2416_v22 = vadd.s32 %v2414_v7, %v2412_v50 }
 0x290   : > { %v2292_v23 = vmul.f32 %v2291_v2, %v2289_v19  ;;  %v2364_v20 = vsel %vm2360_vm4, %v4674_v25, %v2363_v57  ;;  %v4766_v42 = vadd.s32 %v2395_v63, %v2386_v26  ;;  %v2491_v0 = vadd.s32 1, %v2951_v61 }
 0x291   : > { %v2408_v3 = vshrl.u32 %v2403_v46, 16  ;;  %v2417_v47 = vadd.s32 %v2416_v22, %v2406_v6  ;;  %v4768_v37 = vadd.s32 %v2411_v27, %v2407_v51  ;;  %v2315_v58 = vadd.s32 3, %v2298_v59 }
 0x292   : > { %v2293_v21 = vxor.u32 2147483648, %v2292_v23  ;;  %vm2492_vm1 = vcmp.gt.s32.totalorder %v2491_v0, 0  ;;  %v2365_v54 = vsel %vm2359_vm6, %v2362_v5, %v2364_v20  ;;  %v2488_v25 = vand.u32 8388607, %v2481_v16 }
 0x293   : > { %v2418_v18 = vadd.s32 %v2417_v47, %v2408_v3  ;;  %v2493_v24 = vsel %vm2492_vm1, %v2491_v0, 0  ;;  %vm2421_vm2 = vc.u32 %v4766_v42, %v4768_v37  ;;  %v2419_v46 = vmul.u32 %v4685_v56, %v2365_v54 }
 0x294   : > { %v2294_v1 = vsel %vm2173_vm10, %v2293_v21, %v2292_v23  ;;  %v2495_v41 = vand.u32 31, %v2493_v24  ;;  %v4785_v29 = vadd.f32 %v4647_v60, %v308_v17  ;;  %v4787_v28 = vand.u32 3, %v2315_v58 }
 0x295   : > { %v2297_v15 = vsel %vm4742_vm11, %v4390_v14, %v2294_v1  ;;  %v2422_v8 = vadd.s32 1, %v2418_v18  ;;  %v2489_v30 = vor.u32 8388608, %v2488_v25  ;;  %v4789_v11 = vshrl.u32 %v2493_v24, 5 }
 0x296   : > { %v2299_v31 = vmul.f32 %v2297_v15, %v2297_v15  ;;  %v4782_v10 = vsub.s32 32, %v2495_v41  ;;  %v2507_v51 = vshll.u32 %v3085_v40, %v2495_v41  ;;  %v2501_v32 = vshll.u32 %v3083_v36, %v2495_v41 }
 0x297   : > { %v2423_v33 = vsel %vm2421_vm2, %v2422_v8, %v2418_v18  ;;  %v2504_v49 = vshll.u32 %v3084_v38, %v2495_v41  ;;  %v2498_v19 = vshll.u32 %v3082_v34, %v2495_v41  ;;  %v2510_v61 = vshll.u32 %v3086_v43, %v2495_v41 }
 0x298   : > { %v2300_v48 = vmul.f32 -0.001358992, %v2299_v31  ;;  %v2307_v62 = vmul.f32 -0.00019511016, %v2299_v31  ;;  %v2424_v45 = vadd.s32 %v2423_v33, %v2419_v46  ;;  %v2502_v53 = vshrl.u32 %v3084_v38, %v4782_v10 }
 0x299   : > { %v2505_v56 = vshrl.u32 %v3085_v40, %v4782_v10  ;;  %v2508_v55 = vshrl.u32 %v3086_v43, %v4782_v10  ;;  %v2499_v27 = vshrl.u32 %v3083_v36, %v4782_v10  ;;  %v2511_v57 = vshrl.u32 %v3087_v52, %v4782_v10 }
 0x29a   : > { %v2301_v60 = vadd.f32 0.041655596, %v2300_v48  ;;  %v2308_v35 = vadd.f32 0.008332121, %v2307_v62  ;;  %v2425_v9 = vadd.s32 536870912, %v2424_v45  ;;  %v4807_v2 = vor.u32 %v2502_v53, %v2501_v32 }
 0x29b   : > { %v2509_v50 = vor.u32 %v2508_v55, %v2507_v51  ;;  %v4809_v7 = vor.u32 %v2505_v56, %v2504_v49  ;;  %vm2318_vm4 = vcmp.eq.s32.totalorder %v4787_v28, 0  ;;  %vm2321_vm3 = vcmp.eq.s32.totalorder %v4787_v28, 2 }
 0x29c   : > { %v2302_v4 = vmul.f32 %v2301_v60, %v2299_v31  ;;  %v2309_v26 = vmul.f32 %v2308_v35, %v2299_v31  ;;  %v4804_v63 = vshrl.u32 %v2425_v9, 30  ;;  %v4815_v22 = vor.u32 %v2499_v27, %v2498_v19 }
 0x29d   : > { %v2512_v23 = vor.u32 %v2511_v57, %v2510_v61  ;;  %vm2513_vm5 = vcmp.lt.s32.totalorder %v4789_v11, 1  ;;  %vm2516_vm6 = vcmp.lt.s32.totalorder %v4789_v11, 4  ;;  %vm2317_vm7 = vcmp.lt.s32.totalorder %v4787_v28, 2 }
 0x29e   : > { %v2303_v59 = vadd.f32 -0.4999988, %v2302_v4  ;;  %v2310_v5 = vadd.f32 -0.16666654, %v2309_v26  ;;  %v2427_v6 = vshll.u32 %v4804_v63, 30  ;;  %vm2314_vm8 = vweird.f32 %v4390_v14 }
 0x29f   : > { %v2522_v47 = vsel %vm2516_vm6, %v2509_v50, 920167782  ;;  %vm2515_vm9 = vcmp.lt.s32.totalorder %v4789_v11, 3  ;;  %v2525_v21 = vsel %vm2513_vm5, %v4807_v2, %v4809_v7  ;;  %v4828_v58 = vshll.u32 %v2489_v30, 8 }
 0x2a0   : > { %v2304_v20 = vmul.f32 %v2303_v59, %v2299_v31  ;;  %v2311_v0 = vmul.f32 %v2310_v5, %v2299_v31  ;;  %v2428_v3 = vsub.s32 %v2424_v45, %v2427_v6  ;;  %v2639_v54 = vand.u32 2139095040, %v4785_v29 }
 0x2a1   : > { %vm2514_vm12 = vcmp.lt.s32.totalorder %v4789_v11, 2  ;;  %v2521_v1 = vsel %vm2513_vm5, %v4815_v22, %v4807_v2  ;;  %v2523_v25 = vsel %vm2515_vm9, %v4809_v7, %v2522_v47  ;;  %v2526_v41 = vsel %vm2516_vm6, %v2512_v23, 1326507024 }
 0x2a2   : > { %v2305_v18 = vadd.f32 1.0, %v2304_v20  ;;  %v2312_v24 = vadd.f32 1.0, %v2311_v0  ;;  %vm2429_vm10 = vcmp.lt.s32.totalorder %v2428_v3, 0  ;;  %v2430_v17 = vsub.s32 0, %v2428_v3 }
 0x2a3   : > { %v2527_v33 = vsel %vm2515_vm9, %v2509_v50, %v2526_v41  ;;  %v2530_v45 = vand.u32 65535, %v4828_v58  ;;  %v2531_v30 = vshrl.u32 %v4828_v58, 16  ;;  %v2524_v56 = vsel %vm2514_vm12, %v2521_v1, %v2523_v25 }
 0x2a4   : > { %v2313_v8 = vmul.f32 %v2312_v24, %v2297_v15  ;;  %v2322_v31 = vxor.u32 2147483648, %v2305_v18  ;;  %v2431_v46 = vsel %vm2429_vm10, %v2430_v17, %v2428_v3  ;;  %v2528_v62 = vsel %vm2514_vm12, %v2525_v21, %v2527_v33 }
 0x2a5   : > { %v2432_v48 = vclz %v2431_v46  ;;  %v2532_v55 = vand.u32 65535, %v2528_v62  ;;  %v2533_v60 = vshrl.u32 %v2528_v62, 16  ;;  %v2420_v15 = vadd.s32 %v4768_v37, %v4766_v42 }
 0x2a6   : > { %v2319_v53 = vxor.u32 2147483648, %v2313_v8  ;;  %v2636_v9 = vand.u32 2147483647, %v4785_v29  ;;  %v2640_v51 = vshrl.u32 %v2639_v54, 23  ;;  %v2323_v32 = vsel %vm2321_vm3, %v2322_v31, %v2313_v8 }
 0x2a7   : > { %v2949_v35 = vadd.s32 4294967294, %v2432_v48  ;;  %v2535_v49 = vmul.u32 %v2533_v60, %v2530_v45  ;;  %v2536_v57 = vmul.u32 %v2532_v55, %v2531_v30  ;;  %v2554_v26 = vand.u32 65535, %v2524_v56 }
 0x2a8   : > { %v2320_v27 = vsel %vm2318_vm4, %v2305_v18, %v2319_v53  ;;  %v2555_v50 = vshrl.u32 %v2524_v56, 16  ;;  %v2534_v19 = vmul.u32 %v2532_v55, %v2530_v45  ;;  %v2497_v6 = vshrl.u32 %v3082_v34, %v4782_v10 }
 0x2a9   : > { %v2324_v4 = vsel %vm2317_vm7, %v2320_v27, %v2323_v32  ;;  %vm2950_vm11 = vcmp.lt.s32.totalorder %v2949_v35, 0  ;;  %v2538_v61 = vshll.u32 %v2535_v49, 16  ;;  %v2537_v23 = vmul.u32 %v2533_v60, %v2531_v30 }
 0x2aa   : > { %v2325_v42 = vsel %vm2314_vm8, nan, %v2324_v4  ;;  %v2435_v37 = vsel %vm2950_vm11, 0, %v2949_v35  ;;  %v2540_v0 = vshll.u32 %v2536_v57, 16  ;;  %vm2328_vm0 = vcmp.lt.s32.totalorder %v4522_v44, 0 }
 0x2ab   : > { %v2436_v59 = vsub.s32 32, %v2435_v37  ;;  %v2440_v5 = vsub.s32 4294967266, %v2435_v37  ;;  %2803 = vst [vmem:[%s3440_s8 + $0x60] sm:$0xff] %v2325_v42  ;;  %v2437_v20 = vshll.u32 %v2428_v3, %v2435_v37  ;;  %vm2542_vm13 = vc.u32 %v2534_v19, %v2538_v61 }
 0x2ac   : > { %v2544_v28 = vadd.s32 %v2538_v61, %v2534_v19  ;;  %v2543_v14 = vsel %vm2542_vm13, 1, %v3088_v39  ;;  %v2557_v54 = vmul.u32 %v2555_v50, %v2530_v45  ;;  %v2556_v24 = vmul.u32 %v2554_v26, %v2530_v45 }
 0x2ad   : > { %v2438_v47 = vshrl.u32 %v2420_v15, %v2436_v59  ;;  %v2441_v21 = vadd.s32 127, %v2440_v5  ;;  %v2545_v18 = vadd.s32 %v2543_v14, %v2537_v23  ;;  %v2558_v17 = vmul.u32 %v2554_v26, %v2531_v30 }
 0x2ae   : > { %vm2546_vm14 = vc.u32 %v2544_v28, %v2540_v0  ;;  %v2560_v41 = vshll.u32 %v2557_v54, 16  ;;  %v2450_v3 = vsub.s32 4, %v4804_v63  ;;  %v2539_v8 = vshrl.u32 %v2535_v49, 16 }
 0x2af   : > { %v2439_v1 = vor.u32 %v2438_v47, %v2437_v20  ;;  %v2442_v25 = vshll.u32 %v2441_v21, 23  ;;  %v2547_v10 = vsel %vm2546_vm14, 1, %v3088_v39  ;;  %v2559_v46 = vmul.u32 %v2555_v50, %v2531_v30 }
 0x2b0   : > { %v2549_v31 = vadd.s32 %v2547_v10, %v2545_v18  ;;  %v2562_v48 = vshll.u32 %v2558_v17, 16  ;;  %vm2564_vm15 = vc.u32 %v2556_v24, %v2560_v41  ;;  %v2566_v62 = vadd.s32 %v2560_v41, %v2556_v24 }
 0x2b1   : > { %v2443_v33 = vor.u32 4788187, %v2442_v25  ;;  %v2518_v53 = vsel %vm2516_vm6, %v4809_v7, 2102212464  ;;  %v2565_v56 = vsel %vm2564_vm15, 1, %v3088_v39  ;;  %v2954_v55 = vadd.s32 4294967169, %v2640_v51 }
 0x2b2   : > { %v2550_v45 = vadd.s32 %v2549_v31, %v2539_v8  ;;  %v2446_v15 = vcvt.s32.f32 %v2439_v1  ;;  %v2567_v35 = vadd.s32 %v2565_v56, %v2559_v46  ;;  %vm2568_vm1 = vc.u32 %v2566_v62, %v2562_v48 }
 0x2b3   : > { %v2444_v60 = vand.u32 2147483647, %v2443_v33  ;;  %v2517_v30 = vsel %vm2513_vm5, %v2497_v6, %v4815_v22  ;;  %v2541_v27 = vshrl.u32 %v2536_v57, 16  ;;  %v2569_v32 = vsel %vm2568_vm1, 1, %v3088_v39 }
 0x2b4   : > { %v2646_v49 = vadd.s32 1, %v2954_v55  ;;  %v2519_v7 = vsel %vm2515_vm9, %v4807_v2, %v2518_v53  ;;  %v2561_v26 = vshrl.u32 %v2557_v54, 16  ;;  %v2571_v50 = vadd.s32 %v2569_v32, %v2567_v35 }
 0x2b5   : > { %v2447_v4 = vmul.f32 %v2446_v15, %v2444_v60  ;;  %v2451_v51 = vsel %vm2328_vm0, %v2450_v3, %v4804_v63  ;;  %v4881_v42 = vadd.s32 %v2550_v45, %v2541_v27  ;;  %v2563_v22 = vshrl.u32 %v2558_v17, 16 }
 0x2b6   : > { %vm2647_vm2 = vcmp.gt.s32.totalorder %v2646_v49, 0  ;;  %v2572_v57 = vadd.s32 %v2571_v50, %v2561_v26  ;;  %v2520_v61 = vsel %vm2514_vm12, %v2517_v30, %v2519_v7  ;;  %v4885_v59 = vadd.s32 %v2566_v62, %v2562_v48 }
 0x2b7   : > { %v2448_v37 = vxor.u32 2147483648, %v2447_v4  ;;  %v2648_v19 = vsel %vm2647_vm2, %v2646_v49, 0  ;;  %vm4889_vm4 = vcmp.le.f32.partialorder %v2326_v13, 0.7853982  ;;  %v2643_v23 = vand.u32 8388607, %v2636_v9 }
 0x2b8   : > { %v2650_v5 = vand.u32 31, %v2648_v19  ;;  %v2573_v6 = vadd.s32 %v2572_v57, %v2563_v22  ;;  %v2453_v20 = vsel %vm4889_vm4, 0, %v2451_v51  ;;  %vm2576_vm3 = vc.u32 %v4881_v42, %v4885_v59 }
 0x2b9   : > { %v2449_v63 = vsel %vm2328_vm0, %v2448_v37, %v2447_v4  ;;  %v2574_v28 = vmul.u32 %v4828_v58, %v2520_v61  ;;  %v4917_v41 = vshrl.u32 %v2648_v19, 5  ;;  %vm2469_vm10 = vweird.f32 %v4522_v44 }
 0x2ba   : > { %v2452_v11 = vsel %vm4889_vm4, %v4522_v44, %v2449_v63  ;;  %v4904_v13 = vsub.s32 32, %v2650_v5  ;;  %v2577_v47 = vadd.s32 1, %v2573_v6  ;;  %v2653_v21 = vshll.u32 %v3082_v34, %v2650_v5 }
 0x2bb   : > { %v2454_v0 = vmul.f32 %v2452_v11, %v2452_v11  ;;  %v2656_v54 = vshll.u32 %v3083_v36, %v2650_v5  ;;  %v2659_v3 = vshll.u32 %v3084_v38, %v2650_v5  ;;  %v2662_v8 = vshll.u32 %v3085_v40, %v2650_v5 }
 0x2bc   : > { %v2654_v14 = vshrl.u32 %v3083_v36, %v4904_v13  ;;  %v2657_v18 = vshrl.u32 %v3084_v38, %v4904_v13  ;;  %v2660_v24 = vshrl.u32 %v3085_v40, %v4904_v13  ;;  %v2578_v25 = vsel %vm2576_vm3, %v2577_v47, %v2573_v6 }
 0x2bd   : > { %v2455_v17 = vmul.f32 -0.001358992, %v2454_v0  ;;  %v2462_v1 = vmul.f32 -0.00019511016, %v2454_v0  ;;  %v2663_v58 = vshrl.u32 %v3086_v43, %v4904_v13  ;;  %v2579_v10 = vadd.s32 %v2578_v25, %v2574_v28 }
 0x2be   : > { %v4921_v46 = vor.u32 %v2654_v14, %v2653_v21  ;;  %v4923_v33 = vor.u32 %v2657_v18, %v2656_v54  ;;  %v2665_v53 = vshll.u32 %v3086_v43, %v2650_v5  ;;  %v2666_v45 = vshrl.u32 %v3087_v52, %v4904_v13 }
 0x2bf   : > { %v2456_v36 = vadd.f32 0.041655596, %v2455_v17  ;;  %v2463_v31 = vadd.f32 0.008332121, %v2462_v1  ;;  %v2580_v48 = vadd.s32 536870912, %v2579_v10  ;;  %v2664_v62 = vor.u32 %v2663_v58, %v2662_v8 }
 0x2c0   : > { %v4928_v60 = vor.u32 %v2660_v24, %v2659_v3  ;;  %v2470_v38 = vadd.s32 3, %v2453_v20  ;;  %v2644_v40 = vor.u32 8388608, %v2643_v23  ;;  %v2667_v35 = vor.u32 %v2666_v45, %v2665_v53 }
 0x2c1   : > { %v2457_v56 = vmul.f32 %v2456_v36, %v2454_v0  ;;  %v2464_v55 = vmul.f32 %v2463_v31, %v2454_v0  ;;  %v4930_v15 = vshrl.u32 %v2580_v48, 30  ;;  %vm2668_vm5 = vcmp.lt.s32.totalorder %v4917_v41, 1 }
 0x2c2   : > { %vm2671_vm6 = vcmp.lt.s32.totalorder %v4917_v41, 4  ;;  %vm2670_vm7 = vcmp.lt.s32.totalorder %v4917_v41, 3  ;;  %v2676_v52 = vsel %vm2668_vm5, %v4921_v46, %v4923_v33  ;;  %v2680_v26 = vsel %vm2668_vm5, %v4923_v33, %v4928_v60 }
 0x2c3   : > { %v2458_v30 = vadd.f32 -0.4999988, %v2457_v56  ;;  %v2465_v27 = vadd.f32 -0.16666654, %v2464_v55  ;;  %v2582_v43 = vshll.u32 %v4930_v15, 30  ;;  %v2471_v50 = vand.u32 3, %v2470_v38 }
 0x2c4   : > { %v2677_v32 = vsel %vm2671_vm6, %v2664_v62, 920167782  ;;  %v2681_v37 = vsel %vm2671_vm6, %v2667_v35, 1326507024  ;;  %v4951_v22 = vshll.u32 %v2644_v40, 8  ;;  %vm2669_vm8 = vcmp.lt.s32.totalorder %v4917_v41, 2 }
 0x2c5   : > { %v2459_v49 = vmul.f32 %v2458_v30, %v2454_v0  ;;  %v2466_v4 = vmul.f32 %v2465_v27, %v2454_v0  ;;  %v2678_v7 = vsel %vm2670_vm7, %v4928_v60, %v2677_v32  ;;  %v2583_v51 = vsub.s32 %v2579_v10, %v2582_v43 }
 0x2c6   : > { %v2682_v61 = vsel %vm2670_vm7, %v2664_v62, %v2681_v37  ;;  %v2679_v2 = vsel %vm2669_vm8, %v2676_v52, %v2678_v7  ;;  %vm2472_vm12 = vcmp.lt.s32.totalorder %v2471_v50, 2  ;;  %v2685_v47 = vand.u32 65535, %v4951_v22 }
 0x2c7   : > { %v2460_v57 = vadd.f32 1.0, %v2459_v49  ;;  %v2467_v19 = vadd.f32 1.0, %v2466_v4  ;;  %vm2584_vm9 = vcmp.lt.s32.totalorder %v2583_v51, 0  ;;  %v2585_v5 = vsub.s32 0, %v2583_v51 }
 0x2c8   : > { %v2683_v63 = vsel %vm2669_vm8, %v2680_v26, %v2682_v61  ;;  %vm2473_vm11 = vcmp.eq.s32.totalorder %v2471_v50, 0  ;;  %v2686_v54 = vshrl.u32 %v4951_v22, 16  ;;  %vm2476_vm13 = vcmp.eq.s32.totalorder %v2471_v50, 2 }
 0x2c9   : > { %v2468_v6 = vmul.f32 %v2467_v19, %v2452_v11  ;;  %v2477_v23 = vxor.u32 2147483648, %v2460_v57  ;;  %v2687_v20 = vand.u32 65535, %v2683_v63  ;;  %v2688_v0 = vshrl.u32 %v2683_v63, 16 }
 0x2ca   : > { %v2586_v28 = vsel %vm2584_vm9, %v2585_v5, %v2583_v51  ;;  %v2709_v24 = vand.u32 65535, %v2679_v2  ;;  %v2710_v17 = vshrl.u32 %v2679_v2, 16  ;;  %v2575_v3 = vadd.s32 %v4885_v59, %v4881_v42 }
 0x2cb   : > { %v2474_v21 = vxor.u32 2147483648, %v2468_v6  ;;  %v2587_v14 = vclz %v2586_v28  ;;  %v2690_v18 = vmul.u32 %v2688_v0, %v2685_v47  ;;  %v2478_v11 = vsel %vm2476_vm13, %v2477_v23, %v2468_v6 }
 0x2cc   : > { %v2691_v58 = vmul.u32 %v2687_v20, %v2686_v54  ;;  %v2689_v8 = vmul.u32 %v2687_v20, %v2685_v47  ;;  %v2692_v48 = vmul.u32 %v2688_v0, %v2686_v54  ;;  %v2712_v56 = vmul.u32 %v2710_v17, %v2685_v47 }
 0x2cd   : > { %v2475_v1 = vsel %vm2473_vm11, %v2460_v57, %v2474_v21  ;;  %v2952_v25 = vadd.s32 4294967294, %v2587_v14  ;;  %v2693_v36 = vshll.u32 %v2690_v18, 16  ;;  %v2711_v35 = vmul.u32 %v2709_v24, %v2685_v47 }
 0x2ce   : > { %v2479_v10 = vsel %vm2472_vm12, %v2475_v1, %v2478_v11  ;;  %v2695_v62 = vshll.u32 %v2691_v58, 16  ;;  %v2713_v59 = vmul.u32 %v2709_v24, %v2686_v54  ;;  %v2715_v52 = vshll.u32 %v2712_v56, 16 }
 0x2cf   : > { %v2480_v31 = vsel %vm2469_vm10, nan, %v2479_v10  ;;  %vm2953_vm0 = vcmp.lt.s32.totalorder %v2952_v25, 0  ;;  %vm2697_vm14 = vc.u32 %v2689_v8, %v2693_v36  ;;  %v2699_v45 = vadd.s32 %v2693_v36, %v2689_v8 }
 0x2d0   : > { %v2590_v53 = vsel %vm2953_vm0, 0, %v2952_v25  ;;  %2804 = vst [vmem:[%s3440_s8 + $0x68] sm:$0xff] %v2480_v31  ;;  %v2698_v40 = vsel %vm2697_vm14, 1, %v3088_v39  ;;  %v2694_v32 = vshrl.u32 %v2690_v18, 16  ;;  %v2714_v4 = vmul.u32 %v2710_v17, %v2686_v54 }
 0x2d1   : > { %v2591_v55 = vsub.s32 32, %v2590_v53  ;;  %v2595_v38 = vsub.s32 4294967266, %v2590_v53  ;;  %v2592_v30 = vshll.u32 %v2583_v51, %v2590_v53  ;;  %v2700_v42 = vadd.s32 %v2698_v40, %v2692_v48 }
 0x2d2   : > { %vm2701_vm15 = vc.u32 %v2699_v45, %v2695_v62  ;;  %v2717_v7 = vshll.u32 %v2713_v59, 16  ;;  %vm2719_vm1 = vc.u32 %v2711_v35, %v2715_v52  ;;  %v2721_v37 = vadd.s32 %v2715_v52, %v2711_v35 }
 0x2d3   : > { %v2593_v27 = vshrl.u32 %v2575_v3, %v2591_v55  ;;  %v2596_v44 = vadd.s32 127, %v2595_v38  ;;  %v2702_v43 = vsel %vm2701_vm15, 1, %v3088_v39  ;;  %v2720_v19 = vsel %vm2719_vm1, 1, %v3088_v39 }
 0x2d4   : > { %v2704_v49 = vadd.s32 %v2702_v43, %v2700_v42  ;;  %v2673_v61 = vsel %vm2671_vm6, %v4928_v60, 2102212464  ;;  %v2722_v5 = vadd.s32 %v2720_v19, %v2714_v4  ;;  %vm2723_vm2 = vc.u32 %v2721_v37, %v2717_v7 }
 0x2d5   : > { %v2594_v26 = vor.u32 %v2593_v27, %v2592_v30  ;;  %v2597_v50 = vshll.u32 %v2596_v44, 23  ;;  %v2652_v2 = vshrl.u32 %v3082_v34, %v4904_v13  ;;  %v2696_v63 = vshrl.u32 %v2691_v58, 16 }
 0x2d6   : > { %v2705_v57 = vadd.s32 %v2704_v49, %v2694_v32  ;;  %v2724_v6 = vsel %vm2723_vm2, 1, %v3088_v39  ;;  %v2716_v0 = vshrl.u32 %v2712_v56, 16  ;;  %v2674_v60 = vsel %vm2670_vm7, %v4923_v33, %v2673_v61 }
 0x2d7   : > { %v2598_v51 = vor.u32 4788187, %v2597_v50  ;;  %v2601_v20 = vcvt.s32.f32 %v2594_v26  ;;  %v2726_v28 = vadd.s32 %v2724_v6, %v2722_v5  ;;  %v2672_v47 = vsel %vm2668_vm5, %v2652_v2, %v4921_v46 }
 0x2d8   : > { %v2706_v21 = vadd.s32 %v2705_v57, %v2696_v63  ;;  %v2718_v54 = vshrl.u32 %v2713_v59, 16  ;;  %v2725_v34 = vadd.s32 %v2721_v37, %v2717_v7  ;;  %v2675_v39 = vsel %vm2669_vm8, %v2672_v47, %v2674_v60 }
 0x2d9   : > { %v2599_v23 = vand.u32 2147483647, %v2598_v51  ;;  %v2727_v18 = vadd.s32 %v2726_v28, %v2716_v0  ;;  %vm2483_vm4 = vcmp.lt.s32.totalorder %v4650_v12, 0  ;;  %vm4988_vm5 = vcmp.le.f32.partialorder %v2481_v16, 0.7853982 }
 0x2da   : > { %vm2731_vm3 = vc.u32 %v2706_v21, %v2725_v34  ;;  %v2605_v1 = vsub.s32 4, %v4930_v15  ;;  %v2729_v41 = vmul.u32 %v4951_v22, %v2675_v39  ;;  %vm2624_vm12 = vweird.f32 %v4650_v12 }
 0x2db   : > { %v2602_v14 = vmul.f32 %v2601_v20, %v2599_v23  ;;  %v2728_v24 = vadd.s32 %v2727_v18, %v2718_v54  ;;  %v2730_v51 = vadd.s32 %v2725_v34, %v2706_v21  ;;  %vm2638_vm11 = vcmp.lt.s32.totalorder %v4785_v29, 0 }
 0x2dc   : > { %v2606_v16 = vsel %vm2483_vm4, %v2605_v1, %v4930_v15  ;;  %vm2637_vm13 = vcmp.le.f32.partialorder %v2636_v9, 0.7853982  ;;  %vm2779_vm1 = vweird.f32 %v4785_v29 }
 0x2dd   : > { %v2603_v13 = vxor.u32 2147483648, %v2602_v14  ;;  %v2732_v17 = vadd.s32 1, %v2728_v24  ;;  %v2608_v53 = vsel %vm4988_vm5, 0, %v2606_v16 }
 0x2de   : > { %v2625_v22 = vadd.s32 3, %v2608_v53 }
 0x2df   : > { %v2604_v33 = vsel %vm2483_vm4, %v2603_v13, %v2602_v14  ;;  %v2733_v58 = vsel %vm2731_vm3, %v2732_v17, %v2728_v24 }
 0x2e0   : > { %v2607_v11 = vsel %vm4988_vm5, %v4650_v12, %v2604_v33  ;;  %v2734_v10 = vadd.s32 %v2733_v58, %v2729_v41  ;;  %v2626_v44 = vand.u32 3, %v2625_v22 }
 0x2e1   : > { %v2609_v25 = vmul.f32 %v2607_v11, %v2607_v11 }
 0x2e2   : > { %v2735_v36 = vadd.s32 536870912, %v2734_v10  ;;  %vm2628_vm7 = vcmp.eq.s32.totalorder %v2626_v44, 0  ;;  %vm2631_vm8 = vcmp.eq.s32.totalorder %v2626_v44, 2  ;;  %vm2627_vm9 = vcmp.lt.s32.totalorder %v2626_v44, 2 }
 0x2e3   : > { %v2610_v3 = vmul.f32 -0.001358992, %v2609_v25  ;;  %v2617_v8 = vmul.f32 -0.00019511016, %v2609_v25 }
 0x2e4   : > { %v2736_v62 = vshrl.u32 %v2735_v36, 30 }
 0x2e5   : > { %v2611_v31 = vadd.f32 0.041655596, %v2610_v3  ;;  %v2618_v48 = vadd.f32 0.008332121, %v2617_v8 }
 0x2e6   : > { %v2737_v55 = vshll.u32 %v2736_v62, 30  ;;  %v2760_v21 = vsub.s32 4, %v2736_v62 }
 0x2e7   : > { %v2612_v45 = vmul.f32 %v2611_v31, %v2609_v25  ;;  %v2619_v56 = vmul.f32 %v2618_v48, %v2609_v25 }
 0x2e8   : > { %v2738_v35 = vsub.s32 %v2734_v10, %v2737_v55  ;;  %v2761_v39 = vsel %vm2638_vm11, %v2760_v21, %v2736_v62 }
 0x2e9   : > { %v2613_v38 = vadd.f32 -0.4999988, %v2612_v45  ;;  %v2620_v40 = vadd.f32 -0.16666654, %v2619_v56  ;;  %v2763_v33 = vsel %vm2637_vm13, 0, %v2761_v39 }
 0x2ea   : > { %vm2739_vm6 = vcmp.lt.s32.totalorder %v2738_v35, 0  ;;  %v2740_v59 = vsub.s32 0, %v2738_v35 }
 0x2eb   : > { %v2614_v30 = vmul.f32 %v2613_v38, %v2609_v25  ;;  %v2621_v42 = vmul.f32 %v2620_v40, %v2609_v25  ;;  %v2780_v25 = vadd.s32 3, %v2763_v33 }
 0x2ec   : > { %v2741_v43 = vsel %vm2739_vm6, %v2740_v59, %v2738_v35 }
 0x2ed   : > { %v2615_v27 = vadd.f32 1.0, %v2614_v30  ;;  %v2622_v15 = vadd.f32 1.0, %v2621_v42  ;;  %v2742_v49 = vclz %v2741_v43  ;;  %v2781_v8 = vand.u32 3, %v2780_v25 }
 0x2ef   : > { %v2623_v52 = vmul.f32 %v2622_v15, %v2607_v11  ;;  %v2632_v32 = vxor.u32 2147483648, %v2615_v27  ;;  %v2955_v7 = vadd.s32 4294967294, %v2742_v49  ;;  %vm2783_vm0 = vcmp.eq.s32.totalorder %v2781_v8, 0 }
 0x2f0   : > { %vm2786_vm14 = vcmp.eq.s32.totalorder %v2781_v8, 2  ;;  %vm2782_vm15 = vcmp.lt.s32.totalorder %v2781_v8, 2 }
 0x2f1   : > { %v2629_v4 = vxor.u32 2147483648, %v2623_v52  ;;  %v2633_v50 = vsel %vm2631_vm8, %v2632_v32, %v2623_v52  ;;  %vm2956_vm10 = vcmp.lt.s32.totalorder %v2955_v7, 0 }
 0x2f2   : > { %v2745_v57 = vsel %vm2956_vm10, 0, %v2955_v7 }
 0x2f3   : > { %v2630_v26 = vsel %vm2628_vm7, %v2615_v27, %v2629_v4  ;;  %v2746_v61 = vsub.s32 32, %v2745_v57  ;;  %v2750_v5 = vsub.s32 4294967266, %v2745_v57  ;;  %v2747_v2 = vshll.u32 %v2738_v35, %v2745_v57 }
 0x2f4   : > { %v2634_v37 = vsel %vm2627_vm9, %v2630_v26, %v2633_v50 }
 0x2f5   : > { %v2635_v19 = vsel %vm2624_vm12, nan, %v2634_v37  ;;  %v2748_v63 = vshrl.u32 %v2730_v51, %v2746_v61  ;;  %v2751_v6 = vadd.s32 127, %v2750_v5 }
 0x2f6   : > { %2805 = vst [vmem:[%s3440_s8 + $0x70] sm:$0xff] %v2635_v19 }
 0x2f7   : > { %v2749_v23 = vor.u32 %v2748_v63, %v2747_v2  ;;  %v2752_v20 = vshll.u32 %v2751_v6, 23 }
 0x2f9   : > { %v2753_v0 = vor.u32 4788187, %v2752_v20  ;;  %v2756_v47 = vcvt.s32.f32 %v2749_v23 }
 0x2fb   : > { %v2754_v28 = vand.u32 2147483647, %v2753_v0 }
 0x2fd   : > { %v2757_v60 = vmul.f32 %v2756_v47, %v2754_v28 }
 0x2ff   : > { %v2758_v14 = vxor.u32 2147483648, %v2757_v60 }
 0x301   : > { %v2759_v12 = vsel %vm2638_vm11, %v2758_v14, %v2757_v60 }
 0x302   : > { %v2762_v54 = vsel %vm2637_vm13, %v4785_v29, %v2759_v12 }
 0x303   : > { %v2764_v18 = vmul.f32 %v2762_v54, %v2762_v54 }
 0x305   : > { %v2765_v34 = vmul.f32 -0.001358992, %v2764_v18  ;;  %v2772_v13 = vmul.f32 -0.00019511016, %v2764_v18 }
 0x307   : > { %v2766_v24 = vadd.f32 0.041655596, %v2765_v34  ;;  %v2773_v46 = vadd.f32 0.008332121, %v2772_v13 }
 0x309   : > { %v2767_v17 = vmul.f32 %v2766_v24, %v2764_v18  ;;  %v2774_v1 = vmul.f32 %v2773_v46, %v2764_v18 }
 0x30b   : > { %v2768_v11 = vadd.f32 -0.4999988, %v2767_v17  ;;  %v2775_v41 = vadd.f32 -0.16666654, %v2774_v1 }
 0x30d   : > { %v2769_v58 = vmul.f32 %v2768_v11, %v2764_v18  ;;  %v2776_v9 = vmul.f32 %v2775_v41, %v2764_v18 }
 0x30f   : > { %v2770_v10 = vadd.f32 1.0, %v2769_v58  ;;  %v2777_v3 = vadd.f32 1.0, %v2776_v9 }
 0x311   : > { %v2778_v16 = vmul.f32 %v2777_v3, %v2762_v54  ;;  %v2787_v36 = vxor.u32 2147483648, %v2770_v10 }
 0x313   : > { %v2784_v31 = vxor.u32 2147483648, %v2778_v16  ;;  %v2788_v62 = vsel %vm2786_vm14, %v2787_v36, %v2778_v16 }
 0x315   : > { %v2785_v48 = vsel %vm2783_vm0, %v2770_v10, %v2784_v31 }
 0x316   : > { %v2789_v53 = vsel %vm2782_vm15, %v2785_v48, %v2788_v62 }
 0x317   : > { %v2790_v45 = vsel %vm2779_vm1, nan, %v2789_v53 }
 0x318   : > { %2806 = vst [vmem:[%s3440_s8 + $0x78] sm:$0xff] %v2790_v45 }
 0x319   : > { %3045 = shalt.err (!%p3042_p3)
}
 0x31a   : > { %s3089_s6 = smov 128   ;;  %s3090_s8 = smov 8  }
 0x31b   : > { %2966 = dma.vmem_to_hbm [thread:$0]  (%p3149_p5), %s2821_s28, 2048, %s2823_s29, %s2808_s16, %s3089_s6, %s3089_s6, %s3090_s8  }
 0x31c PF: > { %p2972_p4 = scmp.ge.s32.totalorder %s3080_s15, 2  ;;  %s2837_s17 = sand.u32 1, %s3068_s12  }
 0x31d   : > { %s2838_s19 = scalar_lea.sflag [#allocation3], %s2837_s17 }
 0x31e   : > { %p2969_p7 = pnand %p2972_p4, %p3153_p6 }
 0x320   : > { %p2970_p8 = pneg %p2969_p7 }
 0x322   : > { %3063 = dma.done.wait (%p2970_p8), %s2838_s19, 2048  }
 0x323   : > { %3065 = vsyncadd (%p2970_p8), %s2838_s19, 4294965248  ;;  %p13_p9 = scmp.ge.s32.totalorder %s3136_s18, 4   ;;  %s5078_s12 = smov %s3072_s13 }
 0x324   : > { %s5079_s13 = smov %s3076_s14  ;;  %s5080_s14 = smov %s3147_s21 }
 0x325   : > { %s5081_s15 = smov %s3136_s18  ;;  %15 = sbr.rel (!%p13_p9) target bundleno = 3 (0x3), region = 67 }
 0x32a   :  { %2844 = vsyncpa [#allocation3], 1 }
 0x32b   :  { %2846 = vsyncpa [#allocation3 + $0x1], 1 }

</bundles_post_ra>
